<compile_context>
chip_gen: v6e
topology: v6e:2x2x1
jax: 0.10.0
libtpu: 0.0.40
codegen_flags: <defaults>
</compile_context>

<pallas_src>
import functools
import math

import jax
import jax.numpy as jnp
from jax.experimental import pallas as pl
from jax.experimental.pallas import tpu as pltpu

ATTN_EPS = 1e-6   # fast_transformers LinearAttention eps
LN_EPS = 1e-5     # torch.nn.LayerNorm default eps


# ----------------------------- shared math helpers ----------------------------- #

def _elu_feature_map(x):
    # elu(x) + 1 (alpha=1), fast_transformers.feature_maps.elu_feature_map
    return jnp.where(x > 0, x + 1.0, jnp.exp(jnp.minimum(x, 0.0)))


def _gelu(x):
    # tanh-approximate GELU (see TODO above)
    c = math.sqrt(2.0 / math.pi)
    return 0.5 * x * (1.0 + jnp.tanh(c * (x + 0.044715 * x * x * x)))


def _layer_norm(x, gamma, beta):
    mu = jnp.mean(x, axis=-1, keepdims=True)
    xc = x - mu
    var = jnp.mean(xc * xc, axis=-1, keepdims=True)
    return xc * jax.lax.rsqrt(var + LN_EPS) * gamma + beta


# ------------------------------- Pallas kernel ---------------------------------- #

def encoder_layer_kernel(
    lens_ref,                       # scalar prefetch (SMEM): (N,) int32 actual lengths
    x_ref,                          # (1, tL, d) bf16 row tile of the activations
    wq_ref,                         # (d, d)      bf16 query projection
    wkv_ref, bkv_ref,               # (d, 2d) bf16, (1, 2d) f32  fused key/value projection
    wo_ref,                         # (d, d)      bf16 attention output projection
    w1_ref, b1_ref,                 # (d, d_hid) bf16, (1, d_hid) f32
    w2_ref,                         # (d_hid, d)  bf16
    vecs_ref,                       # (9, d) f32: bq,bo,g1,be1,b2,g2,be2,final_g,final_b
    o_ref,                          # (1, tL, d) output row tile
    kv_scr,                         # VMEM (nhead, dh, dh) f32   per-head KV state
    ksum_scr,                       # VMEM (1, d) f32            masked K column sums
    *,
    nhead,
    apply_final_norm,
):
    b = pl.program_id(0)
    phase = pl.program_id(1)      # 0: accumulate KV/ksum over L, 1: emit output rows
    t = pl.program_id(2)
    tL, d = x_ref.shape[1], x_ref.shape[2]
    dh = d // nhead

    xb = x_ref[0]                 # (tL, d) bf16 — fed straight to the MXU
    length = lens_ref[b]

    def vec(i):                   # packed (1, d) bias / norm rows
        return vecs_ref[i:i + 1, :]

    @pl.when((phase == 0) & (t == 0))
    def _init_state():
        kv_scr[...] = jnp.zeros_like(kv_scr)
        ksum_scr[...] = jnp.zeros_like(ksum_scr)

    # -------- pass A: K/V projection of this row tile, accumulate KV and ksum -------- #
    @pl.when(phase == 0)
    def _accumulate_kv():
        kvp = jnp.dot(xb, wkv_ref[...], preferred_element_type=jnp.float32) + bkv_ref[...]
        k = _elu_feature_map(kvp[:, :d])
        v = kvp[:, d:]
        # key padding mask built in-kernel from the scalar-prefetched length
        row = t * tL + jax.lax.broadcasted_iota(jnp.int32, (tL, 1), 0)
        k = k * (row < length).astype(jnp.float32)
        ksum_scr[...] += jnp.sum(k, axis=0, keepdims=True)
        kb = k.astype(jnp.bfloat16)
        vb = v.astype(jnp.bfloat16)
        for h in range(nhead):
            sl = slice(h * dh, (h + 1) * dh)
            # KV_h[dk, m] = sum_s K'[s, dk] * V[s, m]   (f32 accumulate)
            kv_scr[h] += jax.lax.dot_general(
                kb[:, sl], vb[:, sl], (((0,), (0,)), ((), ())),
                preferred_element_type=jnp.float32)

    # -------- pass B: Q projection, attention output, residuals, norms, FFN -------- #
    @pl.when(phase == 1)
    def _emit_rows():
        x = xb.astype(jnp.float32)
        q = _elu_feature_map(
            jnp.dot(xb, wq_ref[...], preferred_element_type=jnp.float32) + vec(0))
        heads = []
        for h in range(nhead):
            sl = slice(h * dh, (h + 1) * dh)
            qh = q[:, sl]
            num = jnp.dot(qh, kv_scr[h], preferred_element_type=jnp.float32)
            den = jnp.sum(qh * ksum_scr[:, sl], axis=1, keepdims=True) + ATTN_EPS
            heads.append(num * pl.reciprocal(den, approx=True))
        # one lane-dense (tL, d) @ (d, d) output projection instead of nhead narrow dots
        o_heads = jnp.concatenate(heads, axis=1).astype(jnp.bfloat16)
        attn = jnp.dot(o_heads, wo_ref[...], preferred_element_type=jnp.float32) + vec(1)

        x1 = x + attn
        xn = _layer_norm(x1, vec(2), vec(3))
        h1 = _gelu(jnp.dot(xn.astype(jnp.bfloat16), w1_ref[...],
                           preferred_element_type=jnp.float32) + b1_ref[...])
        y = jnp.dot(h1.astype(jnp.bfloat16), w2_ref[...],
                    preferred_element_type=jnp.float32) + vec(4)
        out = _layer_norm(xn + y, vec(5), vec(6))
        if apply_final_norm:                     # final LN fused into the last layer
            out = _layer_norm(out, vec(7), vec(8))
        o_ref[0] = out.astype(o_ref.dtype)


# ------------------------------- wrappers --------------------------------------- #

def _vmem_limit_bytes():
    # Re-derive per generation: ~75% of physical VMEM, capped at 96 MiB (v5e/v6e);
    # on v7x (64 MiB) this yields ~48 MiB which the row-tiled footprint fits easily.
    try:
        cap = pltpu.get_tpu_info().vmem_capacity_bytes
    except Exception:
        cap = 64 * 1024 * 1024
    return int(min(int(0.75 * cap), 96 * 1024 * 1024))


def _choose_row_tile(L, target=256):
    if L <= target:
        return L
    for t in range(target, 7, -8):
        if L % t == 0:
            return t
    return L


# Constant-index weight blocks are single-buffered; falls back if unsupported.
_SINGLE_BUFFER_WEIGHTS = [True]


def encoder_layer_forward(x, lengths, p, vecs, nhead, *,
                          apply_final_norm, out_dtype, row_tile):
    N, L, d = x.shape
    d_hid = p["w1"].shape[1]
    dh = d // nhead
    n_t = L // row_tile

    flops = int(2 * N * L * (4 * d * d + 2 * d * dh + 2 * d * d_hid))
    transcendentals = int(N * L * (2 * d + d_hid))
    bytes_accessed = int(2 * (3 * N * L * d)
                         + 2 * (4 * d * d + 2 * d * d_hid)
                         + 4 * (11 * d + d_hid))

    def call(single_buffer):
        def const_spec(shape):
            idx = lambda b, ph, t, lens: (0,) * len(shape)
            if single_buffer:
                return pl.BlockSpec(shape, idx, pipeline_mode=pl.Buffered(1))
            return pl.BlockSpec(shape, idx)

        grid_spec = pltpu.PrefetchScalarGridSpec(
            num_scalar_prefetch=1,
            grid=(N, 2, n_t),
            in_specs=[
                pl.BlockSpec((1, row_tile, d), lambda b, ph, t, lens: (b, t, 0)),  # x
                const_spec((d, d)),            # wq
                const_spec((d, 2 * d)),        # wkv
                const_spec((1, 2 * d)),        # bkv
                const_spec((d, d)),            # wo
                const_spec((d, d_hid)),        # w1
                const_spec((1, d_hid)),        # b1
                const_spec((d_hid, d)),        # w2
                const_spec((9, d)),            # packed bias / norm vectors
            ],
            # During phase 0 the output block index stays at (b, 0); it is (re)written
            # correctly at phase 1, t=0 before any writeback, so no garbage HBM writes.
            out_specs=pl.BlockSpec((1, row_tile, d), lambda b, ph, t, lens: (b, t * ph, 0)),
            scratch_shapes=[
                pltpu.VMEM((nhead, dh, dh), jnp.float32),   # KV state
                pltpu.VMEM((1, d), jnp.float32),            # masked K column sums
            ],
        )

        kernel = functools.partial(encoder_layer_kernel, nhead=nhead,
                                   apply_final_norm=apply_final_norm)
        return pl.pallas_call(
            kernel,
            out_shape=jax.ShapeDtypeStruct((N, L, d), out_dtype),
            grid_spec=grid_spec,
            compiler_params=pltpu.CompilerParams(
                dimension_semantics=("parallel", "arbitrary", "arbitrary"),
                vmem_limit_bytes=_vmem_limit_bytes(),
            ),
            cost_estimate=pl.CostEstimate(
                flops=flops, transcendentals=transcendentals,
                bytes_accessed=bytes_accessed),
        )(lengths, x, p["wq"], p["wkv"], p["bkv"], p["wo"],
          p["w1"], p["b1"], p["w2"], vecs)

    if _SINGLE_BUFFER_WEIGHTS[0]:
        try:
            return call(True)
        except Exception:
            _SINGLE_BUFFER_WEIGHTS[0] = False
    return call(False)


def fast_transformer_encoder_forward(src, src_key_padding_mask, params, nhead,
                                     row_tile_target=256):
    """src: (N, L, d_model); src_key_padding_mask: (N, L) bool (True = padding, at the tail)."""
    N, L, d = src.shape
    lengths = (L - jnp.sum(src_key_padding_mask.astype(jnp.int32), axis=1)).astype(jnp.int32)
    row_tile = _choose_row_tile(L, row_tile_target)

    x = src.astype(jnp.bfloat16)          # bf16 activations between layers (halves HBM traffic)
    nlayers = len(params["layers"])
    for i, p in enumerate(params["layers"]):
        last = (i == nlayers - 1)
        vecs = jnp.stack([p["bq"], p["bo"], p["g1"], p["be1"], p["b2"],
                          p["g2"], p["be2"], params["final_g"], params["final_b"]], axis=0)
        x = encoder_layer_forward(
            x, lengths, p, vecs, nhead,
            apply_final_norm=last,
            out_dtype=jnp.float32 if last else jnp.bfloat16,
            row_tile=row_tile)
    return x


# ------------------------------ params / reference ------------------------------ #

def init_params(key, d_model, nhead, d_hid, nlayers):
    keys = jax.random.split(key, nlayers + 1)
    s_d = 1.0 / math.sqrt(d_model)
    s_h = 1.0 / math.sqrt(d_hid)

    def nrm(k, shape, scale):
        return jax.random.normal(k, shape, jnp.float32) * scale

    layers = []
    for i in range(nlayers):
        ks = jax.random.split(keys[i], 14)
        layers.append(dict(
            # wq is the torch query projection; wkv is the concatenated key/value projections.
            wq=nrm(ks[0], (d_model, d_model), s_d).astype(jnp.bfloat16),
            wkv=nrm(ks[1], (d_model, 2 * d_model), s_d).astype(jnp.bfloat16),
            wo=nrm(ks[2], (d_model, d_model), s_d).astype(jnp.bfloat16),
            w1=nrm(ks[3], (d_model, d_hid), s_d).astype(jnp.bfloat16),
            w2=nrm(ks[4], (d_hid, d_model), s_h).astype(jnp.bfloat16),
            bq=nrm(ks[5], (d_model,), 0.01),
            bkv=nrm(ks[6], (1, 2 * d_model), 0.01),
            bo=nrm(ks[7], (d_model,), 0.01),
            b1=nrm(ks[8], (1, d_hid), 0.01),
            b2=nrm(ks[9], (d_model,), 0.01),
            g1=1.0 + 0.1 * jax.random.normal(ks[10], (d_model,), jnp.float32),
            be1=0.01 * jax.random.normal(ks[11], (d_model,), jnp.float32),
            g2=1.0 + 0.1 * jax.random.normal(ks[12], (d_model,), jnp.float32),
            be2=0.01 * jax.random.normal(ks[13], (d_model,), jnp.float32),
        ))
    kf = jax.random.split(keys[-1], 2)
    final_g = 1.0 + 0.1 * jax.random.normal(kf[0], (d_model,), jnp.float32)
    final_b = 0.01 * jax.random.normal(kf[1], (d_model,), jnp.float32)
    return dict(layers=layers, final_g=final_g, final_b=final_b)


def reference_forward(src, src_key_padding_mask, params, nhead):
    """Pure-JAX mirror of the linear-attention encoder with the same bf16/f32 mixed precision."""
    N, L, d = src.shape
    dh = d // nhead
    lengths = L - jnp.sum(src_key_padding_mask.astype(jnp.int32), axis=1)
    key_mask = (jnp.arange(L)[None, :] < lengths[:, None]).astype(jnp.float32)[:, :, None]

    x = src.astype(jnp.bfloat16)
    nlayers = len(params["layers"])
    out = None
    for i, p in enumerate(params["layers"]):
        xf = x.astype(jnp.float32)
        q = _elu_feature_map(jnp.dot(x, p["wq"], preferred_element_type=jnp.float32) + p["bq"])
        kvp = jnp.dot(x, p["wkv"], preferred_element_type=jnp.float32) + p["bkv"]
        k = _elu_feature_map(kvp[..., :d]) * key_mask
        v = kvp[..., d:]
        qh = q.reshape(N, L, nhead, dh)
        kh = k.reshape(N, L, nhead, dh)
        vh = v.reshape(N, L, nhead, dh)
        kv = jnp.einsum("nshd,nshm->nhdm", kh.astype(jnp.bfloat16), vh.astype(jnp.bfloat16),
                        preferred_element_type=jnp.float32)
        ksum = kh.sum(axis=1)
        z = 1.0 / (jnp.einsum("nlhd,nhd->nlh", qh, ksum) + ATTN_EPS)
        num = jnp.einsum("nlhd,nhdm->nlhm", qh, kv)
        o_heads = (num * z[..., None]).reshape(N, L, d).astype(jnp.bfloat16)
        attn = jnp.dot(o_heads, p["wo"], preferred_element_type=jnp.float32) + p["bo"]
        x1 = xf + attn
        xn = _layer_norm(x1, p["g1"], p["be1"])
        h1 = _gelu(jnp.dot(xn.astype(jnp.bfloat16), p["w1"],
                           preferred_element_type=jnp.float32) + p["b1"])
        y = jnp.dot(h1.astype(jnp.bfloat16), p["w2"],
                    preferred_element_type=jnp.float32) + p["b2"]
        out = _layer_norm(xn + y, p["g2"], p["be2"])
        if i == nlayers - 1:
            out = _layer_norm(out, params["final_g"], params["final_b"])
        else:
            x = out.astype(jnp.bfloat16)
    return out


# ------------------------------------ main --------------------------------------- #

if __name__ == "__main__":
    key = jax.random.PRNGKey(0)
    k_x, k_p = jax.random.split(key)

    batch, seq_len, d_model, nhead, d_hid, nlayers = 2, 8, 32, 4, 64, 2

    src = jax.random.normal(k_x, (batch, seq_len, d_model), jnp.float32)
    lengths = jnp.array([seq_len, seq_len - 3], dtype=jnp.int32)
    # True = padding token (only at the tail of each sequence, as the module requires)
    src_key_padding_mask = jnp.arange(seq_len)[None, :] >= lengths[:, None]

    params = init_params(k_p, d_model, nhead, d_hid, nlayers)

    out = fast_transformer_encoder_forward(src, src_key_padding_mask, params, nhead)
    out = jax.block_until_ready(out)

    ref = reference_forward(src, src_key_padding_mask, params, nhead)
    assert out.shape == (batch, seq_len, d_model)
    assert out.dtype == jnp.float32
    err = float(jnp.max(jnp.abs(out - jnp.asarray(ref, jnp.float32))))
    assert err < 2e-2, err

    print("KERNEL_OK")
</pallas_src>

<mosaic_0001>
module attributes {stable_mosaic.version = 11 : i64} {
  func.func @encoder_layer_kernel(%arg0: i32, %arg1: i32, %arg2: i32, %arg3: memref<2xi32, #tpu.memory_space<smem>>, %arg4: memref<1x8x32xbf16, #tpu.memory_space<vmem>>, %arg5: memref<32x32xbf16, #tpu.memory_space<vmem>>, %arg6: memref<32x64xbf16, #tpu.memory_space<vmem>>, %arg7: memref<1x64xf32, #tpu.memory_space<vmem>>, %arg8: memref<32x32xbf16, #tpu.memory_space<vmem>>, %arg9: memref<32x64xbf16, #tpu.memory_space<vmem>>, %arg10: memref<1x64xf32, #tpu.memory_space<vmem>>, %arg11: memref<64x32xbf16, #tpu.memory_space<vmem>>, %arg12: memref<9x32xf32, #tpu.memory_space<vmem>>, %arg13: memref<1x8x32xbf16, #tpu.memory_space<vmem>>, %arg14: memref<4x8x8xf32, #tpu.memory_space<vmem>>, %arg15: memref<1x32xf32, #tpu.memory_space<vmem>>) attributes {dimension_semantics = [#tpu.dimension_semantics<parallel>, #tpu.dimension_semantics<arbitrary>, #tpu.dimension_semantics<arbitrary>], iteration_bounds = array<i64: 2, 2, 1>, scalar_prefetch = 1 : i64, scratch_operands = 2 : i64, tpu.core_type = #tpu.core_type<tc>, window_params = [{transform_indices = @transform_0, window_bounds = array<i64: 1, 8, 32>}, {pipeline_mode = #tpu.pipeline_mode<synchronous>, transform_indices = @transform_1, window_bounds = array<i64: 32, 32>}, {pipeline_mode = #tpu.pipeline_mode<synchronous>, transform_indices = @transform_2, window_bounds = array<i64: 32, 64>}, {pipeline_mode = #tpu.pipeline_mode<synchronous>, transform_indices = @transform_3, window_bounds = array<i64: 1, 64>}, {pipeline_mode = #tpu.pipeline_mode<synchronous>, transform_indices = @transform_4, window_bounds = array<i64: 32, 32>}, {pipeline_mode = #tpu.pipeline_mode<synchronous>, transform_indices = @transform_5, window_bounds = array<i64: 32, 64>}, {pipeline_mode = #tpu.pipeline_mode<synchronous>, transform_indices = @transform_6, window_bounds = array<i64: 1, 64>}, {pipeline_mode = #tpu.pipeline_mode<synchronous>, transform_indices = @transform_7, window_bounds = array<i64: 64, 32>}, {pipeline_mode = #tpu.pipeline_mode<synchronous>, transform_indices = @transform_8, window_bounds = array<i64: 9, 32>}, {transform_indices = @transform_9, window_bounds = array<i64: 1, 8, 32>}]} {
    %c0 = arith.constant 0 : index
    %c0_0 = arith.constant 0 : index
    %c0_1 = arith.constant 0 : index
    %0 = vector.load %arg4[%c0, %c0_0, %c0_1] : memref<1x8x32xbf16, #tpu.memory_space<vmem>>, vector<1x8x32xbf16>
    %1 = vector.shape_cast %0 : vector<1x8x32xbf16> to vector<8x32xbf16>
    %2 = arith.index_cast %arg0 : i32 to index
    %3 = memref.load %arg3[%2] : memref<2xi32, #tpu.memory_space<smem>>
    %c0_i32 = arith.constant 0 : i32
    %4 = arith.cmpi eq, %arg1, %c0_i32 : i32
    %c0_i32_2 = arith.constant 0 : i32
    %5 = arith.cmpi eq, %arg2, %c0_i32_2 : i32
    %6 = arith.andi %4, %5 : i1
    %7 = arith.extui %6 : i1 to i32
    %c0_i32_3 = arith.constant 0 : i32
    %8 = arith.cmpi ne, %7, %c0_i32_3 : i32
    scf.if %8 {
      %cst = arith.constant 0.000000e+00 : f32
      %15 = vector.broadcast %cst : f32 to vector<4x8x8xf32>
      %c0_7 = arith.constant 0 : index
      %c0_8 = arith.constant 0 : index
      %c0_9 = arith.constant 0 : index
      %16 = vector.load %arg14[%c0_7, %c0_8, %c0_9] : memref<4x8x8xf32, #tpu.memory_space<vmem>>, vector<4x8x8xf32>
      tpu.vector_store %arg14[%c0_7, %c0_8, %c0_9], %15 {strides = array<i32>} : memref<4x8x8xf32, #tpu.memory_space<vmem>>, vector<4x8x8xf32>,
      %cst_10 = arith.constant 0.000000e+00 : f32
      %17 = vector.broadcast %cst_10 : f32 to vector<1x32xf32>
      %c0_11 = arith.constant 0 : index
      %c0_12 = arith.constant 0 : index
      %18 = vector.load %arg15[%c0_11, %c0_12] : memref<1x32xf32, #tpu.memory_space<vmem>>, vector<1x32xf32>
      tpu.vector_store %arg15[%c0_11, %c0_12], %17 {strides = array<i32>} : memref<1x32xf32, #tpu.memory_space<vmem>>, vector<1x32xf32>,
    } else {
    }
    %c0_i32_4 = arith.constant 0 : i32
    %9 = arith.cmpi eq, %arg1, %c0_i32_4 : i32
    %10 = arith.extui %9 : i1 to i32
    %c0_i32_5 = arith.constant 0 : i32
    %11 = arith.cmpi ne, %10, %c0_i32_5 : i32
    scf.if %11 {
      %c0_7 = arith.constant 0 : index
      %c0_8 = arith.constant 0 : index
      %15 = vector.load %arg6[%c0_7, %c0_8] : memref<32x64xbf16, #tpu.memory_space<vmem>>, vector<32x64xbf16>
      %cst = arith.constant dense<0.000000e+00> : vector<8x64xf32>
      %16 = tpu.matmul %1, %15, %cst {dimension_numbers = #tpu.dot_dimension_numbers<[1], [0], [0], [1], [0, 0, 1, 1], [], []>} : vector<8x32xbf16>, vector<32x64xbf16>, vector<8x64xf32> -> vector<8x64xf32>
      %c0_9 = arith.constant 0 : index
      %c0_10 = arith.constant 0 : index
      %17 = vector.load %arg7[%c0_9, %c0_10] : memref<1x64xf32, #tpu.memory_space<vmem>>, vector<1x64xf32>
      %18 = vector.broadcast %17 : vector<1x64xf32> to vector<8x64xf32>
      %19 = arith.addf %16, %18 : vector<8x64xf32>
      %20 = vector.extract_strided_slice %19 {offsets = [0, 0], sizes = [8, 32], strides = [1, 1]} : vector<8x64xf32> to vector<8x32xf32>
      %cst_11 = arith.constant 0.000000e+00 : f32
      %21 = vector.broadcast %cst_11 : f32 to vector<8x32xf32>
      %22 = arith.cmpf ogt, %20, %21 : vector<8x32xf32>
      %cst_12 = arith.constant 1.000000e+00 : f32
      %23 = vector.broadcast %cst_12 : f32 to vector<8x32xf32>
      %24 = arith.addf %20, %23 : vector<8x32xf32>
      %cst_13 = arith.constant 0.000000e+00 : f32
      %25 = vector.broadcast %cst_13 : f32 to vector<8x32xf32>
      %26 = arith.minimumf %20, %25 : vector<8x32xf32>
      %27 = math.exp %26 : vector<8x32xf32>
      %28 = arith.select %22, %24, %27 : vector<8x32xi1>, vector<8x32xf32>
      %29 = vector.extract_strided_slice %19 {offsets = [0, 32], sizes = [8, 32], strides = [1, 1]} : vector<8x64xf32> to vector<8x32xf32>
      %c8_i32 = arith.constant 8 : i32
      %30 = arith.muli %arg2, %c8_i32 : i32
      %31 = tpu.iota {dimensions = array<i32: 0>} : vector<8x1xi32>
      %32 = vector.broadcast %30 : i32 to vector<8x1xi32>
      %33 = arith.addi %32, %31 : vector<8x1xi32>
      %34 = vector.broadcast %3 : i32 to vector<8x1xi32>
      %35 = arith.cmpi slt, %33, %34 : vector<8x1xi32>
      %36 = arith.extui %35 : vector<8x1xi1> to vector<8x1xi32>
      %37 = arith.sitofp %36 : vector<8x1xi32> to vector<8x1xf32>
      %38 = vector.broadcast %37 : vector<8x1xf32> to vector<8x32xf32>
      %39 = arith.mulf %28, %38 : vector<8x32xf32>
      %c0_14 = arith.constant 0 : index
      %c0_15 = arith.constant 0 : index
      %40 = vector.load %arg15[%c0_14, %c0_15] : memref<1x32xf32, #tpu.memory_space<vmem>>, vector<1x32xf32>
      %cst_16 = arith.constant dense<0.000000e+00> : vector<32xf32>
      %41 = vector.multi_reduction <add>, %39, %cst_16 [0] : vector<8x32xf32> to vector<32xf32>
      %42 = vector.shape_cast %41 : vector<32xf32> to vector<1x32xf32>
      %43 = arith.addf %40, %42 : vector<1x32xf32>
      %c0_17 = arith.constant 0 : index
      %c0_18 = arith.constant 0 : index
      %44 = vector.load %arg15[%c0_17, %c0_18] : memref<1x32xf32, #tpu.memory_space<vmem>>, vector<1x32xf32>
      tpu.vector_store %arg15[%c0_17, %c0_18], %43 {strides = array<i32>} : memref<1x32xf32, #tpu.memory_space<vmem>>, vector<1x32xf32>,
      %45 = arith.truncf %39 : vector<8x32xf32> to vector<8x32xbf16>
      %46 = arith.truncf %29 : vector<8x32xf32> to vector<8x32xbf16>
      %c0_19 = arith.constant 0 : index
      %c0_20 = arith.constant 0 : index
      %c0_21 = arith.constant 0 : index
      %47 = vector.load %arg14[%c0_19, %c0_20, %c0_21] : memref<4x8x8xf32, #tpu.memory_space<vmem>>, vector<1x8x8xf32>
      %48 = vector.shape_cast %47 : vector<1x8x8xf32> to vector<8x8xf32>
      %49 = vector.extract_strided_slice %45 {offsets = [0, 0], sizes = [8, 8], strides = [1, 1]} : vector<8x32xbf16> to vector<8x8xbf16>
      %50 = vector.extract_strided_slice %46 {offsets = [0, 0], sizes = [8, 8], strides = [1, 1]} : vector<8x32xbf16> to vector<8x8xbf16>
      %cst_22 = arith.constant dense<0.000000e+00> : vector<8x8xf32>
      %51 = tpu.matmul %49, %50, %cst_22 {dimension_numbers = #tpu.dot_dimension_numbers<[0], [0], [1], [1], [0, 1, 1, 1], [], []>} : vector<8x8xbf16>, vector<8x8xbf16>, vector<8x8xf32> -> vector<8x8xf32>
      %52 = arith.addf %48, %51 : vector<8x8xf32>
      %c0_23 = arith.constant 0 : index
      %c0_24 = arith.constant 0 : index
      %c0_25 = arith.constant 0 : index
      %53 = vector.load %arg14[%c0_23, %c0_24, %c0_25] : memref<4x8x8xf32, #tpu.memory_space<vmem>>, vector<1x8x8xf32>
      %54 = vector.shape_cast %53 : vector<1x8x8xf32> to vector<8x8xf32>
      %55 = vector.shape_cast %52 : vector<8x8xf32> to vector<1x8x8xf32>
      tpu.vector_store %arg14[%c0_23, %c0_24, %c0_25], %55 {strides = array<i32>} : memref<4x8x8xf32, #tpu.memory_space<vmem>>, vector<1x8x8xf32>,
      %c1 = arith.constant 1 : index
      %c0_26 = arith.constant 0 : index
      %c0_27 = arith.constant 0 : index
      %56 = vector.load %arg14[%c1, %c0_26, %c0_27] : memref<4x8x8xf32, #tpu.memory_space<vmem>>, vector<1x8x8xf32>
      %57 = vector.shape_cast %56 : vector<1x8x8xf32> to vector<8x8xf32>
      %58 = vector.extract_strided_slice %45 {offsets = [0, 8], sizes = [8, 8], strides = [1, 1]} : vector<8x32xbf16> to vector<8x8xbf16>
      %59 = vector.extract_strided_slice %46 {offsets = [0, 8], sizes = [8, 8], strides = [1, 1]} : vector<8x32xbf16> to vector<8x8xbf16>
      %cst_28 = arith.constant dense<0.000000e+00> : vector<8x8xf32>
      %60 = tpu.matmul %58, %59, %cst_28 {dimension_numbers = #tpu.dot_dimension_numbers<[0], [0], [1], [1], [0, 1, 1, 1], [], []>} : vector<8x8xbf16>, vector<8x8xbf16>, vector<8x8xf32> -> vector<8x8xf32>
      %61 = arith.addf %57, %60 : vector<8x8xf32>
      %c1_29 = arith.constant 1 : index
      %c0_30 = arith.constant 0 : index
      %c0_31 = arith.constant 0 : index
      %62 = vector.load %arg14[%c1_29, %c0_30, %c0_31] : memref<4x8x8xf32, #tpu.memory_space<vmem>>, vector<1x8x8xf32>
      %63 = vector.shape_cast %62 : vector<1x8x8xf32> to vector<8x8xf32>
      %64 = vector.shape_cast %61 : vector<8x8xf32> to vector<1x8x8xf32>
      tpu.vector_store %arg14[%c1_29, %c0_30, %c0_31], %64 {strides = array<i32>} : memref<4x8x8xf32, #tpu.memory_space<vmem>>, vector<1x8x8xf32>,
      %c2 = arith.constant 2 : index
      %c0_32 = arith.constant 0 : index
      %c0_33 = arith.constant 0 : index
      %65 = vector.load %arg14[%c2, %c0_32, %c0_33] : memref<4x8x8xf32, #tpu.memory_space<vmem>>, vector<1x8x8xf32>
      %66 = vector.shape_cast %65 : vector<1x8x8xf32> to vector<8x8xf32>
      %67 = vector.extract_strided_slice %45 {offsets = [0, 16], sizes = [8, 8], strides = [1, 1]} : vector<8x32xbf16> to vector<8x8xbf16>
      %68 = vector.extract_strided_slice %46 {offsets = [0, 16], sizes = [8, 8], strides = [1, 1]} : vector<8x32xbf16> to vector<8x8xbf16>
      %cst_34 = arith.constant dense<0.000000e+00> : vector<8x8xf32>
      %69 = tpu.matmul %67, %68, %cst_34 {dimension_numbers = #tpu.dot_dimension_numbers<[0], [0], [1], [1], [0, 1, 1, 1], [], []>} : vector<8x8xbf16>, vector<8x8xbf16>, vector<8x8xf32> -> vector<8x8xf32>
      %70 = arith.addf %66, %69 : vector<8x8xf32>
      %c2_35 = arith.constant 2 : index
      %c0_36 = arith.constant 0 : index
      %c0_37 = arith.constant 0 : index
      %71 = vector.load %arg14[%c2_35, %c0_36, %c0_37] : memref<4x8x8xf32, #tpu.memory_space<vmem>>, vector<1x8x8xf32>
      %72 = vector.shape_cast %71 : vector<1x8x8xf32> to vector<8x8xf32>
      %73 = vector.shape_cast %70 : vector<8x8xf32> to vector<1x8x8xf32>
      tpu.vector_store %arg14[%c2_35, %c0_36, %c0_37], %73 {strides = array<i32>} : memref<4x8x8xf32, #tpu.memory_space<vmem>>, vector<1x8x8xf32>,
      %c3 = arith.constant 3 : index
      %c0_38 = arith.constant 0 : index
      %c0_39 = arith.constant 0 : index
      %74 = vector.load %arg14[%c3, %c0_38, %c0_39] : memref<4x8x8xf32, #tpu.memory_space<vmem>>, vector<1x8x8xf32>
      %75 = vector.shape_cast %74 : vector<1x8x8xf32> to vector<8x8xf32>
      %76 = vector.extract_strided_slice %45 {offsets = [0, 24], sizes = [8, 8], strides = [1, 1]} : vector<8x32xbf16> to vector<8x8xbf16>
      %77 = vector.extract_strided_slice %46 {offsets = [0, 24], sizes = [8, 8], strides = [1, 1]} : vector<8x32xbf16> to vector<8x8xbf16>
      %cst_40 = arith.constant dense<0.000000e+00> : vector<8x8xf32>
      %78 = tpu.matmul %76, %77, %cst_40 {dimension_numbers = #tpu.dot_dimension_numbers<[0], [0], [1], [1], [0, 1, 1, 1], [], []>} : vector<8x8xbf16>, vector<8x8xbf16>, vector<8x8xf32> -> vector<8x8xf32>
      %79 = arith.addf %75, %78 : vector<8x8xf32>
      %c3_41 = arith.constant 3 : index
      %c0_42 = arith.constant 0 : index
      %c0_43 = arith.constant 0 : index
      %80 = vector.load %arg14[%c3_41, %c0_42, %c0_43] : memref<4x8x8xf32, #tpu.memory_space<vmem>>, vector<1x8x8xf32>
      %81 = vector.shape_cast %80 : vector<1x8x8xf32> to vector<8x8xf32>
      %82 = vector.shape_cast %79 : vector<8x8xf32> to vector<1x8x8xf32>
      tpu.vector_store %arg14[%c3_41, %c0_42, %c0_43], %82 {strides = array<i32>} : memref<4x8x8xf32, #tpu.memory_space<vmem>>, vector<1x8x8xf32>,
    } else {
    }
    %c1_i32 = arith.constant 1 : i32
    %12 = arith.cmpi eq, %arg1, %c1_i32 : i32
    %13 = arith.extui %12 : i1 to i32
    %c0_i32_6 = arith.constant 0 : i32
    %14 = arith.cmpi ne, %13, %c0_i32_6 : i32
    scf.if %14 {
      %15 = arith.extf %1 : vector<8x32xbf16> to vector<8x32xf32>
      %c0_7 = arith.constant 0 : index
      %c0_8 = arith.constant 0 : index
      %16 = vector.load %arg5[%c0_7, %c0_8] : memref<32x32xbf16, #tpu.memory_space<vmem>>, vector<32x32xbf16>
      %cst = arith.constant dense<0.000000e+00> : vector<8x32xf32>
      %17 = tpu.matmul %1, %16, %cst {dimension_numbers = #tpu.dot_dimension_numbers<[1], [0], [0], [1], [0, 0, 1, 1], [], []>} : vector<8x32xbf16>, vector<32x32xbf16>, vector<8x32xf32> -> vector<8x32xf32>
      %c0_9 = arith.constant 0 : index
      %c0_10 = arith.constant 0 : index
      %18 = vector.load %arg12[%c0_9, %c0_10] : memref<9x32xf32, #tpu.memory_space<vmem>>, vector<1x32xf32>
      %19 = vector.broadcast %18 : vector<1x32xf32> to vector<8x32xf32>
      %20 = arith.addf %17, %19 : vector<8x32xf32>
      %cst_11 = arith.constant 0.000000e+00 : f32
      %21 = vector.broadcast %cst_11 : f32 to vector<8x32xf32>
      %22 = arith.cmpf ogt, %20, %21 : vector<8x32xf32>
      %cst_12 = arith.constant 1.000000e+00 : f32
      %23 = vector.broadcast %cst_12 : f32 to vector<8x32xf32>
      %24 = arith.addf %20, %23 : vector<8x32xf32>
      %cst_13 = arith.constant 0.000000e+00 : f32
      %25 = vector.broadcast %cst_13 : f32 to vector<8x32xf32>
      %26 = arith.minimumf %20, %25 : vector<8x32xf32>
      %27 = math.exp %26 : vector<8x32xf32>
      %28 = arith.select %22, %24, %27 : vector<8x32xi1>, vector<8x32xf32>
      %29 = vector.extract_strided_slice %28 {offsets = [0, 0], sizes = [8, 8], strides = [1, 1]} : vector<8x32xf32> to vector<8x8xf32>
      %c0_14 = arith.constant 0 : index
      %c0_15 = arith.constant 0 : index
      %c0_16 = arith.constant 0 : index
      %30 = vector.load %arg14[%c0_14, %c0_15, %c0_16] : memref<4x8x8xf32, #tpu.memory_space<vmem>>, vector<1x8x8xf32>
      %31 = vector.shape_cast %30 : vector<1x8x8xf32> to vector<8x8xf32>
      %cst_17 = arith.constant dense<0.000000e+00> : vector<8x8xf32>
      %32 = tpu.matmul %29, %31, %cst_17 {dimension_numbers = #tpu.dot_dimension_numbers<[1], [0], [0], [1], [0, 0, 1, 1], [], []>} : vector<8x8xf32>, vector<8x8xf32>, vector<8x8xf32> -> vector<8x8xf32>
      %c0_18 = arith.constant 0 : index
      %c0_19 = arith.constant 0 : index
      %33 = vector.load %arg15[%c0_18, %c0_19] : memref<1x32xf32, #tpu.memory_space<vmem>>, vector<1x8xf32>
      %34 = vector.broadcast %33 : vector<1x8xf32> to vector<8x8xf32>
      %35 = arith.mulf %29, %34 : vector<8x8xf32>
      %cst_20 = arith.constant dense<0.000000e+00> : vector<8xf32>
      %36 = vector.multi_reduction <add>, %35, %cst_20 [1] : vector<8x8xf32> to vector<8xf32>
      %37 = vector.shape_cast %36 : vector<8xf32> to vector<8x1xf32>
      %cst_21 = arith.constant 9.99999997E-7 : f32
      %38 = vector.broadcast %cst_21 : f32 to vector<8x1xf32>
      %39 = arith.addf %37, %38 : vector<8x1xf32>
      %40 = tpu.reciprocal %39 {approx = true} : vector<8x1xf32> -> vector<8x1xf32>
      %41 = vector.broadcast %40 : vector<8x1xf32> to vector<8x8xf32>
      %42 = arith.mulf %32, %41 : vector<8x8xf32>
      %43 = vector.extract_strided_slice %28 {offsets = [0, 8], sizes = [8, 8], strides = [1, 1]} : vector<8x32xf32> to vector<8x8xf32>
      %c1 = arith.constant 1 : index
      %c0_22 = arith.constant 0 : index
      %c0_23 = arith.constant 0 : index
      %44 = vector.load %arg14[%c1, %c0_22, %c0_23] : memref<4x8x8xf32, #tpu.memory_space<vmem>>, vector<1x8x8xf32>
      %45 = vector.shape_cast %44 : vector<1x8x8xf32> to vector<8x8xf32>
      %cst_24 = arith.constant dense<0.000000e+00> : vector<8x8xf32>
      %46 = tpu.matmul %43, %45, %cst_24 {dimension_numbers = #tpu.dot_dimension_numbers<[1], [0], [0], [1], [0, 0, 1, 1], [], []>} : vector<8x8xf32>, vector<8x8xf32>, vector<8x8xf32> -> vector<8x8xf32>
      %c0_25 = arith.constant 0 : index
      %c8 = arith.constant 8 : index
      %47 = vector.load %arg15[%c0_25, %c8] : memref<1x32xf32, #tpu.memory_space<vmem>>, vector<1x8xf32>
      %48 = vector.broadcast %47 : vector<1x8xf32> to vector<8x8xf32>
      %49 = arith.mulf %43, %48 : vector<8x8xf32>
      %cst_26 = arith.constant dense<0.000000e+00> : vector<8xf32>
      %50 = vector.multi_reduction <add>, %49, %cst_26 [1] : vector<8x8xf32> to vector<8xf32>
      %51 = vector.shape_cast %50 : vector<8xf32> to vector<8x1xf32>
      %cst_27 = arith.constant 9.99999997E-7 : f32
      %52 = vector.broadcast %cst_27 : f32 to vector<8x1xf32>
      %53 = arith.addf %51, %52 : vector<8x1xf32>
      %54 = tpu.reciprocal %53 {approx = true} : vector<8x1xf32> -> vector<8x1xf32>
      %55 = vector.broadcast %54 : vector<8x1xf32> to vector<8x8xf32>
      %56 = arith.mulf %46, %55 : vector<8x8xf32>
      %57 = vector.extract_strided_slice %28 {offsets = [0, 16], sizes = [8, 8], strides = [1, 1]} : vector<8x32xf32> to vector<8x8xf32>
      %c2 = arith.constant 2 : index
      %c0_28 = arith.constant 0 : index
      %c0_29 = arith.constant 0 : index
      %58 = vector.load %arg14[%c2, %c0_28, %c0_29] : memref<4x8x8xf32, #tpu.memory_space<vmem>>, vector<1x8x8xf32>
      %59 = vector.shape_cast %58 : vector<1x8x8xf32> to vector<8x8xf32>
      %cst_30 = arith.constant dense<0.000000e+00> : vector<8x8xf32>
      %60 = tpu.matmul %57, %59, %cst_30 {dimension_numbers = #tpu.dot_dimension_numbers<[1], [0], [0], [1], [0, 0, 1, 1], [], []>} : vector<8x8xf32>, vector<8x8xf32>, vector<8x8xf32> -> vector<8x8xf32>
      %c0_31 = arith.constant 0 : index
      %c16 = arith.constant 16 : index
      %61 = vector.load %arg15[%c0_31, %c16] : memref<1x32xf32, #tpu.memory_space<vmem>>, vector<1x8xf32>
      %62 = vector.broadcast %61 : vector<1x8xf32> to vector<8x8xf32>
      %63 = arith.mulf %57, %62 : vector<8x8xf32>
      %cst_32 = arith.constant dense<0.000000e+00> : vector<8xf32>
      %64 = vector.multi_reduction <add>, %63, %cst_32 [1] : vector<8x8xf32> to vector<8xf32>
      %65 = vector.shape_cast %64 : vector<8xf32> to vector<8x1xf32>
      %cst_33 = arith.constant 9.99999997E-7 : f32
      %66 = vector.broadcast %cst_33 : f32 to vector<8x1xf32>
      %67 = arith.addf %65, %66 : vector<8x1xf32>
      %68 = tpu.reciprocal %67 {approx = true} : vector<8x1xf32> -> vector<8x1xf32>
      %69 = vector.broadcast %68 : vector<8x1xf32> to vector<8x8xf32>
      %70 = arith.mulf %60, %69 : vector<8x8xf32>
      %71 = vector.extract_strided_slice %28 {offsets = [0, 24], sizes = [8, 8], strides = [1, 1]} : vector<8x32xf32> to vector<8x8xf32>
      %c3 = arith.constant 3 : index
      %c0_34 = arith.constant 0 : index
      %c0_35 = arith.constant 0 : index
      %72 = vector.load %arg14[%c3, %c0_34, %c0_35] : memref<4x8x8xf32, #tpu.memory_space<vmem>>, vector<1x8x8xf32>
      %73 = vector.shape_cast %72 : vector<1x8x8xf32> to vector<8x8xf32>
      %cst_36 = arith.constant dense<0.000000e+00> : vector<8x8xf32>
      %74 = tpu.matmul %71, %73, %cst_36 {dimension_numbers = #tpu.dot_dimension_numbers<[1], [0], [0], [1], [0, 0, 1, 1], [], []>} : vector<8x8xf32>, vector<8x8xf32>, vector<8x8xf32> -> vector<8x8xf32>
      %c0_37 = arith.constant 0 : index
      %c24 = arith.constant 24 : index
      %75 = vector.load %arg15[%c0_37, %c24] : memref<1x32xf32, #tpu.memory_space<vmem>>, vector<1x8xf32>
      %76 = vector.broadcast %75 : vector<1x8xf32> to vector<8x8xf32>
      %77 = arith.mulf %71, %76 : vector<8x8xf32>
      %cst_38 = arith.constant dense<0.000000e+00> : vector<8xf32>
      %78 = vector.multi_reduction <add>, %77, %cst_38 [1] : vector<8x8xf32> to vector<8xf32>
      %79 = vector.shape_cast %78 : vector<8xf32> to vector<8x1xf32>
      %cst_39 = arith.constant 9.99999997E-7 : f32
      %80 = vector.broadcast %cst_39 : f32 to vector<8x1xf32>
      %81 = arith.addf %79, %80 : vector<8x1xf32>
      %82 = tpu.reciprocal %81 {approx = true} : vector<8x1xf32> -> vector<8x1xf32>
      %83 = vector.broadcast %82 : vector<8x1xf32> to vector<8x8xf32>
      %84 = arith.mulf %74, %83 : vector<8x8xf32>
      %85 = tpu.concatenate %42, %56, %70, %84 in 1 : vector<8x8xf32>, vector<8x8xf32>, vector<8x8xf32>, vector<8x8xf32> -> vector<8x32xf32>
      %86 = arith.truncf %85 : vector<8x32xf32> to vector<8x32xbf16>
      %c0_40 = arith.constant 0 : index
      %c0_41 = arith.constant 0 : index
      %87 = vector.load %arg8[%c0_40, %c0_41] : memref<32x32xbf16, #tpu.memory_space<vmem>>, vector<32x32xbf16>
      %cst_42 = arith.constant dense<0.000000e+00> : vector<8x32xf32>
      %88 = tpu.matmul %86, %87, %cst_42 {dimension_numbers = #tpu.dot_dimension_numbers<[1], [0], [0], [1], [0, 0, 1, 1], [], []>} : vector<8x32xbf16>, vector<32x32xbf16>, vector<8x32xf32> -> vector<8x32xf32>
      %c1_43 = arith.constant 1 : index
      %c0_44 = arith.constant 0 : index
      %89 = vector.load %arg12[%c1_43, %c0_44] : memref<9x32xf32, #tpu.memory_space<vmem>>, vector<1x32xf32>
      %90 = vector.broadcast %89 : vector<1x32xf32> to vector<8x32xf32>
      %91 = arith.addf %88, %90 : vector<8x32xf32>
      %92 = arith.addf %15, %91 : vector<8x32xf32>
      %c2_45 = arith.constant 2 : index
      %c0_46 = arith.constant 0 : index
      %93 = vector.load %arg12[%c2_45, %c0_46] : memref<9x32xf32, #tpu.memory_space<vmem>>, vector<1x32xf32>
      %c3_47 = arith.constant 3 : index
      %c0_48 = arith.constant 0 : index
      %94 = vector.load %arg12[%c3_47, %c0_48] : memref<9x32xf32, #tpu.memory_space<vmem>>, vector<1x32xf32>
      %cst_49 = arith.constant dense<0.000000e+00> : vector<8xf32>
      %95 = vector.multi_reduction <add>, %92, %cst_49 [1] : vector<8x32xf32> to vector<8xf32>
      %96 = vector.shape_cast %95 : vector<8xf32> to vector<8x1xf32>
      %cst_50 = arith.constant 3.200000e+01 : f32
      %97 = vector.broadcast %cst_50 : f32 to vector<8x1xf32>
      %98 = arith.divf %96, %97 : vector<8x1xf32>
      %99 = vector.broadcast %98 : vector<8x1xf32> to vector<8x32xf32>
      %100 = arith.subf %92, %99 : vector<8x32xf32>
      %101 = arith.mulf %100, %100 : vector<8x32xf32>
      %cst_51 = arith.constant dense<0.000000e+00> : vector<8xf32>
      %102 = vector.multi_reduction <add>, %101, %cst_51 [1] : vector<8x32xf32> to vector<8xf32>
      %103 = vector.shape_cast %102 : vector<8xf32> to vector<8x1xf32>
      %cst_52 = arith.constant 3.200000e+01 : f32
      %104 = vector.broadcast %cst_52 : f32 to vector<8x1xf32>
      %105 = arith.divf %103, %104 : vector<8x1xf32>
      %cst_53 = arith.constant 9.99999974E-6 : f32
      %106 = vector.broadcast %cst_53 : f32 to vector<8x1xf32>
      %107 = arith.addf %105, %106 : vector<8x1xf32>
      %108 = math.rsqrt %107 : vector<8x1xf32>
      %109 = vector.broadcast %108 : vector<8x1xf32> to vector<8x32xf32>
      %110 = arith.mulf %100, %109 : vector<8x32xf32>
      %111 = vector.broadcast %93 : vector<1x32xf32> to vector<8x32xf32>
      %112 = arith.mulf %110, %111 : vector<8x32xf32>
      %113 = vector.broadcast %94 : vector<1x32xf32> to vector<8x32xf32>
      %114 = arith.addf %112, %113 : vector<8x32xf32>
      %115 = arith.truncf %114 : vector<8x32xf32> to vector<8x32xbf16>
      %c0_54 = arith.constant 0 : index
      %c0_55 = arith.constant 0 : index
      %116 = vector.load %arg9[%c0_54, %c0_55] : memref<32x64xbf16, #tpu.memory_space<vmem>>, vector<32x64xbf16>
      %cst_56 = arith.constant dense<0.000000e+00> : vector<8x64xf32>
      %117 = tpu.matmul %115, %116, %cst_56 {dimension_numbers = #tpu.dot_dimension_numbers<[1], [0], [0], [1], [0, 0, 1, 1], [], []>} : vector<8x32xbf16>, vector<32x64xbf16>, vector<8x64xf32> -> vector<8x64xf32>
      %c0_57 = arith.constant 0 : index
      %c0_58 = arith.constant 0 : index
      %118 = vector.load %arg10[%c0_57, %c0_58] : memref<1x64xf32, #tpu.memory_space<vmem>>, vector<1x64xf32>
      %119 = vector.broadcast %118 : vector<1x64xf32> to vector<8x64xf32>
      %120 = arith.addf %117, %119 : vector<8x64xf32>
      %cst_59 = arith.constant 5.000000e-01 : f32
      %121 = vector.broadcast %cst_59 : f32 to vector<8x64xf32>
      %122 = arith.mulf %121, %120 : vector<8x64xf32>
      %cst_60 = arith.constant 4.471500e-02 : f32
      %123 = vector.broadcast %cst_60 : f32 to vector<8x64xf32>
      %124 = arith.mulf %123, %120 : vector<8x64xf32>
      %125 = arith.mulf %124, %120 : vector<8x64xf32>
      %126 = arith.mulf %125, %120 : vector<8x64xf32>
      %127 = arith.addf %120, %126 : vector<8x64xf32>
      %cst_61 = arith.constant 0.797884583 : f32
      %128 = vector.broadcast %cst_61 : f32 to vector<8x64xf32>
      %129 = arith.mulf %128, %127 : vector<8x64xf32>
      %130 = math.tanh %129 : vector<8x64xf32>
      %cst_62 = arith.constant 1.000000e+00 : f32
      %131 = vector.broadcast %cst_62 : f32 to vector<8x64xf32>
      %132 = arith.addf %131, %130 : vector<8x64xf32>
      %133 = arith.mulf %122, %132 : vector<8x64xf32>
      %134 = arith.truncf %133 : vector<8x64xf32> to vector<8x64xbf16>
      %c0_63 = arith.constant 0 : index
      %c0_64 = arith.constant 0 : index
      %135 = vector.load %arg11[%c0_63, %c0_64] : memref<64x32xbf16, #tpu.memory_space<vmem>>, vector<64x32xbf16>
      %cst_65 = arith.constant dense<0.000000e+00> : vector<8x32xf32>
      %136 = tpu.matmul %134, %135, %cst_65 {dimension_numbers = #tpu.dot_dimension_numbers<[1], [0], [0], [1], [0, 0, 1, 1], [], []>} : vector<8x64xbf16>, vector<64x32xbf16>, vector<8x32xf32> -> vector<8x32xf32>
      %c4 = arith.constant 4 : index
      %c0_66 = arith.constant 0 : index
      %137 = vector.load %arg12[%c4, %c0_66] : memref<9x32xf32, #tpu.memory_space<vmem>>, vector<1x32xf32>
      %138 = vector.broadcast %137 : vector<1x32xf32> to vector<8x32xf32>
      %139 = arith.addf %136, %138 : vector<8x32xf32>
      %140 = arith.addf %114, %139 : vector<8x32xf32>
      %c5 = arith.constant 5 : index
      %c0_67 = arith.constant 0 : index
      %141 = vector.load %arg12[%c5, %c0_67] : memref<9x32xf32, #tpu.memory_space<vmem>>, vector<1x32xf32>
      %c6 = arith.constant 6 : index
      %c0_68 = arith.constant 0 : index
      %142 = vector.load %arg12[%c6, %c0_68] : memref<9x32xf32, #tpu.memory_space<vmem>>, vector<1x32xf32>
      %cst_69 = arith.constant dense<0.000000e+00> : vector<8xf32>
      %143 = vector.multi_reduction <add>, %140, %cst_69 [1] : vector<8x32xf32> to vector<8xf32>
      %144 = vector.shape_cast %143 : vector<8xf32> to vector<8x1xf32>
      %cst_70 = arith.constant 3.200000e+01 : f32
      %145 = vector.broadcast %cst_70 : f32 to vector<8x1xf32>
      %146 = arith.divf %144, %145 : vector<8x1xf32>
      %147 = vector.broadcast %146 : vector<8x1xf32> to vector<8x32xf32>
      %148 = arith.subf %140, %147 : vector<8x32xf32>
      %149 = arith.mulf %148, %148 : vector<8x32xf32>
      %cst_71 = arith.constant dense<0.000000e+00> : vector<8xf32>
      %150 = vector.multi_reduction <add>, %149, %cst_71 [1] : vector<8x32xf32> to vector<8xf32>
      %151 = vector.shape_cast %150 : vector<8xf32> to vector<8x1xf32>
      %cst_72 = arith.constant 3.200000e+01 : f32
      %152 = vector.broadcast %cst_72 : f32 to vector<8x1xf32>
      %153 = arith.divf %151, %152 : vector<8x1xf32>
      %cst_73 = arith.constant 9.99999974E-6 : f32
      %154 = vector.broadcast %cst_73 : f32 to vector<8x1xf32>
      %155 = arith.addf %153, %154 : vector<8x1xf32>
      %156 = math.rsqrt %155 : vector<8x1xf32>
      %157 = vector.broadcast %156 : vector<8x1xf32> to vector<8x32xf32>
      %158 = arith.mulf %148, %157 : vector<8x32xf32>
      %159 = vector.broadcast %141 : vector<1x32xf32> to vector<8x32xf32>
      %160 = arith.mulf %158, %159 : vector<8x32xf32>
      %161 = vector.broadcast %142 : vector<1x32xf32> to vector<8x32xf32>
      %162 = arith.addf %160, %161 : vector<8x32xf32>
      %163 = arith.truncf %162 : vector<8x32xf32> to vector<8x32xbf16>
      %c0_74 = arith.constant 0 : index
      %c0_75 = arith.constant 0 : index
      %c0_76 = arith.constant 0 : index
      %164 = vector.load %arg13[%c0_74, %c0_75, %c0_76] : memref<1x8x32xbf16, #tpu.memory_space<vmem>>, vector<1x8x32xbf16>
      %165 = vector.shape_cast %164 : vector<1x8x32xbf16> to vector<8x32xbf16>
      %166 = vector.shape_cast %163 : vector<8x32xbf16> to vector<1x8x32xbf16>
      tpu.vector_store %arg13[%c0_74, %c0_75, %c0_76], %166 {strides = array<i32>} : memref<1x8x32xbf16, #tpu.memory_space<vmem>>, vector<1x8x32xbf16>,
    } else {
    }
    return
  }
  func.func @transform_0(%arg0: i32, %arg1: i32, %arg2: i32, %arg3: memref<2xi32, #tpu.memory_space<smem>>) -> (i32, i32, i32) {
    %c0_i32 = arith.constant 0 : i32
    %c0_i32_0 = arith.constant 0 : i32
    return %arg0, %arg2, %c0_i32 : i32, i32, i32
  }
  func.func @transform_1(%arg0: i32, %arg1: i32, %arg2: i32, %arg3: memref<2xi32, #tpu.memory_space<smem>>) -> (i32, i32) {
    %c0_i32 = arith.constant 0 : i32
    %c0_i32_0 = arith.constant 0 : i32
    %c0_i32_1 = arith.constant 0 : i32
    return %c0_i32, %c0_i32_0 : i32, i32
  }
  func.func @transform_2(%arg0: i32, %arg1: i32, %arg2: i32, %arg3: memref<2xi32, #tpu.memory_space<smem>>) -> (i32, i32) {
    %c0_i32 = arith.constant 0 : i32
    %c0_i32_0 = arith.constant 0 : i32
    %c0_i32_1 = arith.constant 0 : i32
    return %c0_i32, %c0_i32_0 : i32, i32
  }
  func.func @transform_3(%arg0: i32, %arg1: i32, %arg2: i32, %arg3: memref<2xi32, #tpu.memory_space<smem>>) -> (i32, i32) {
    %c0_i32 = arith.constant 0 : i32
    %c0_i32_0 = arith.constant 0 : i32
    %c0_i32_1 = arith.constant 0 : i32
    return %c0_i32, %c0_i32_0 : i32, i32
  }
  func.func @transform_4(%arg0: i32, %arg1: i32, %arg2: i32, %arg3: memref<2xi32, #tpu.memory_space<smem>>) -> (i32, i32) {
    %c0_i32 = arith.constant 0 : i32
    %c0_i32_0 = arith.constant 0 : i32
    %c0_i32_1 = arith.constant 0 : i32
    return %c0_i32, %c0_i32_0 : i32, i32
  }
  func.func @transform_5(%arg0: i32, %arg1: i32, %arg2: i32, %arg3: memref<2xi32, #tpu.memory_space<smem>>) -> (i32, i32) {
    %c0_i32 = arith.constant 0 : i32
    %c0_i32_0 = arith.constant 0 : i32
    %c0_i32_1 = arith.constant 0 : i32
    return %c0_i32, %c0_i32_0 : i32, i32
  }
  func.func @transform_6(%arg0: i32, %arg1: i32, %arg2: i32, %arg3: memref<2xi32, #tpu.memory_space<smem>>) -> (i32, i32) {
    %c0_i32 = arith.constant 0 : i32
    %c0_i32_0 = arith.constant 0 : i32
    %c0_i32_1 = arith.constant 0 : i32
    return %c0_i32, %c0_i32_0 : i32, i32
  }
  func.func @transform_7(%arg0: i32, %arg1: i32, %arg2: i32, %arg3: memref<2xi32, #tpu.memory_space<smem>>) -> (i32, i32) {
    %c0_i32 = arith.constant 0 : i32
    %c0_i32_0 = arith.constant 0 : i32
    %c0_i32_1 = arith.constant 0 : i32
    return %c0_i32, %c0_i32_0 : i32, i32
  }
  func.func @transform_8(%arg0: i32, %arg1: i32, %arg2: i32, %arg3: memref<2xi32, #tpu.memory_space<smem>>) -> (i32, i32) {
    %c0_i32 = arith.constant 0 : i32
    %c0_i32_0 = arith.constant 0 : i32
    %c0_i32_1 = arith.constant 0 : i32
    return %c0_i32, %c0_i32_0 : i32, i32
  }
  func.func @transform_9(%arg0: i32, %arg1: i32, %arg2: i32, %arg3: memref<2xi32, #tpu.memory_space<smem>>) -> (i32, i32, i32) {
    %0 = arith.muli %arg2, %arg1 : i32
    %c0_i32 = arith.constant 0 : i32
    %c0_i32_0 = arith.constant 0 : i32
    return %arg0, %0, %c0_i32 : i32, i32, i32
  }
}

module attributes {stable_mosaic.version = 11 : i64} {
  func.func @encoder_layer_kernel(%arg0: i32, %arg1: i32, %arg2: i32, %arg3: memref<2xi32, #tpu.memory_space<smem>>, %arg4: memref<1x8x32xbf16, #tpu.memory_space<vmem>>, %arg5: memref<32x32xbf16, #tpu.memory_space<vmem>>, %arg6: memref<32x64xbf16, #tpu.memory_space<vmem>>, %arg7: memref<1x64xf32, #tpu.memory_space<vmem>>, %arg8: memref<32x32xbf16, #tpu.memory_space<vmem>>, %arg9: memref<32x64xbf16, #tpu.memory_space<vmem>>, %arg10: memref<1x64xf32, #tpu.memory_space<vmem>>, %arg11: memref<64x32xbf16, #tpu.memory_space<vmem>>, %arg12: memref<9x32xf32, #tpu.memory_space<vmem>>, %arg13: memref<1x8x32xbf16, #tpu.memory_space<vmem>>, %arg14: memref<4x8x8xf32, #tpu.memory_space<vmem>>, %arg15: memref<1x32xf32, #tpu.memory_space<vmem>>) attributes {dimension_semantics = [#tpu.dimension_semantics<parallel>, #tpu.dimension_semantics<arbitrary>, #tpu.dimension_semantics<arbitrary>], iteration_bounds = array<i64: 2, 2, 1>, scalar_prefetch = 1 : i64, scratch_operands = 2 : i64, tpu.core_type = #tpu.core_type<tc>, window_params = [{transform_indices = @transform_0, window_bounds = array<i64: 1, 8, 32>}, {pipeline_mode = #tpu.pipeline_mode<synchronous>, transform_indices = @transform_1, window_bounds = array<i64: 32, 32>}, {pipeline_mode = #tpu.pipeline_mode<synchronous>, transform_indices = @transform_2, window_bounds = array<i64: 32, 64>}, {pipeline_mode = #tpu.pipeline_mode<synchronous>, transform_indices = @transform_3, window_bounds = array<i64: 1, 64>}, {pipeline_mode = #tpu.pipeline_mode<synchronous>, transform_indices = @transform_4, window_bounds = array<i64: 32, 32>}, {pipeline_mode = #tpu.pipeline_mode<synchronous>, transform_indices = @transform_5, window_bounds = array<i64: 32, 64>}, {pipeline_mode = #tpu.pipeline_mode<synchronous>, transform_indices = @transform_6, window_bounds = array<i64: 1, 64>}, {pipeline_mode = #tpu.pipeline_mode<synchronous>, transform_indices = @transform_7, window_bounds = array<i64: 64, 32>}, {pipeline_mode = #tpu.pipeline_mode<synchronous>, transform_indices = @transform_8, window_bounds = array<i64: 9, 32>}, {transform_indices = @transform_9, window_bounds = array<i64: 1, 8, 32>}]} {
    %c0 = arith.constant 0 : index
    %c0_0 = arith.constant 0 : index
    %c0_1 = arith.constant 0 : index
    %0 = vector.load %arg4[%c0, %c0_0, %c0_1] : memref<1x8x32xbf16, #tpu.memory_space<vmem>>, vector<1x8x32xbf16>
    %1 = vector.shape_cast %0 : vector<1x8x32xbf16> to vector<8x32xbf16>
    %2 = arith.index_cast %arg0 : i32 to index
    %3 = memref.load %arg3[%2] : memref<2xi32, #tpu.memory_space<smem>>
    %c0_i32 = arith.constant 0 : i32
    %4 = arith.cmpi eq, %arg1, %c0_i32 : i32
    %c0_i32_2 = arith.constant 0 : i32
    %5 = arith.cmpi eq, %arg2, %c0_i32_2 : i32
    %6 = arith.andi %4, %5 : i1
    %7 = arith.extui %6 : i1 to i32
    %c0_i32_3 = arith.constant 0 : i32
    %8 = arith.cmpi ne, %7, %c0_i32_3 : i32
    scf.if %8 {
      %cst = arith.constant 0.000000e+00 : f32
      %15 = vector.broadcast %cst : f32 to vector<4x8x8xf32>
      %c0_7 = arith.constant 0 : index
      %c0_8 = arith.constant 0 : index
      %c0_9 = arith.constant 0 : index
      %16 = vector.load %arg14[%c0_7, %c0_8, %c0_9] : memref<4x8x8xf32, #tpu.memory_space<vmem>>, vector<4x8x8xf32>
      tpu.vector_store %arg14[%c0_7, %c0_8, %c0_9], %15 {strides = array<i32>} : memref<4x8x8xf32, #tpu.memory_space<vmem>>, vector<4x8x8xf32>,
      %cst_10 = arith.constant 0.000000e+00 : f32
      %17 = vector.broadcast %cst_10 : f32 to vector<1x32xf32>
      %c0_11 = arith.constant 0 : index
      %c0_12 = arith.constant 0 : index
      %18 = vector.load %arg15[%c0_11, %c0_12] : memref<1x32xf32, #tpu.memory_space<vmem>>, vector<1x32xf32>
      tpu.vector_store %arg15[%c0_11, %c0_12], %17 {strides = array<i32>} : memref<1x32xf32, #tpu.memory_space<vmem>>, vector<1x32xf32>,
    } else {
    }
    %c0_i32_4 = arith.constant 0 : i32
    %9 = arith.cmpi eq, %arg1, %c0_i32_4 : i32
    %10 = arith.extui %9 : i1 to i32
    %c0_i32_5 = arith.constant 0 : i32
    %11 = arith.cmpi ne, %10, %c0_i32_5 : i32
    scf.if %11 {
      %c0_7 = arith.constant 0 : index
      %c0_8 = arith.constant 0 : index
      %15 = vector.load %arg6[%c0_7, %c0_8] : memref<32x64xbf16, #tpu.memory_space<vmem>>, vector<32x64xbf16>
      %cst = arith.constant dense<0.000000e+00> : vector<8x64xf32>
      %16 = tpu.matmul %1, %15, %cst {dimension_numbers = #tpu.dot_dimension_numbers<[1], [0], [0], [1], [0, 0, 1, 1], [], []>} : vector<8x32xbf16>, vector<32x64xbf16>, vector<8x64xf32> -> vector<8x64xf32>
      %c0_9 = arith.constant 0 : index
      %c0_10 = arith.constant 0 : index
      %17 = vector.load %arg7[%c0_9, %c0_10] : memref<1x64xf32, #tpu.memory_space<vmem>>, vector<1x64xf32>
      %18 = vector.broadcast %17 : vector<1x64xf32> to vector<8x64xf32>
      %19 = arith.addf %16, %18 : vector<8x64xf32>
      %20 = vector.extract_strided_slice %19 {offsets = [0, 0], sizes = [8, 32], strides = [1, 1]} : vector<8x64xf32> to vector<8x32xf32>
      %cst_11 = arith.constant 0.000000e+00 : f32
      %21 = vector.broadcast %cst_11 : f32 to vector<8x32xf32>
      %22 = arith.cmpf ogt, %20, %21 : vector<8x32xf32>
      %cst_12 = arith.constant 1.000000e+00 : f32
      %23 = vector.broadcast %cst_12 : f32 to vector<8x32xf32>
      %24 = arith.addf %20, %23 : vector<8x32xf32>
      %cst_13 = arith.constant 0.000000e+00 : f32
      %25 = vector.broadcast %cst_13 : f32 to vector<8x32xf32>
      %26 = arith.minimumf %20, %25 : vector<8x32xf32>
      %27 = math.exp %26 : vector<8x32xf32>
      %28 = arith.select %22, %24, %27 : vector<8x32xi1>, vector<8x32xf32>
      %29 = vector.extract_strided_slice %19 {offsets = [0, 32], sizes = [8, 32], strides = [1, 1]} : vector<8x64xf32> to vector<8x32xf32>
      %c8_i32 = arith.constant 8 : i32
      %30 = arith.muli %arg2, %c8_i32 : i32
      %31 = tpu.iota {dimensions = array<i32: 0>} : vector<8x1xi32>
      %32 = vector.broadcast %30 : i32 to vector<8x1xi32>
      %33 = arith.addi %32, %31 : vector<8x1xi32>
      %34 = vector.broadcast %3 : i32 to vector<8x1xi32>
      %35 = arith.cmpi slt, %33, %34 : vector<8x1xi32>
      %36 = arith.extui %35 : vector<8x1xi1> to vector<8x1xi32>
      %37 = arith.sitofp %36 : vector<8x1xi32> to vector<8x1xf32>
      %38 = vector.broadcast %37 : vector<8x1xf32> to vector<8x32xf32>
      %39 = arith.mulf %28, %38 : vector<8x32xf32>
      %c0_14 = arith.constant 0 : index
      %c0_15 = arith.constant 0 : index
      %40 = vector.load %arg15[%c0_14, %c0_15] : memref<1x32xf32, #tpu.memory_space<vmem>>, vector<1x32xf32>
      %cst_16 = arith.constant dense<0.000000e+00> : vector<32xf32>
      %41 = vector.multi_reduction <add>, %39, %cst_16 [0] : vector<8x32xf32> to vector<32xf32>
      %42 = vector.shape_cast %41 : vector<32xf32> to vector<1x32xf32>
      %43 = arith.addf %40, %42 : vector<1x32xf32>
      %c0_17 = arith.constant 0 : index
      %c0_18 = arith.constant 0 : index
      %44 = vector.load %arg15[%c0_17, %c0_18] : memref<1x32xf32, #tpu.memory_space<vmem>>, vector<1x32xf32>
      tpu.vector_store %arg15[%c0_17, %c0_18], %43 {strides = array<i32>} : memref<1x32xf32, #tpu.memory_space<vmem>>, vector<1x32xf32>,
      %45 = arith.truncf %39 : vector<8x32xf32> to vector<8x32xbf16>
      %46 = arith.truncf %29 : vector<8x32xf32> to vector<8x32xbf16>
      %c0_19 = arith.constant 0 : index
      %c0_20 = arith.constant 0 : index
      %c0_21 = arith.constant 0 : index
      %47 = vector.load %arg14[%c0_19, %c0_20, %c0_21] : memref<4x8x8xf32, #tpu.memory_space<vmem>>, vector<1x8x8xf32>
      %48 = vector.shape_cast %47 : vector<1x8x8xf32> to vector<8x8xf32>
      %49 = vector.extract_strided_slice %45 {offsets = [0, 0], sizes = [8, 8], strides = [1, 1]} : vector<8x32xbf16> to vector<8x8xbf16>
      %50 = vector.extract_strided_slice %46 {offsets = [0, 0], sizes = [8, 8], strides = [1, 1]} : vector<8x32xbf16> to vector<8x8xbf16>
      %cst_22 = arith.constant dense<0.000000e+00> : vector<8x8xf32>
      %51 = tpu.matmul %49, %50, %cst_22 {dimension_numbers = #tpu.dot_dimension_numbers<[0], [0], [1], [1], [0, 1, 1, 1], [], []>} : vector<8x8xbf16>, vector<8x8xbf16>, vector<8x8xf32> -> vector<8x8xf32>
      %52 = arith.addf %48, %51 : vector<8x8xf32>
      %c0_23 = arith.constant 0 : index
      %c0_24 = arith.constant 0 : index
      %c0_25 = arith.constant 0 : index
      %53 = vector.load %arg14[%c0_23, %c0_24, %c0_25] : memref<4x8x8xf32, #tpu.memory_space<vmem>>, vector<1x8x8xf32>
      %54 = vector.shape_cast %53 : vector<1x8x8xf32> to vector<8x8xf32>
      %55 = vector.shape_cast %52 : vector<8x8xf32> to vector<1x8x8xf32>
      tpu.vector_store %arg14[%c0_23, %c0_24, %c0_25], %55 {strides = array<i32>} : memref<4x8x8xf32, #tpu.memory_space<vmem>>, vector<1x8x8xf32>,
      %c1 = arith.constant 1 : index
      %c0_26 = arith.constant 0 : index
      %c0_27 = arith.constant 0 : index
      %56 = vector.load %arg14[%c1, %c0_26, %c0_27] : memref<4x8x8xf32, #tpu.memory_space<vmem>>, vector<1x8x8xf32>
      %57 = vector.shape_cast %56 : vector<1x8x8xf32> to vector<8x8xf32>
      %58 = vector.extract_strided_slice %45 {offsets = [0, 8], sizes = [8, 8], strides = [1, 1]} : vector<8x32xbf16> to vector<8x8xbf16>
      %59 = vector.extract_strided_slice %46 {offsets = [0, 8], sizes = [8, 8], strides = [1, 1]} : vector<8x32xbf16> to vector<8x8xbf16>
      %cst_28 = arith.constant dense<0.000000e+00> : vector<8x8xf32>
      %60 = tpu.matmul %58, %59, %cst_28 {dimension_numbers = #tpu.dot_dimension_numbers<[0], [0], [1], [1], [0, 1, 1, 1], [], []>} : vector<8x8xbf16>, vector<8x8xbf16>, vector<8x8xf32> -> vector<8x8xf32>
      %61 = arith.addf %57, %60 : vector<8x8xf32>
      %c1_29 = arith.constant 1 : index
      %c0_30 = arith.constant 0 : index
      %c0_31 = arith.constant 0 : index
      %62 = vector.load %arg14[%c1_29, %c0_30, %c0_31] : memref<4x8x8xf32, #tpu.memory_space<vmem>>, vector<1x8x8xf32>
      %63 = vector.shape_cast %62 : vector<1x8x8xf32> to vector<8x8xf32>
      %64 = vector.shape_cast %61 : vector<8x8xf32> to vector<1x8x8xf32>
      tpu.vector_store %arg14[%c1_29, %c0_30, %c0_31], %64 {strides = array<i32>} : memref<4x8x8xf32, #tpu.memory_space<vmem>>, vector<1x8x8xf32>,
      %c2 = arith.constant 2 : index
      %c0_32 = arith.constant 0 : index
      %c0_33 = arith.constant 0 : index
      %65 = vector.load %arg14[%c2, %c0_32, %c0_33] : memref<4x8x8xf32, #tpu.memory_space<vmem>>, vector<1x8x8xf32>
      %66 = vector.shape_cast %65 : vector<1x8x8xf32> to vector<8x8xf32>
      %67 = vector.extract_strided_slice %45 {offsets = [0, 16], sizes = [8, 8], strides = [1, 1]} : vector<8x32xbf16> to vector<8x8xbf16>
      %68 = vector.extract_strided_slice %46 {offsets = [0, 16], sizes = [8, 8], strides = [1, 1]} : vector<8x32xbf16> to vector<8x8xbf16>
      %cst_34 = arith.constant dense<0.000000e+00> : vector<8x8xf32>
      %69 = tpu.matmul %67, %68, %cst_34 {dimension_numbers = #tpu.dot_dimension_numbers<[0], [0], [1], [1], [0, 1, 1, 1], [], []>} : vector<8x8xbf16>, vector<8x8xbf16>, vector<8x8xf32> -> vector<8x8xf32>
      %70 = arith.addf %66, %69 : vector<8x8xf32>
      %c2_35 = arith.constant 2 : index
      %c0_36 = arith.constant 0 : index
      %c0_37 = arith.constant 0 : index
      %71 = vector.load %arg14[%c2_35, %c0_36, %c0_37] : memref<4x8x8xf32, #tpu.memory_space<vmem>>, vector<1x8x8xf32>
      %72 = vector.shape_cast %71 : vector<1x8x8xf32> to vector<8x8xf32>
      %73 = vector.shape_cast %70 : vector<8x8xf32> to vector<1x8x8xf32>
      tpu.vector_store %arg14[%c2_35, %c0_36, %c0_37], %73 {strides = array<i32>} : memref<4x8x8xf32, #tpu.memory_space<vmem>>, vector<1x8x8xf32>,
      %c3 = arith.constant 3 : index
      %c0_38 = arith.constant 0 : index
      %c0_39 = arith.constant 0 : index
      %74 = vector.load %arg14[%c3, %c0_38, %c0_39] : memref<4x8x8xf32, #tpu.memory_space<vmem>>, vector<1x8x8xf32>
      %75 = vector.shape_cast %74 : vector<1x8x8xf32> to vector<8x8xf32>
      %76 = vector.extract_strided_slice %45 {offsets = [0, 24], sizes = [8, 8], strides = [1, 1]} : vector<8x32xbf16> to vector<8x8xbf16>
      %77 = vector.extract_strided_slice %46 {offsets = [0, 24], sizes = [8, 8], strides = [1, 1]} : vector<8x32xbf16> to vector<8x8xbf16>
      %cst_40 = arith.constant dense<0.000000e+00> : vector<8x8xf32>
      %78 = tpu.matmul %76, %77, %cst_40 {dimension_numbers = #tpu.dot_dimension_numbers<[0], [0], [1], [1], [0, 1, 1, 1], [], []>} : vector<8x8xbf16>, vector<8x8xbf16>, vector<8x8xf32> -> vector<8x8xf32>
      %79 = arith.addf %75, %78 : vector<8x8xf32>
      %c3_41 = arith.constant 3 : index
      %c0_42 = arith.constant 0 : index
      %c0_43 = arith.constant 0 : index
      %80 = vector.load %arg14[%c3_41, %c0_42, %c0_43] : memref<4x8x8xf32, #tpu.memory_space<vmem>>, vector<1x8x8xf32>
      %81 = vector.shape_cast %80 : vector<1x8x8xf32> to vector<8x8xf32>
      %82 = vector.shape_cast %79 : vector<8x8xf32> to vector<1x8x8xf32>
      tpu.vector_store %arg14[%c3_41, %c0_42, %c0_43], %82 {strides = array<i32>} : memref<4x8x8xf32, #tpu.memory_space<vmem>>, vector<1x8x8xf32>,
    } else {
    }
    %c1_i32 = arith.constant 1 : i32
    %12 = arith.cmpi eq, %arg1, %c1_i32 : i32
    %13 = arith.extui %12 : i1 to i32
    %c0_i32_6 = arith.constant 0 : i32
    %14 = arith.cmpi ne, %13, %c0_i32_6 : i32
    scf.if %14 {
      %15 = arith.extf %1 : vector<8x32xbf16> to vector<8x32xf32>
      %c0_7 = arith.constant 0 : index
      %c0_8 = arith.constant 0 : index
      %16 = vector.load %arg5[%c0_7, %c0_8] : memref<32x32xbf16, #tpu.memory_space<vmem>>, vector<32x32xbf16>
      %cst = arith.constant dense<0.000000e+00> : vector<8x32xf32>
      %17 = tpu.matmul %1, %16, %cst {dimension_numbers = #tpu.dot_dimension_numbers<[1], [0], [0], [1], [0, 0, 1, 1], [], []>} : vector<8x32xbf16>, vector<32x32xbf16>, vector<8x32xf32> -> vector<8x32xf32>
      %c0_9 = arith.constant 0 : index
      %c0_10 = arith.constant 0 : index
      %18 = vector.load %arg12[%c0_9, %c0_10] : memref<9x32xf32, #tpu.memory_space<vmem>>, vector<1x32xf32>
      %19 = vector.broadcast %18 : vector<1x32xf32> to vector<8x32xf32>
      %20 = arith.addf %17, %19 : vector<8x32xf32>
      %cst_11 = arith.constant 0.000000e+00 : f32
      %21 = vector.broadcast %cst_11 : f32 to vector<8x32xf32>
      %22 = arith.cmpf ogt, %20, %21 : vector<8x32xf32>
      %cst_12 = arith.constant 1.000000e+00 : f32
      %23 = vector.broadcast %cst_12 : f32 to vector<8x32xf32>
      %24 = arith.addf %20, %23 : vector<8x32xf32>
      %cst_13 = arith.constant 0.000000e+00 : f32
      %25 = vector.broadcast %cst_13 : f32 to vector<8x32xf32>
      %26 = arith.minimumf %20, %25 : vector<8x32xf32>
      %27 = math.exp %26 : vector<8x32xf32>
      %28 = arith.select %22, %24, %27 : vector<8x32xi1>, vector<8x32xf32>
      %29 = vector.extract_strided_slice %28 {offsets = [0, 0], sizes = [8, 8], strides = [1, 1]} : vector<8x32xf32> to vector<8x8xf32>
      %c0_14 = arith.constant 0 : index
      %c0_15 = arith.constant 0 : index
      %c0_16 = arith.constant 0 : index
      %30 = vector.load %arg14[%c0_14, %c0_15, %c0_16] : memref<4x8x8xf32, #tpu.memory_space<vmem>>, vector<1x8x8xf32>
      %31 = vector.shape_cast %30 : vector<1x8x8xf32> to vector<8x8xf32>
      %cst_17 = arith.constant dense<0.000000e+00> : vector<8x8xf32>
      %32 = tpu.matmul %29, %31, %cst_17 {dimension_numbers = #tpu.dot_dimension_numbers<[1], [0], [0], [1], [0, 0, 1, 1], [], []>} : vector<8x8xf32>, vector<8x8xf32>, vector<8x8xf32> -> vector<8x8xf32>
      %c0_18 = arith.constant 0 : index
      %c0_19 = arith.constant 0 : index
      %33 = vector.load %arg15[%c0_18, %c0_19] : memref<1x32xf32, #tpu.memory_space<vmem>>, vector<1x8xf32>
      %34 = vector.broadcast %33 : vector<1x8xf32> to vector<8x8xf32>
      %35 = arith.mulf %29, %34 : vector<8x8xf32>
      %cst_20 = arith.constant dense<0.000000e+00> : vector<8xf32>
      %36 = vector.multi_reduction <add>, %35, %cst_20 [1] : vector<8x8xf32> to vector<8xf32>
      %37 = vector.shape_cast %36 : vector<8xf32> to vector<8x1xf32>
      %cst_21 = arith.constant 9.99999997E-7 : f32
      %38 = vector.broadcast %cst_21 : f32 to vector<8x1xf32>
      %39 = arith.addf %37, %38 : vector<8x1xf32>
      %40 = tpu.reciprocal %39 {approx = true} : vector<8x1xf32> -> vector<8x1xf32>
      %41 = vector.broadcast %40 : vector<8x1xf32> to vector<8x8xf32>
      %42 = arith.mulf %32, %41 : vector<8x8xf32>
      %43 = vector.extract_strided_slice %28 {offsets = [0, 8], sizes = [8, 8], strides = [1, 1]} : vector<8x32xf32> to vector<8x8xf32>
      %c1 = arith.constant 1 : index
      %c0_22 = arith.constant 0 : index
      %c0_23 = arith.constant 0 : index
      %44 = vector.load %arg14[%c1, %c0_22, %c0_23] : memref<4x8x8xf32, #tpu.memory_space<vmem>>, vector<1x8x8xf32>
      %45 = vector.shape_cast %44 : vector<1x8x8xf32> to vector<8x8xf32>
      %cst_24 = arith.constant dense<0.000000e+00> : vector<8x8xf32>
      %46 = tpu.matmul %43, %45, %cst_24 {dimension_numbers = #tpu.dot_dimension_numbers<[1], [0], [0], [1], [0, 0, 1, 1], [], []>} : vector<8x8xf32>, vector<8x8xf32>, vector<8x8xf32> -> vector<8x8xf32>
      %c0_25 = arith.constant 0 : index
      %c8 = arith.constant 8 : index
      %47 = vector.load %arg15[%c0_25, %c8] : memref<1x32xf32, #tpu.memory_space<vmem>>, vector<1x8xf32>
      %48 = vector.broadcast %47 : vector<1x8xf32> to vector<8x8xf32>
      %49 = arith.mulf %43, %48 : vector<8x8xf32>
      %cst_26 = arith.constant dense<0.000000e+00> : vector<8xf32>
      %50 = vector.multi_reduction <add>, %49, %cst_26 [1] : vector<8x8xf32> to vector<8xf32>
      %51 = vector.shape_cast %50 : vector<8xf32> to vector<8x1xf32>
      %cst_27 = arith.constant 9.99999997E-7 : f32
      %52 = vector.broadcast %cst_27 : f32 to vector<8x1xf32>
      %53 = arith.addf %51, %52 : vector<8x1xf32>
      %54 = tpu.reciprocal %53 {approx = true} : vector<8x1xf32> -> vector<8x1xf32>
      %55 = vector.broadcast %54 : vector<8x1xf32> to vector<8x8xf32>
      %56 = arith.mulf %46, %55 : vector<8x8xf32>
      %57 = vector.extract_strided_slice %28 {offsets = [0, 16], sizes = [8, 8], strides = [1, 1]} : vector<8x32xf32> to vector<8x8xf32>
      %c2 = arith.constant 2 : index
      %c0_28 = arith.constant 0 : index
      %c0_29 = arith.constant 0 : index
      %58 = vector.load %arg14[%c2, %c0_28, %c0_29] : memref<4x8x8xf32, #tpu.memory_space<vmem>>, vector<1x8x8xf32>
      %59 = vector.shape_cast %58 : vector<1x8x8xf32> to vector<8x8xf32>
      %cst_30 = arith.constant dense<0.000000e+00> : vector<8x8xf32>
      %60 = tpu.matmul %57, %59, %cst_30 {dimension_numbers = #tpu.dot_dimension_numbers<[1], [0], [0], [1], [0, 0, 1, 1], [], []>} : vector<8x8xf32>, vector<8x8xf32>, vector<8x8xf32> -> vector<8x8xf32>
      %c0_31 = arith.constant 0 : index
      %c16 = arith.constant 16 : index
      %61 = vector.load %arg15[%c0_31, %c16] : memref<1x32xf32, #tpu.memory_space<vmem>>, vector<1x8xf32>
      %62 = vector.broadcast %61 : vector<1x8xf32> to vector<8x8xf32>
      %63 = arith.mulf %57, %62 : vector<8x8xf32>
      %cst_32 = arith.constant dense<0.000000e+00> : vector<8xf32>
      %64 = vector.multi_reduction <add>, %63, %cst_32 [1] : vector<8x8xf32> to vector<8xf32>
      %65 = vector.shape_cast %64 : vector<8xf32> to vector<8x1xf32>
      %cst_33 = arith.constant 9.99999997E-7 : f32
      %66 = vector.broadcast %cst_33 : f32 to vector<8x1xf32>
      %67 = arith.addf %65, %66 : vector<8x1xf32>
      %68 = tpu.reciprocal %67 {approx = true} : vector<8x1xf32> -> vector<8x1xf32>
      %69 = vector.broadcast %68 : vector<8x1xf32> to vector<8x8xf32>
      %70 = arith.mulf %60, %69 : vector<8x8xf32>
      %71 = vector.extract_strided_slice %28 {offsets = [0, 24], sizes = [8, 8], strides = [1, 1]} : vector<8x32xf32> to vector<8x8xf32>
      %c3 = arith.constant 3 : index
      %c0_34 = arith.constant 0 : index
      %c0_35 = arith.constant 0 : index
      %72 = vector.load %arg14[%c3, %c0_34, %c0_35] : memref<4x8x8xf32, #tpu.memory_space<vmem>>, vector<1x8x8xf32>
      %73 = vector.shape_cast %72 : vector<1x8x8xf32> to vector<8x8xf32>
      %cst_36 = arith.constant dense<0.000000e+00> : vector<8x8xf32>
      %74 = tpu.matmul %71, %73, %cst_36 {dimension_numbers = #tpu.dot_dimension_numbers<[1], [0], [0], [1], [0, 0, 1, 1], [], []>} : vector<8x8xf32>, vector<8x8xf32>, vector<8x8xf32> -> vector<8x8xf32>
      %c0_37 = arith.constant 0 : index
      %c24 = arith.constant 24 : index
      %75 = vector.load %arg15[%c0_37, %c24] : memref<1x32xf32, #tpu.memory_space<vmem>>, vector<1x8xf32>
      %76 = vector.broadcast %75 : vector<1x8xf32> to vector<8x8xf32>
      %77 = arith.mulf %71, %76 : vector<8x8xf32>
      %cst_38 = arith.constant dense<0.000000e+00> : vector<8xf32>
      %78 = vector.multi_reduction <add>, %77, %cst_38 [1] : vector<8x8xf32> to vector<8xf32>
      %79 = vector.shape_cast %78 : vector<8xf32> to vector<8x1xf32>
      %cst_39 = arith.constant 9.99999997E-7 : f32
      %80 = vector.broadcast %cst_39 : f32 to vector<8x1xf32>
      %81 = arith.addf %79, %80 : vector<8x1xf32>
      %82 = tpu.reciprocal %81 {approx = true} : vector<8x1xf32> -> vector<8x1xf32>
      %83 = vector.broadcast %82 : vector<8x1xf32> to vector<8x8xf32>
      %84 = arith.mulf %74, %83 : vector<8x8xf32>
      %85 = tpu.concatenate %42, %56, %70, %84 in 1 : vector<8x8xf32>, vector<8x8xf32>, vector<8x8xf32>, vector<8x8xf32> -> vector<8x32xf32>
      %86 = arith.truncf %85 : vector<8x32xf32> to vector<8x32xbf16>
      %c0_40 = arith.constant 0 : index
      %c0_41 = arith.constant 0 : index
      %87 = vector.load %arg8[%c0_40, %c0_41] : memref<32x32xbf16, #tpu.memory_space<vmem>>, vector<32x32xbf16>
      %cst_42 = arith.constant dense<0.000000e+00> : vector<8x32xf32>
      %88 = tpu.matmul %86, %87, %cst_42 {dimension_numbers = #tpu.dot_dimension_numbers<[1], [0], [0], [1], [0, 0, 1, 1], [], []>} : vector<8x32xbf16>, vector<32x32xbf16>, vector<8x32xf32> -> vector<8x32xf32>
      %c1_43 = arith.constant 1 : index
      %c0_44 = arith.constant 0 : index
      %89 = vector.load %arg12[%c1_43, %c0_44] : memref<9x32xf32, #tpu.memory_space<vmem>>, vector<1x32xf32>
      %90 = vector.broadcast %89 : vector<1x32xf32> to vector<8x32xf32>
      %91 = arith.addf %88, %90 : vector<8x32xf32>
      %92 = arith.addf %15, %91 : vector<8x32xf32>
      %c2_45 = arith.constant 2 : index
      %c0_46 = arith.constant 0 : index
      %93 = vector.load %arg12[%c2_45, %c0_46] : memref<9x32xf32, #tpu.memory_space<vmem>>, vector<1x32xf32>
      %c3_47 = arith.constant 3 : index
      %c0_48 = arith.constant 0 : index
      %94 = vector.load %arg12[%c3_47, %c0_48] : memref<9x32xf32, #tpu.memory_space<vmem>>, vector<1x32xf32>
      %cst_49 = arith.constant dense<0.000000e+00> : vector<8xf32>
      %95 = vector.multi_reduction <add>, %92, %cst_49 [1] : vector<8x32xf32> to vector<8xf32>
      %96 = vector.shape_cast %95 : vector<8xf32> to vector<8x1xf32>
      %cst_50 = arith.constant 3.200000e+01 : f32
      %97 = vector.broadcast %cst_50 : f32 to vector<8x1xf32>
      %98 = arith.divf %96, %97 : vector<8x1xf32>
      %99 = vector.broadcast %98 : vector<8x1xf32> to vector<8x32xf32>
      %100 = arith.subf %92, %99 : vector<8x32xf32>
      %101 = arith.mulf %100, %100 : vector<8x32xf32>
      %cst_51 = arith.constant dense<0.000000e+00> : vector<8xf32>
      %102 = vector.multi_reduction <add>, %101, %cst_51 [1] : vector<8x32xf32> to vector<8xf32>
      %103 = vector.shape_cast %102 : vector<8xf32> to vector<8x1xf32>
      %cst_52 = arith.constant 3.200000e+01 : f32
      %104 = vector.broadcast %cst_52 : f32 to vector<8x1xf32>
      %105 = arith.divf %103, %104 : vector<8x1xf32>
      %cst_53 = arith.constant 9.99999974E-6 : f32
      %106 = vector.broadcast %cst_53 : f32 to vector<8x1xf32>
      %107 = arith.addf %105, %106 : vector<8x1xf32>
      %108 = math.rsqrt %107 : vector<8x1xf32>
      %109 = vector.broadcast %108 : vector<8x1xf32> to vector<8x32xf32>
      %110 = arith.mulf %100, %109 : vector<8x32xf32>
      %111 = vector.broadcast %93 : vector<1x32xf32> to vector<8x32xf32>
      %112 = arith.mulf %110, %111 : vector<8x32xf32>
      %113 = vector.broadcast %94 : vector<1x32xf32> to vector<8x32xf32>
      %114 = arith.addf %112, %113 : vector<8x32xf32>
      %115 = arith.truncf %114 : vector<8x32xf32> to vector<8x32xbf16>
      %c0_54 = arith.constant 0 : index
      %c0_55 = arith.constant 0 : index
      %116 = vector.load %arg9[%c0_54, %c0_55] : memref<32x64xbf16, #tpu.memory_space<vmem>>, vector<32x64xbf16>
      %cst_56 = arith.constant dense<0.000000e+00> : vector<8x64xf32>
      %117 = tpu.matmul %115, %116, %cst_56 {dimension_numbers = #tpu.dot_dimension_numbers<[1], [0], [0], [1], [0, 0, 1, 1], [], []>} : vector<8x32xbf16>, vector<32x64xbf16>, vector<8x64xf32> -> vector<8x64xf32>
      %c0_57 = arith.constant 0 : index
      %c0_58 = arith.constant 0 : index
      %118 = vector.load %arg10[%c0_57, %c0_58] : memref<1x64xf32, #tpu.memory_space<vmem>>, vector<1x64xf32>
      %119 = vector.broadcast %118 : vector<1x64xf32> to vector<8x64xf32>
      %120 = arith.addf %117, %119 : vector<8x64xf32>
      %cst_59 = arith.constant 5.000000e-01 : f32
      %121 = vector.broadcast %cst_59 : f32 to vector<8x64xf32>
      %122 = arith.mulf %121, %120 : vector<8x64xf32>
      %cst_60 = arith.constant 4.471500e-02 : f32
      %123 = vector.broadcast %cst_60 : f32 to vector<8x64xf32>
      %124 = arith.mulf %123, %120 : vector<8x64xf32>
      %125 = arith.mulf %124, %120 : vector<8x64xf32>
      %126 = arith.mulf %125, %120 : vector<8x64xf32>
      %127 = arith.addf %120, %126 : vector<8x64xf32>
      %cst_61 = arith.constant 0.797884583 : f32
      %128 = vector.broadcast %cst_61 : f32 to vector<8x64xf32>
      %129 = arith.mulf %128, %127 : vector<8x64xf32>
      %130 = math.tanh %129 : vector<8x64xf32>
      %cst_62 = arith.constant 1.000000e+00 : f32
      %131 = vector.broadcast %cst_62 : f32 to vector<8x64xf32>
      %132 = arith.addf %131, %130 : vector<8x64xf32>
      %133 = arith.mulf %122, %132 : vector<8x64xf32>
      %134 = arith.truncf %133 : vector<8x64xf32> to vector<8x64xbf16>
      %c0_63 = arith.constant 0 : index
      %c0_64 = arith.constant 0 : index
      %135 = vector.load %arg11[%c0_63, %c0_64] : memref<64x32xbf16, #tpu.memory_space<vmem>>, vector<64x32xbf16>
      %cst_65 = arith.constant dense<0.000000e+00> : vector<8x32xf32>
      %136 = tpu.matmul %134, %135, %cst_65 {dimension_numbers = #tpu.dot_dimension_numbers<[1], [0], [0], [1], [0, 0, 1, 1], [], []>} : vector<8x64xbf16>, vector<64x32xbf16>, vector<8x32xf32> -> vector<8x32xf32>
      %c4 = arith.constant 4 : index
      %c0_66 = arith.constant 0 : index
      %137 = vector.load %arg12[%c4, %c0_66] : memref<9x32xf32, #tpu.memory_space<vmem>>, vector<1x32xf32>
      %138 = vector.broadcast %137 : vector<1x32xf32> to vector<8x32xf32>
      %139 = arith.addf %136, %138 : vector<8x32xf32>
      %140 = arith.addf %114, %139 : vector<8x32xf32>
      %c5 = arith.constant 5 : index
      %c0_67 = arith.constant 0 : index
      %141 = vector.load %arg12[%c5, %c0_67] : memref<9x32xf32, #tpu.memory_space<vmem>>, vector<1x32xf32>
      %c6 = arith.constant 6 : index
      %c0_68 = arith.constant 0 : index
      %142 = vector.load %arg12[%c6, %c0_68] : memref<9x32xf32, #tpu.memory_space<vmem>>, vector<1x32xf32>
      %cst_69 = arith.constant dense<0.000000e+00> : vector<8xf32>
      %143 = vector.multi_reduction <add>, %140, %cst_69 [1] : vector<8x32xf32> to vector<8xf32>
      %144 = vector.shape_cast %143 : vector<8xf32> to vector<8x1xf32>
      %cst_70 = arith.constant 3.200000e+01 : f32
      %145 = vector.broadcast %cst_70 : f32 to vector<8x1xf32>
      %146 = arith.divf %144, %145 : vector<8x1xf32>
      %147 = vector.broadcast %146 : vector<8x1xf32> to vector<8x32xf32>
      %148 = arith.subf %140, %147 : vector<8x32xf32>
      %149 = arith.mulf %148, %148 : vector<8x32xf32>
      %cst_71 = arith.constant dense<0.000000e+00> : vector<8xf32>
      %150 = vector.multi_reduction <add>, %149, %cst_71 [1] : vector<8x32xf32> to vector<8xf32>
      %151 = vector.shape_cast %150 : vector<8xf32> to vector<8x1xf32>
      %cst_72 = arith.constant 3.200000e+01 : f32
      %152 = vector.broadcast %cst_72 : f32 to vector<8x1xf32>
      %153 = arith.divf %151, %152 : vector<8x1xf32>
      %cst_73 = arith.constant 9.99999974E-6 : f32
      %154 = vector.broadcast %cst_73 : f32 to vector<8x1xf32>
      %155 = arith.addf %153, %154 : vector<8x1xf32>
      %156 = math.rsqrt %155 : vector<8x1xf32>
      %157 = vector.broadcast %156 : vector<8x1xf32> to vector<8x32xf32>
      %158 = arith.mulf %148, %157 : vector<8x32xf32>
      %159 = vector.broadcast %141 : vector<1x32xf32> to vector<8x32xf32>
      %160 = arith.mulf %158, %159 : vector<8x32xf32>
      %161 = vector.broadcast %142 : vector<1x32xf32> to vector<8x32xf32>
      %162 = arith.addf %160, %161 : vector<8x32xf32>
      %163 = arith.truncf %162 : vector<8x32xf32> to vector<8x32xbf16>
      %c0_74 = arith.constant 0 : index
      %c0_75 = arith.constant 0 : index
      %c0_76 = arith.constant 0 : index
      %164 = vector.load %arg13[%c0_74, %c0_75, %c0_76] : memref<1x8x32xbf16, #tpu.memory_space<vmem>>, vector<1x8x32xbf16>
      %165 = vector.shape_cast %164 : vector<1x8x32xbf16> to vector<8x32xbf16>
      %166 = vector.shape_cast %163 : vector<8x32xbf16> to vector<1x8x32xbf16>
      tpu.vector_store %arg13[%c0_74, %c0_75, %c0_76], %166 {strides = array<i32>} : memref<1x8x32xbf16, #tpu.memory_space<vmem>>, vector<1x8x32xbf16>,
    } else {
    }
    return
  }
  func.func @transform_0(%arg0: i32, %arg1: i32, %arg2: i32, %arg3: memref<2xi32, #tpu.memory_space<smem>>) -> (i32, i32, i32) {
    %c0_i32 = arith.constant 0 : i32
    %c0_i32_0 = arith.constant 0 : i32
    return %arg0, %arg2, %c0_i32 : i32, i32, i32
  }
  func.func @transform_1(%arg0: i32, %arg1: i32, %arg2: i32, %arg3: memref<2xi32, #tpu.memory_space<smem>>) -> (i32, i32) {
    %c0_i32 = arith.constant 0 : i32
    %c0_i32_0 = arith.constant 0 : i32
    %c0_i32_1 = arith.constant 0 : i32
    return %c0_i32, %c0_i32_0 : i32, i32
  }
  func.func @transform_2(%arg0: i32, %arg1: i32, %arg2: i32, %arg3: memref<2xi32, #tpu.memory_space<smem>>) -> (i32, i32) {
    %c0_i32 = arith.constant 0 : i32
    %c0_i32_0 = arith.constant 0 : i32
    %c0_i32_1 = arith.constant 0 : i32
    return %c0_i32, %c0_i32_0 : i32, i32
  }
  func.func @transform_3(%arg0: i32, %arg1: i32, %arg2: i32, %arg3: memref<2xi32, #tpu.memory_space<smem>>) -> (i32, i32) {
    %c0_i32 = arith.constant 0 : i32
    %c0_i32_0 = arith.constant 0 : i32
    %c0_i32_1 = arith.constant 0 : i32
    return %c0_i32, %c0_i32_0 : i32, i32
  }
  func.func @transform_4(%arg0: i32, %arg1: i32, %arg2: i32, %arg3: memref<2xi32, #tpu.memory_space<smem>>) -> (i32, i32) {
    %c0_i32 = arith.constant 0 : i32
    %c0_i32_0 = arith.constant 0 : i32
    %c0_i32_1 = arith.constant 0 : i32
    return %c0_i32, %c0_i32_0 : i32, i32
  }
  func.func @transform_5(%arg0: i32, %arg1: i32, %arg2: i32, %arg3: memref<2xi32, #tpu.memory_space<smem>>) -> (i32, i32) {
    %c0_i32 = arith.constant 0 : i32
    %c0_i32_0 = arith.constant 0 : i32
    %c0_i32_1 = arith.constant 0 : i32
    return %c0_i32, %c0_i32_0 : i32, i32
  }
  func.func @transform_6(%arg0: i32, %arg1: i32, %arg2: i32, %arg3: memref<2xi32, #tpu.memory_space<smem>>) -> (i32, i32) {
    %c0_i32 = arith.constant 0 : i32
    %c0_i32_0 = arith.constant 0 : i32
    %c0_i32_1 = arith.constant 0 : i32
    return %c0_i32, %c0_i32_0 : i32, i32
  }
  func.func @transform_7(%arg0: i32, %arg1: i32, %arg2: i32, %arg3: memref<2xi32, #tpu.memory_space<smem>>) -> (i32, i32) {
    %c0_i32 = arith.constant 0 : i32
    %c0_i32_0 = arith.constant 0 : i32
    %c0_i32_1 = arith.constant 0 : i32
    return %c0_i32, %c0_i32_0 : i32, i32
  }
  func.func @transform_8(%arg0: i32, %arg1: i32, %arg2: i32, %arg3: memref<2xi32, #tpu.memory_space<smem>>) -> (i32, i32) {
    %c0_i32 = arith.constant 0 : i32
    %c0_i32_0 = arith.constant 0 : i32
    %c0_i32_1 = arith.constant 0 : i32
    return %c0_i32, %c0_i32_0 : i32, i32
  }
  func.func @transform_9(%arg0: i32, %arg1: i32, %arg2: i32, %arg3: memref<2xi32, #tpu.memory_space<smem>>) -> (i32, i32, i32) {
    %0 = arith.muli %arg2, %arg1 : i32
    %c0_i32 = arith.constant 0 : i32
    %c0_i32_0 = arith.constant 0 : i32
    return %arg0, %0, %c0_i32 : i32, i32, i32
  }
}

</mosaic_0001>

<bundles_post_ra>
// kernel: tpu_custom_call.1
= control target key start
LH: loop header
LB: loop body
LE: loop exit
PB: predicated region body
PF: predicated region fallthrough
CT: control target
= control target key end

     0   :  { %s2230_s13 = smov [#allocation5]   ;;  %s2669_s0 = inlined_call_operand.hbm [shape: s32[2], index: 0, kind: input, shape index: {}]   ;;  %s2670_s1 = inlined_call_operand.hbm [shape: bf16[2,8,32], index: 1, kind: input, shape index: {}]   ;;  %s2671_s2 = inlined_call_operand.vmem [shape: bf16[32,32], index: 2, kind: input, shape index: {}]   ;;  %s2672_s3 = inlined_call_operand.vmem [shape: bf16[32,64], index: 3, kind: input, shape index: {}]   ;;  %s2673_s4 = inlined_call_operand.hbm [shape: f32[1,64], index: 4, kind: input, shape index: {}]   ;;  %s2674_s5 = inlined_call_operand.vmem [shape: bf16[32,32], index: 5, kind: input, shape index: {}]   ;;  %s2675_s6 = inlined_call_operand.hbm [shape: bf16[32,64], index: 6, kind: input, shape index: {}]   ;;  %s2676_s7 = inlined_call_operand.hbm [shape: f32[1,64], index: 7, kind: input, shape index: {}]   ;;  %s2677_s8 = inlined_call_operand.vmem [shape: bf16[64,32], index: 8, kind: input, shape index: {}]   ;;  %s2678_s9 = inlined_call_operand.vmem [shape: f32[9,32], index: 9, kind: input, shape index: {}]   ;;  %s2679_s10 = inlined_call_operand.hbm [shape: bf16[2,8,32], index: 10, kind: output, shape index: {}]  }
   0x1   :  { %2684 = sst [smem:[#allocation24_spill]] %s2673_s4 }
   0x2   :  { %2685 = sst [smem:[#allocation25_spill]] %s2675_s6 }
   0x3   :  { %2686 = sst [smem:[#allocation26_spill]] %s2676_s7 }
   0x4   :  { %16 = dma.hbm_to_smem %s2669_s0, 16, %s2230_s13, [#allocation4] }
   0x5   :  { %2180 = dma.done.wait [#allocation4], 16 }
   0x6   :  { %2181 = vsyncadd [#allocation4], 4294967280 }
   0x7   :  { %18 = sfence }
   0x8   :  { %19 = vsyncpa [#allocation7], 0 }
   0x9   :  { %21 = vsyncpa [#allocation7 + $0x1], 0 }
   0xa   :  { %22 = vsyncpa [#allocation10], 0 }
   0xb   :  { %23 = vsyncpa [#allocation13], 0 }
   0xc   :  { %24 = vsyncpa [#allocation8], 0 }
   0xd   :  { %26 = vsyncpa [#allocation8 + $0x1], 0  ;;  %s2314_s16 = smov 0   ;;  %s2316_s17 = smov 0  }
   0xe   :  { %s2318_s18 = smov 0   ;;  %s2320_s19 = smov 0  }
   0xf   :  { %s2322_s20 = smov 0   ;;  %s2324_s0 = smov 0  }
  0x10   :  { %s2326_s21 = smov 0   ;;  %s2328_s22 = smov 0  }
  0x11 LB: > { %2687 = sst [smem:[#allocation20_spill]] %s2200_s16  ;;  %s1667_s23 = sadd.s32 4294967295, %s2228_s22   ;;  %s2228_s22 = sphi %s2328_s22, %s32_s22   ;;  %s2224_s21 = sphi %s2326_s21, %s2712_s21   ;;  %s2220_s0 = sphi %s2324_s0, %s2707_s0   ;;  %s2216_s20 = sphi %s2322_s20, %s2711_s20   ;;  %s2212_s19 = sphi %s2320_s19, %s2706_s19   ;;  %s2208_s18 = sphi %s2318_s18, %s2710_s18   ;;  %s2204_s17 = sphi %s2316_s17, %s2709_s17   ;;  %s2200_s16 = sphi %s2314_s16, %s2708_s16  }
  0x12   : > { %2688 = sst [smem:[#allocation21_spill]] %s2220_s0  ;;  %s1668_s24 = sadd.s32 4294967294, %s2228_s22  }
  0x13   : > { %p73_p0 = scmp.ne.s32.totalorder %s2204_s17, %s2200_s16  ;;  %p2358_p1 = scmp.eq.s32.totalorder %s1667_s23, 0 }
  0x14   : > { %p2362_p2 = scmp.eq.s32.totalorder %s1667_s23, 3  ;;  %p275_p3 = scmp.eq.s32.totalorder %s1668_s24, 3 }
  0x15   : > { %p2368_p4 = por %p2358_p1, %p73_p0  ;;  %p1669_p5 = scmp.ge.s32.totalorder %s2228_s22, 1 }
  0x16   : > { %p2373_p6 = por %p275_p3, %p73_p0  ;;  %p282_p7 = scmp.lt.s32.totalorder %s2228_s22, 5 }
  0x17   : > { %s2231_s30 = smov [#allocation9]   ;;  %s2232_s12 = smov [#allocation11]  }
  0x18   : > { %s2692_s28 = scalar_select %p2373_p6, 1, 0 }
  0x19   : > { %p2378_p8 = pnand %p1669_p5, %p282_p7  ;;  %s301_s11 = sshll.u32 %s2231_s30, 4  ;;  %s302_s11 = int_to_ptr.vmem [resolvable:$true] %s301_s11 }
  0x1a   : > { %2693 = sst [smem:[#allocation22_spill]] %s2692_s28  ;;  %s314_s13 = sshll.u32 %s2232_s12, 4  ;;  %s2390_s13 = int_to_ptr.vmem [resolvable:$true] %s314_s13 }
  0x1b   : > { %p1863_p9 = pneg %p2378_p8  ;;  %s2233_s15 = smov [#allocation12]  }
  0x1c   : > { %s328_s23 = sshll.u32 %s2233_s15, 4  ;;  %s2027_s24 = scalar_lea.vmem %s302_s11, 16  ;;  %s329_s23 = int_to_ptr.vmem [resolvable:$true] %s328_s23 }
  0x1d   : > { %p2386_p10 = pnand %p1863_p9, %p2358_p1  ;;  %p2028_p12 = scmp.ne.s32.totalorder %s302_s11, %s2027_s24 }
  0x1e   : > { %s2034_s30 = scalar_lea.vmem %s302_s11, 32  ;;  %p2035_p3 = scmp.lt.s32.totalorder %s302_s11, %s302_s11 }
  0x1f   : > { %p2018_p11 = pneg %p2386_p10  ;;  %p2036_p5 = scmp.lt.s32.totalorder %s2034_s30, %s2027_s24 }
  0x21   : > { %p2030_p13 = pnand %p2028_p12, %p2018_p11  ;;  %p2037_p7 = por %p2036_p5, %p2035_p3 }
  0x23   : > { %p2031_p0 = pneg %p2030_p13 }
  0x25   : > { %p2038_p9 = pnand %p2037_p7, %p2031_p0 }
  0x27   : > { %2041 = shalt.err (!%p2038_p9)
}
  0x28   : > { %s2696_s4 = sld [smem:[#allocation24_spill]]  ;;  %s2053_s15 = scalar_lea.vmem %s2390_s13, 256 }
  0x29   : > { %p2054_p6 = scmp.ne.s32.totalorder %s2390_s13, %s2053_s15  ;;  %p2061_p3 = scmp.lt.s32.totalorder %s2390_s13, %s2390_s13 }
  0x2a   : > { %p2062_p0 = scmp.lt.s32.totalorder %s2053_s15, %s2053_s15 }
  0x2b   : > { %p2056_p12 = pnand %p2054_p6, %p2018_p11 }
  0x2c   : > { %p2063_p5 = por %p2062_p0, %p2061_p3 }
  0x2d   : > { %p2057_p13 = pneg %p2056_p12 }
  0x2e   : > { %1866 = dma.hbm_to_vmem [thread:$0]  (!%p2386_p10), %s2696_s4, 16, %s302_s11, [#allocation10]  }
  0x2f   : > { %p2064_p7 = pnand %p2063_p5, %p2057_p13 }
  0x31   : > { %2067 = shalt.err (!%p2064_p7)
}
  0x32   : > { %s2234_s24 = smov 64   ;;  %s2235_s28 = smov 4  }
  0x33   : > { %s2697_s6 = sld [smem:[#allocation25_spill]]  ;;  %s2079_s12 = scalar_lea.vmem %s329_s23, 16 }
  0x34   : > { %p2080_p6 = scmp.ne.s32.totalorder %s329_s23, %s2079_s12  ;;  %s2086_s15 = scalar_lea.vmem %s329_s23, 32 }
  0x35   : > { %p2087_p13 = scmp.lt.s32.totalorder %s329_s23, %s329_s23  ;;  %p2088_p3 = scmp.lt.s32.totalorder %s2086_s15, %s2079_s12 }
  0x36   : > { %p2082_p9 = pnand %p2080_p6, %p2018_p11 }
  0x37   : > { %p2089_p0 = por %p2088_p3, %p2087_p13 }
  0x38   : > { %p2083_p12 = pneg %p2082_p9 }
  0x39   : > { %1869 = dma.hbm_to_vmem [thread:$0]  (!%p2386_p10), %s2697_s6, 256, %s2390_s13, [#allocation10], %s2234_s24, %s2234_s24, %s2235_s28  }
  0x3a   : > { %p2090_p5 = pnand %p2089_p0, %p2083_p12 }
  0x3c   : > { %2093 = shalt.err (!%p2090_p5)
}
  0x3d   : > { %s2698_s7 = sld [smem:[#allocation26_spill]]  ;;  %s47_s13 = sadd.s32 1, %s2220_s0 }
  0x3e   : > { %p49_p11 = scmp.ge.s32.totalorder %s47_s13, 2  ;;  %s51_s24 = sadd.s32 1, %s2224_s21 }
  0x3f   : > { %s60_s14 = sadd.s32 1, %s2208_s18  ;;  %p67_p7 = scmp.ne.s32.totalorder %s2208_s18, %s2204_s17 }
  0x40   : > { %s2714_s13 = smov (%p49_p11, %s47_s13), 0  ;;  %s2716_s24 = smov (!%p49_p11, %s51_s24), %s2224_s21 }
  0x41   : > { %2699 = sst [smem:[#allocation23_spill]] %s2714_s13  ;;  %p68_p6 = scmp.eq.s32.totalorder %s2228_s22, 0 }
  0x42   : > { %p2434_p9 = por %p2362_p2, %p67_p7  ;;  %p53_p12 = scmp.ge.s32.totalorder %s2716_s24, 2 }
  0x43   : > { %1872 = dma.hbm_to_vmem [thread:$0]  (!%p2386_p10), %s2698_s7, 16, %s329_s23, [#allocation13]  }
  0x44   : > { %s2700_s4 = scalar_select %p2434_p9, 1, 0 }
  0x45   : > { %p1884_p10 = scmp.lt.s32.totalorder %s2228_s22, 4  ;;  %p69_p13 = por %p68_p6, %p67_p7 }
  0x46   : > { %s345_s16 = sand.u32 1, %s2208_s18   ;;  %s2718_s24 = smov (%p53_p12, %s2716_s24), 0 }
  0x47   : > { %s1674_s23 = sshll.u32 %s345_s16, 2  ;;  %s55_s28 = ssub.s32 %s2224_s21, %s2718_s24 }
  0x48   : > { %p58_p3 = scmp.eq.s32.totalorder %s55_s28, 0  ;;  %s1675_s30 = sshll.u32 %s2224_s21, 6 }
  0x49   : > { %s355_s26 = scalar_lea.hbm %s2670_s1, %s1675_s30  ;;  %s349_s15 = scalar_lea.vmem [#allocation6], %s1674_s23 }
  0x4a   : > { %s357_s6 = sshll.u32 %s349_s15, 4  ;;  %p2453_p2 = pnand %p1884_p10, %p69_p13  ;;  %s358_s6 = int_to_ptr.vmem [resolvable:$true] %s357_s6 }
  0x4b   : > { %s2449_s7 = scalar_select %p58_p3, %s2208_s18, %s60_s14  }
  0x4c   : > { %s346_s0 = scalar_lea.sflag [#allocation7], %s345_s16  ;;  %p2096_p0 = pneg %p2453_p2 }
  0x4d   : > { %s2107_s28 = scalar_lea.vmem %s358_s6, 64  ;;  %s2236_s11 = smov [#allocation6]  }
  0x4e   : > { %p2108_p5 = scmp.ne.s32.totalorder %s358_s6, %s2107_s28  ;;  %s2112_s30 = sshll.u32 %s2236_s11, 4  ;;  %s2113_s30 = int_to_ptr.vmem [resolvable:$false] %s2112_s30 }
  0x4f   : > { %s2114_s23 = scalar_lea.vmem %s2113_s30, 128  ;;  %p2115_p6 = scmp.lt.s32.totalorder %s358_s6, %s2113_s30 }
  0x50   : > { %p2110_p11 = pnand %p2108_p5, %p2096_p0  ;;  %p2116_p12 = scmp.lt.s32.totalorder %s2114_s23, %s2107_s28 }
  0x52   : > { %p2111_p7 = pneg %p2110_p11  ;;  %p2117_p3 = por %p2116_p12, %p2115_p6 }
  0x54   : > { %p2118_p9 = pnand %p2117_p3, %p2111_p7 }
  0x56   : > { %2121 = shalt.err (!%p2118_p9)
}
  0x57   : > { %1876 = dma.hbm_to_vmem [thread:$0]  (!%p2453_p2), %s355_s26, 64, %s358_s6, %s346_s0  }
  0x58   : > { %366 = sbr.rel (%p2378_p8) target bundleno = 2690 (0xa82), region = 56  ;;  %s2464_s14 = sand.u32 (!%p2378_p8), 1, %s2204_s17  }
  0x59   : > { %s1677_s16 = sshll.u32 (!%p2378_p8), %s2464_s14, 2  ;;  %s369_s12 = scalar_lea.sflag (!%p2378_p8), [#allocation7], %s2464_s14 }
  0x5a   : > { %s372_s15 = scalar_lea.vmem (!%p2378_p8), [#allocation6], %s1677_s16 }
  0x5d   : > { %2183 = dma.done.wait (%p2368_p4), %s369_s12, 64  }
  0x5e   : > { %2185 = vsyncadd (%p2368_p4), %s369_s12, 4294967232 }
  0x5f   : > { %2187 = dma.done.wait (%p2358_p1), [#allocation10], 272  }
  0x60   : > { %2189 = vsyncadd (%p2358_p1), [#allocation10], 4294967024 }
  0x61   : > { %2191 = dma.done.wait (%p2358_p1), [#allocation13], 16  }
  0x62   : > { %2193 = vsyncadd (%p2358_p1), [#allocation13], 4294967280  ;;  %p423_p8 = scmp.eq.s32.totalorder %s2212_s19, 0  ;;  %s2482_s6 = sld [smem:[#allocation5 + %s2216_s20]]  ;;  %v2484_v0 = vld [vmem:[%s372_s15] sm:$0xf] }
  0x63   : > { %s2486_s0 = scalar_lea.vmem [#allocation14], %s1677_s16  ;;  %vm429_vm0 = vcmask (%p423_p8), 64512   ;;  %vm434_vm1 = vcmask (%p423_p8), 253952   ;;  %v2237_v1 = vmov (%p423_p8), 0.0  }
  0x64   : > { %428 = sbr.rel (!%p423_p8) target bundleno = 105 (0x69), region = 76  ;;  %430 = vst.msk [vmem:[#allocation2] sm:$0xff] (%p423_p8), %vm429_vm0, %v2237_v1  ;;  %431 = vst.msk [vmem:[#allocation2 + $0x8] sm:$0xff] (%p423_p8), %vm429_vm0, %v2237_v1 }
  0x65   : > { %432 = vst.msk [vmem:[#allocation2 + $0x10] sm:$0xff] (%p423_p8), %vm429_vm0, %v2237_v1  ;;  %433 = vst.msk [vmem:[#allocation2 + $0x18] sm:$0xff] (%p423_p8), %vm429_vm0, %v2237_v1 }
  0x66   : > { %435 = vst.msk [vmem:[#allocation3] sm:$0x1] (%p423_p8), %vm434_vm1, %v2237_v1 }
  0x69 PF: > { %p1683_p1 = scmp.ne.s32.totalorder %s2212_s19, 0 }
  0x6a   : > { %s2240_s26 = smov (!%p1683_p1), 104   ;;  %s2241_s28 = smov (!%p1683_p1), 120  }
  0x6b   : > { %438 = sbr.rel (%p1683_p1) target bundleno = 760 (0x2f8), region = 80  ;;  %s2242_s11 = smov (!%p1683_p1), 96  }
  0x6c   : > { %s2243_s30 = smov (!%p1683_p1), 112   ;;  %s2244_s23 = smov (!%p1683_p1), 80  }
  0x6d   : > { %s2245_s16 = smov (!%p1683_p1), 88   ;;  %s2246_s12 = smov (!%p1683_p1), 72  }
  0x70   : > { %v1978_v2 = vld [vmem:[%s2672_s3 + $0x8] sm:$0xff]   ;;  %v2238_v3 = vmov 0.0   ;;  %v1979_v4 = vld [vmem:[%s2672_s3] sm:$0xff]   ;;  %vm2239_vm2 = vmmov 0   ;;  %vm462_vm3 = vcmask 261120   ;;  %v513_v13 = vlaneseq  ;;  %v678_v57 = vld [vmem:[#allocation2 + $0x10] sm:$0xff] }
  0x71   : > { %1759 = vmatprep.subr.bf16.mxu0 %v2238_v3  ;;  %1767 = vmatprep.subr.bf16.mxu1 %v2238_v3  ;;  %v1684_v5 = vld [vmem:[#allocation9] ss:$0 sm:$0xff]  ;;  %v517_v15 = vstv %s2482_s6  ;;  %v522_v29 = vld [vmem:[#allocation3] sm:$0x1]  ;;  %vm531_vm6 = vcmask 253952   ;;  %vm559_vm7 = vcmask 1043456  }
  0x72   : > { %1760 = vmatpush3.bf16.msra.mxu0 %v1978_v2  ;;  %1763 = vmatprep.mubr.msk.bf16.mxu0 %vm2239_vm2, %v2238_v3  ;;  %v514_v14 = vshrl.u32 %v513_v13, 7  ;;  %vm555_vm8 = vcmask 64512   ;;  %v535_v47 = vld [vmem:[#allocation2] sm:$0xff]  ;;  %v606_v53 = vld [vmem:[#allocation2 + $0x8] sm:$0xff]  ;;  %v749_v63 = vld [vmem:[#allocation2 + $0x18] sm:$0xff] }
  0x73   : > { %1761 = vmatprep.subr.bf16.mxu0 %v2238_v3  ;;  %1769 = vmatprep.mubr.msk.bf16.mxu1 %vm2239_vm2, %v2238_v3 }
  0x74   : > { %vm518_vm4 = vcmp.lt.s32.totalorder %v514_v14, %v517_v15 }
  0x75   : > { %v1688_v17 = vsel %vm518_vm4, 1.0, %v2238_v3 }
  0x76   : > { %1762 = vmatpush3.bf16.msra.mxu0 %v1979_v4 }
  0x77   : > { %1779 = vmatprep.subr.bf16.mxu0 %v2238_v3 }
  0x79   : > { %1764 = vmatmul.mubr.msk.bf16.vlgmr.msra.gmra.mxu0 %vm462_vm3, %v2484_v0 }
  0x7a   : > { %1781 = vmatprep.mubr.msk.bf16.mxu0 %vm2239_vm2, %v2238_v3 }
 0x139   : > { %v500_v6 = vpop.f32.mrf.mxu0 }
 0x13a   : > { %v501_v7 = vadd.f32 %v1684_v5, %v500_v6 }
 0x13b   : > { %v1765_v8 = vpop.f32.mrf.mxu0 }
 0x13c   : > { %v508_v9 = vmin.f32 %v501_v7, 0.0  ;;  %v507_v16 = vadd.f32 1.0, %v501_v7  ;;  %vm506_vm5 = vcmp.gt.f32.partialorder %v501_v7, 0.0  ;;  %v534_v25 = vpack.c.bf16 %v501_v7, %v501_v7 }
 0x13d   : > { %v503_v10 = vpop.f32.mrf.mxu0 }
 0x13e   : > { %v509_v11 = vmul.f32 1.442695, %v508_v9 }
 0x13f   : > { %v1766_v12 = vpop.f32.mrf.mxu0 }
 0x140   : > { %1980 = vpow2.f32 %v509_v11 }
 0x14d   : > { %v1981_v18 = vpop.eup %1980 }
 0x14e   : > { %v511_v19 = vsel %vm506_vm5, %v507_v16, %v1981_v18 }
 0x14f   : > { %v521_v20 = vmul.f32 %v1688_v17, %v511_v19 }
 0x151   : > { %v533_v21 = vpack.c.bf16 %v521_v20, %v521_v20  ;;  %v523_v22 = vsel %vm462_vm3, %v521_v20, 0.0 }
 0x152   : > { %v524_v23 = vrot.slane %v523_v22, 4 }
 0x153   : > { %750 = vrot.lane.b32.xlu1 %v533_v21, %s2240_s26  ;;  %608 = vrot.lane.b32.xlu0 %v533_v21, %s2241_s28 }
 0x154   : > { %v525_v24 = vadd.f32 %v524_v23, %v523_v22 }
 0x156   : > { %v526_v26 = vrot.slane %v525_v24, 2 }
 0x157   : > { %553 = vrot.lane.b32.xlu1 %v534_v25, %s2242_s11  ;;  %679 = vrot.lane.b32.xlu0 %v533_v21, %s2243_s30 }
 0x158   : > { %v527_v27 = vadd.f32 %v526_v26, %v525_v24 }
 0x15a   : > { %v528_v28 = vrot.slane %v527_v27, 1 }
 0x15b   : > { %698 = vrot.lane.b32.xlu1 %v534_v25, %s2244_s23  ;;  %627 = vrot.lane.b32.xlu0 %v534_v25, %s2245_s16 }
 0x15c   : > { %v529_v30 = vadd.f32 %v528_v28, %v527_v27 }
 0x15e   : > { %v530_v31 = vadd.f32 %v529_v30, %v522_v29 }
 0x15f   : > { %769 = vrot.lane.b32.xlu0 %v534_v25, %s2246_s12 }
 0x160   : > { %532 = vst.msk [vmem:[#allocation3] sm:$0x1] %vm531_vm6, %v530_v31 }
 0x17e   : > { %536 = vxpose.xlu1.c.b16.start.end [1/1] (short) (narrow) %v533_v21, 16 }
 0x1c5   : > { %v751_v32 = vpop.permute.xlu1 %750  ;;  %v609_v33 = vpop.permute.xlu0 %608 }
 0x1c6   : > { %753 = vxpose.xlu1.c.b16.start.end [1/1] (short) (narrow) %v751_v32, 16  ;;  %611 = vxpose.xlu0.c.b16.start.end [1/1] (short) (narrow) %v609_v33, 16 }
 0x1c9   : > { %v554_v34 = vpop.permute.xlu1 %553  ;;  %v680_v35 = vpop.permute.xlu0 %679 }
 0x1ca   : > { %682 = vxpose.xlu0.c.b16.start.end [1/1] (short) (narrow) %v680_v35, 16  ;;  %v561_v36 = vsel %vm559_vm7, %v554_v34, 0 }
 0x1cb   : > { %1768 = vmatpush3.bf16.msra.mxu1 %v561_v36 }
 0x1cc   : > { %1773 = vmatprep.subr.bf16.mxu1 %v2238_v3 }
 0x1cd   : > { %v699_v37 = vpop.permute.xlu1 %698  ;;  %v628_v39 = vpop.permute.xlu0 %627 }
 0x1ce   : > { %v704_v38 = vsel %vm559_vm7, %v699_v37, 0  ;;  %v633_v41 = vsel %vm559_vm7, %v628_v39, 0 }
 0x1cf   : > { %1780 = vmatpush3.bf16.msra.mxu0 %v704_v38 }
 0x1d1   : > { %v770_v42 = vpop.permute.xlu0 %769 }
 0x1d2   : > { %v775_v44 = vsel %vm559_vm7, %v770_v42, 0 }
 0x1e0   : > { %v544_v40 = vpop.trf.xlu1 }
 0x1e1   : > { %1770 = vmatmul.mubr.msk.bf16.vlgmr.msra.gmra.mxu1 %vm555_vm8, %v544_v40 }
 0x1e2   : > { %1774 = vmatpush3.bf16.msra.mxu1 %v633_v41  ;;  %1775 = vmatprep.mubr.msk.bf16.mxu1 %vm2239_vm2, %v2238_v3 }
 0x1e3   : > { %1785 = vmatprep.subr.bf16.mxu1 %v2238_v3 }
 0x228   : > { %v619_v43 = vpop.trf.xlu0  ;;  %v761_v46 = vpop.trf.xlu1 }
 0x229   : > { %1776 = vmatmul.mubr.msk.bf16.vlgmr.msra.gmra.mxu1 %vm555_vm8, %v619_v43 }
 0x22a   : > { %1786 = vmatpush3.bf16.msra.mxu1 %v775_v44  ;;  %1787 = vmatprep.mubr.msk.bf16.mxu1 %vm2239_vm2, %v2238_v3 }
 0x22c   : > { %v690_v45 = vpop.trf.xlu0 }
 0x22d   : > { %1782 = vmatmul.mubr.msk.bf16.vlgmr.msra.gmra.mxu0 %vm555_vm8, %v690_v45 }
 0x231   : > { %1788 = vmatmul.mubr.msk.bf16.vlgmr.msra.gmra.mxu1 %vm555_vm8, %v761_v46 }
 0x2a1   : > { %v597_v48 = vpop.f32.mrf.mxu1 }
 0x2a2   : > { %v603_v49 = vadd.f32 %v597_v48, %v535_v47 }
 0x2a3   : > { %v1771_v50 = vpop.f32.mrf.mxu1 }
 0x2a4   : > { %604 = vst.msk [vmem:[#allocation2] sm:$0xff] %vm555_vm8, %v603_v49 }
 0x2a5   : > { %v600_v51 = vpop.f32.mrf.mxu1 }
 0x2a7   : > { %v1772_v52 = vpop.f32.mrf.mxu1 }
 0x2e9   : > { %v669_v54 = vpop.f32.mrf.mxu1 }
 0x2ea   : > { %v675_v55 = vadd.f32 %v669_v54, %v606_v53 }
 0x2eb   : > { %v1777_v56 = vpop.f32.mrf.mxu1 }
 0x2ec   : > { %676 = vst.msk [vmem:[#allocation2 + $0x8] sm:$0xff] %vm555_vm8, %v675_v55 }
 0x2ed   : > { %v672_v58 = vpop.f32.mrf.mxu1  ;;  %v740_v59 = vpop.f32.mrf.mxu0 }
 0x2ee   : > { %v746_v60 = vadd.f32 %v740_v59, %v678_v57 }
 0x2ef   : > { %v1778_v61 = vpop.f32.mrf.mxu1  ;;  %v1783_v62 = vpop.f32.mrf.mxu0 }
 0x2f0   : > { %747 = vst.msk [vmem:[#allocation2 + $0x10] sm:$0xff] %vm555_vm8, %v746_v60 }
 0x2f1   : > { %v743_v1 = vpop.f32.mrf.mxu0  ;;  %v811_v2 = vpop.f32.mrf.mxu1 }
 0x2f2   : > { %v817_v3 = vadd.f32 %v811_v2, %v749_v63 }
 0x2f3   : > { %v1784_v4 = vpop.f32.mrf.mxu0  ;;  %v1789_v5 = vpop.f32.mrf.mxu1 }
 0x2f4   : > { %818 = vst.msk [vmem:[#allocation2 + $0x18] sm:$0xff] %vm555_vm8, %v817_v3 }
 0x2f5   : > { %v814_v6 = vpop.f32.mrf.mxu1 }
 0x2f7   : > { %v1790_v7 = vpop.f32.mrf.mxu1 }
 0x2f8 PF: > { %p1693_p4 = scmp.ne.s32.totalorder %s2212_s19, 1 }
 0x2f9   : > { %s2249_s13 = smov (!%p1693_p4), 104   ;;  %s2250_s26 = smov (!%p1693_p4), 120  }
 0x2fa   : > { %822 = sbr.rel (%p1693_p4) target bundleno = 2666 (0xa6a), region = 84  ;;  %s2251_s28 = smov (!%p1693_p4), 112  }
 0x2fb   : > { %s2252_s12 = smov (!%p1693_p4), 8   ;;  %s2253_s15 = smov (!%p1693_p4), 16  }
 0x2fc   : > { %s2254_s6 = smov (!%p1693_p4), 24  }
 0x2ff   : > { %v1982_v8 = vld [vmem:[%s2671_s2 + $0x8] sm:$0xff]   ;;  %v2247_v9 = vmov 0.0   ;;  %v1983_v10 = vld [vmem:[%s2671_s2] sm:$0xff]   ;;  %vm2248_vm9 = vmmov 0   ;;  %vm845_vm10 = vcmask 261120   ;;  %vm896_vm12 = vcmask 64512  }
 0x300   : > { %1791 = vmatprep.subr.bf16.mxu0 %v2247_v9  ;;  %1799 = vmatprep.subr.mxu1 %v2247_v9  ;;  %v895_v11 = vld [vmem:[#allocation2] sm:$0xff]  ;;  %v985_v24 = vld [vmem:[#allocation2 + $0x8] sm:$0xff]  ;;  %v1071_v26 = vld [vmem:[#allocation2 + $0x10] sm:$0xff]  ;;  %vm1253_vm13 = vcmask 130048   ;;  %vm1255_vm14 = vcmask 195584   ;;  %vm1463_vm15 = vcmask 523264  }
 0x301   : > { %1792 = vmatpush3.bf16.msra.mxu0 %v1982_v8  ;;  %1795 = vmatprep.mubr.msk.bf16.mxu0 %vm2248_vm9, %v2247_v9  ;;  %v1694_v12 = vld [vmem:[%s2678_s9] ss:$0 sm:$0xff]  ;;  %v1156_v29 = vld [vmem:[#allocation2 + $0x18] sm:$0xff]  ;;  %v1984_v46 = vld [vmem:[%s2674_s5 + $0x8] sm:$0xff]   ;;  %vm1534_vm0 = vcmask 257024  }
 0x302   : > { %1793 = vmatprep.subr.bf16.mxu0 %v2247_v9  ;;  %1801 = vmatprep.mubr.msk.f32.mxu1 %vm2248_vm9, %v2247_v9  ;;  %v1699_v23 = vld [vmem:[#allocation3] ss:$0 sm:$0xff]  ;;  %v1703_v8 = vld [vmem:[%s2678_s9 + $0x1] ss:$0 sm:$0xff] }
 0x303   : > { %1800 = vmatpush3.msra.mxu1 %v895_v11  ;;  %v1985_v47 = vld [vmem:[%s2674_s5] sm:$0xff]  }
 0x304   : > { %1804 = vmatprep.subr.mxu1 %v2247_v9 }
 0x305   : > { %1794 = vmatpush3.bf16.msra.mxu0 %v1983_v10  ;;  %v823_v10 = vunpack.c.l.bf16 %v2484_v0 }
 0x306   : > { %1835 = vmatprep.subr.bf16.mxu0 %v2247_v9 }
 0x308   : > { %1796 = vmatmul.mubr.msk.bf16.vlgmr.msra.gmra.mxu0 %vm845_vm10, %v2484_v0 }
 0x309   : > { %1843 = vmatprep.mubr.msk.bf16.mxu0 %vm2248_vm9, %v2247_v9 }
 0x3c8   : > { %v883_v13 = vpop.f32.mrf.mxu0 }
 0x3c9   : > { %v884_v14 = vadd.f32 %v1694_v12, %v883_v13 }
 0x3ca   : > { %v1797_v15 = vpop.f32.mrf.mxu0 }
 0x3cb   : > { %v891_v16 = vmin.f32 %v884_v14, 0.0  ;;  %v890_v20 = vadd.f32 1.0, %v884_v14  ;;  %vm889_vm11 = vcmp.gt.f32.partialorder %v884_v14, 0.0 }
 0x3cc   : > { %v886_v17 = vpop.f32.mrf.mxu0 }
 0x3cd   : > { %v892_v18 = vmul.f32 1.442695, %v891_v16 }
 0x3ce   : > { %v1798_v19 = vpop.f32.mrf.mxu0 }
 0x3cf   : > { %1992 = vpow2.f32 %v892_v18 }
 0x3dc   : > { %v1993_v21 = vpop.eup %1992 }
 0x3dd   : > { %v894_v22 = vsel %vm889_vm11, %v890_v20, %v1993_v21 }
 0x3de   : > { %1157 = vrot.lane.b32.xlu1 %v894_v22, %s2249_s13  ;;  %986 = vrot.lane.b32.xlu0 %v894_v22, %s2250_s26  ;;  %v977_v25 = vmul.f32 %v1699_v23, %v894_v22  ;;  %v1986_v23 = vld [vmem:[#allocation11 + $0x8] sm:$0xff]  }
 0x3df   : > { %1802 = vmatmul.mubr.msk.f32.vlgmr.msra.gmra.mxu1 %vm896_vm12, %v894_v22 }
 0x3e0   : > { %1805 = vmatpush3.msra.mxu1 %v985_v24  ;;  %1806 = vmatprep.mubr.msk.f32.mxu1 %vm2248_vm9, %v2247_v9  ;;  %v978_v37 = vsel %vm896_vm12, %v977_v25, 0.0  ;;  %v1987_v24 = vld [vmem:[#allocation11] sm:$0xff]  }
 0x3e1   : > { %1809 = vmatprep.subr.mxu1 %v2247_v9 }
 0x3e2   : > { %1072 = vrot.lane.b32.xlu0 %v894_v22, %s2251_s28  ;;  %1061 = vrot.lane.b32.xlu1 %v977_v25, %s2250_s26 }
 0x3e6   : > { %1146 = vrot.lane.b32.xlu0 %v977_v25, %s2251_s28  ;;  %1231 = vrot.lane.b32.xlu1 %v977_v25, %s2249_s13 }
 0x450   : > { %v1158_v27 = vpop.permute.xlu1 %1157  ;;  %v987_v28 = vpop.permute.xlu0 %986 }
 0x451   : > { %1807 = vmatmul.mubr.msk.f32.vlgmr.msra.gmra.mxu1 %vm896_vm12, %v987_v28  ;;  %v1707_v28 = vld [vmem:[%s2678_s9 + $0x2] ss:$0 sm:$0xff] }
 0x452   : > { %1810 = vmatpush3.msra.mxu1 %v1071_v26  ;;  %1811 = vmatprep.mubr.msk.f32.mxu1 %vm2248_vm9, %v2247_v9 }
 0x453   : > { %1814 = vmatprep.subr.mxu1 %v2247_v9 }
 0x454   : > { %v1073_v30 = vpop.permute.xlu0 %1072  ;;  %v1062_v31 = vpop.permute.xlu1 %1061 }
 0x455   : > { %1812 = vmatmul.mubr.msk.f32.vlgmr.msra.gmra.mxu1 %vm896_vm12, %v1073_v30  ;;  %v1064_v32 = vsel %vm896_vm12, %v1062_v31, 0.0  ;;  %v1708_v30 = vld [vmem:[%s2678_s9 + $0x3] ss:$0 sm:$0xff] }
 0x456   : > { %1815 = vmatpush3.msra.mxu1 %v1156_v29  ;;  %1065 = vadd.xlane.f32.xlu0 %v1064_v32 }
 0x457   : > { %1816 = vmatprep.mubr.msk.f32.mxu1 %vm2248_vm9, %v2247_v9  ;;  %1819 = vmatprep.subr.bf16.mxu1 %v2247_v9 }
 0x458   : > { %v1147_v33 = vpop.permute.xlu0 %1146  ;;  %v1232_v34 = vpop.permute.xlu1 %1231 }
 0x459   : > { %1817 = vmatmul.mubr.msk.f32.vlgmr.msra.gmra.mxu1 %vm896_vm12, %v1158_v27  ;;  %v1149_v35 = vsel %vm896_vm12, %v1147_v33, 0.0  ;;  %v1234_v36 = vsel %vm896_vm12, %v1232_v34, 0.0  ;;  %v1988_v34 = vld [vmem:[%s2677_s8 + $0x18] sm:$0xff]  }
 0x45a   : > { %1150 = vadd.xlane.f32.xlu1 %v1149_v35  ;;  %1235 = vadd.xlane.f32.xlu0 %v1234_v36  ;;  %v1989_v35 = vld [vmem:[%s2677_s8 + $0x10] sm:$0xff]   ;;  %v1990_v36 = vld [vmem:[%s2677_s8 + $0x8] sm:$0xff]  }
 0x45b   : > { %1823 = vmatprep.mubr.msk.bf16.mxu1 %vm2248_vm9, %v2247_v9  ;;  %1820 = vmatpush3.bf16.msra.mxu1 %v1984_v46 }
 0x45c   : > { %1821 = vmatprep.subr.bf16.mxu1 %v2247_v9  ;;  %1836 = vmatpush3.bf16.msra.mxu0 %v1988_v34 }
 0x45d   : > { %1837 = vmatprep.subr.bf16.mxu0 %v2247_v9 }
 0x45e   : > { %979 = vadd.xlane.f32.xlu0 %v978_v37  ;;  %v1991_v37 = vld [vmem:[%s2677_s8] sm:$0xff]  }
 0x45f   : > { %1822 = vmatpush3.bf16.msra.mxu1 %v1985_v47 }
 0x460   : > { %1827 = vmatprep.subr.bf16.mxu1 %v2247_v9  ;;  %1838 = vmatpush3.bf16.msra.mxu0 %v1989_v35 }
 0x461   : > { %1839 = vmatprep.subr.bf16.mxu0 %v2247_v9 }
 0x464   : > { %1840 = vmatpush3.bf16.msra.mxu0 %v1990_v36 }
 0x465   : > { %1841 = vmatprep.subr.bf16.mxu0 %v2247_v9 }
 0x468   : > { %1842 = vmatpush3.bf16.msra.mxu0 %v1991_v37 }
 0x49f   : > { %v966_v38 = vpop.f32.mrf.mxu1 }
 0x4a1   : > { %v1803_v39 = vpop.f32.mrf.mxu1 }
 0x4df   : > { %v1066_v40 = vpop.xlane.xlu0 %1065 }
 0x4e0   : > { %v1067_v41 = vadd.f32 1e-06, %v1066_v40 }
 0x4e2   : > { %1994 = vrcp.f32 %v1067_v41 }
 0x4e3   : > { %v1151_v42 = vpop.xlane.xlu1 %1150  ;;  %v1236_v44 = vpop.xlane.xlu0 %1235 }
 0x4e4   : > { %v1152_v43 = vadd.f32 1e-06, %v1151_v42  ;;  %v1237_v45 = vadd.f32 1e-06, %v1236_v44 }
 0x4e6   : > { %1996 = vrcp.f32 %v1152_v43 }
 0x4e7   : > { %1998 = vrcp.f32 %v1237_v45  ;;  %v980_v60 = vpop.xlane.xlu0 %979 }
 0x4e8   : > { %v981_v61 = vadd.f32 1e-06, %v980_v60 }
 0x4ea   : > { %2000 = vrcp.f32 %v981_v61 }
 0x4ef   : > { %v1995_v48 = vpop.eup %1994 }
 0x4f3   : > { %v1997_v52 = vpop.eup %1996 }
 0x4f4   : > { %v1999_v56 = vpop.eup %1998 }
 0x4f7   : > { %v2001_v62 = vpop.eup %2000 }
 0x4f8   : > { %v983_v1 = vmul.f32 %v2001_v62, %v966_v38  ;;  %v1709_v38 = vld [vmem:[#allocation12] ss:$0 sm:$0xff] }
 0x511   : > { %v1056_v49 = vpop.f32.mrf.mxu1 }
 0x512   : > { %v1069_v50 = vmul.f32 %v1995_v48, %v1056_v49 }
 0x513   : > { %v1808_v51 = vpop.f32.mrf.mxu1 }
 0x514   : > { %1241 = vrot.lane.b32.xlu1 %v1069_v50, %s2252_s12 }
 0x515   : > { %v1142_v53 = vpop.f32.mrf.mxu1 }
 0x516   : > { %v1154_v54 = vmul.f32 %v1997_v52, %v1142_v53 }
 0x517   : > { %v1813_v55 = vpop.f32.mrf.mxu1 }
 0x518   : > { %1245 = vrot.lane.b32.xlu0 %v1154_v54, %s2253_s15 }
 0x519   : > { %v1227_v57 = vpop.f32.mrf.mxu1 }
 0x51a   : > { %v1239_v58 = vmul.f32 %v1999_v56, %v1227_v57 }
 0x51b   : > { %v1818_v59 = vpop.f32.mrf.mxu1 }
 0x51c   : > { %1249 = vrot.lane.b32.xlu1 %v1239_v58, %s2254_s6 }
 0x586   : > { %v1242_v63 = vpop.permute.xlu1 %1241 }
 0x587   : > { %v1252_v3 = vsel %vm896_vm12, %v983_v1, %v1242_v63 }
 0x58a   : > { %v1246_v2 = vpop.permute.xlu0 %1245 }
 0x58b   : > { %v1254_v4 = vsel %vm1253_vm13, %v1252_v3, %v1246_v2 }
 0x58e   : > { %v1250_v5 = vpop.permute.xlu1 %1249 }
 0x58f   : > { %v1256_v6 = vsel %vm1255_vm14, %v1254_v4, %v1250_v5 }
 0x590   : > { %v1257_v7 = vpack.c.bf16 %v1256_v6, %v1256_v6 }
 0x592   : > { %1824 = vmatmul.mubr.msk.bf16.vlgmr.msra.gmra.mxu1 %vm845_vm10, %v1257_v7  ;;  %v1719_v7 = vld [vmem:[%s2678_s9 + $0x5] ss:$0 sm:$0xff] }
 0x593   : > { %1831 = vmatprep.mubr.msk.bf16.mxu1 %vm2248_vm9, %v2247_v9  ;;  %1828 = vmatpush3.bf16.msra.mxu1 %v1986_v23 }
 0x594   : > { %1829 = vmatprep.subr.bf16.mxu1 %v2247_v9  ;;  %v1713_v9 = vld [vmem:[%s2678_s9 + $0x4] ss:$0 sm:$0xff] }
 0x597   : > { %1830 = vmatpush3.bf16.msra.mxu1 %v1987_v24 }
 0x652   : > { %v1316_v11 = vpop.f32.mrf.mxu1 }
 0x653   : > { %v1317_v12 = vadd.f32 %v1703_v8, %v1316_v11 }
 0x654   : > { %v1825_v13 = vpop.f32.mrf.mxu1 }
 0x655   : > { %v1322_v14 = vadd.f32 %v1317_v12, %v823_v10  ;;  %v1720_v10 = vld [vmem:[%s2678_s9 + $0x6] ss:$0 sm:$0xff] }
 0x656   : > { %v1319_v15 = vpop.f32.mrf.mxu1 }
 0x657   : > { %v1325_v16 = vsel %vm845_vm10, %v1322_v14, 0.0 }
 0x658   : > { %v1826_v17 = vpop.f32.mrf.mxu1  ;;  %1326 = vadd.xlane.f32.xlu1 %v1325_v16 }
 0x6e1   : > { %v1327_v18 = vpop.xlane.xlu1 %1326 }
 0x6e2   : > { %v1329_v19 = vmul.f32 0.03125, %v1327_v18 }
 0x6e4   : > { %v1330_v20 = vsub.f32 %v1322_v14, %v1329_v19 }
 0x6e6   : > { %v1331_v21 = vmul.f32 %v1330_v20, %v1330_v20 }
 0x6e8   : > { %v1332_v22 = vsel %vm845_vm10, %v1331_v21, 0.0 }
 0x6e9   : > { %1333 = vadd.xlane.f32.xlu0 %v1332_v22 }
 0x772   : > { %v1334_v0 = vpop.xlane.xlu0 %1333 }
 0x773   : > { %v1335_v25 = vmul.f32 0.03125, %v1334_v0 }
 0x775   : > { %v1336_v26 = vadd.f32 1e-05, %v1335_v25 }
 0x777   : > { %2002 = vrsqrt.f32 %v1336_v26 }
 0x784   : > { %v2003_v27 = vpop.eup %2002 }
 0x785   : > { %v1338_v29 = vmul.f32 %v2003_v27, %v1330_v20 }
 0x787   : > { %v1343_v31 = vmul.f32 %v1707_v28, %v1338_v29 }
 0x789   : > { %v1348_v32 = vadd.f32 %v1708_v30, %v1343_v31 }
 0x78b   : > { %v1349_v33 = vpack.c.bf16 %v1348_v32, %v1348_v32 }
 0x78d   : > { %1832 = vmatmul.mubr.msk.bf16.vlgmr.msra.gmra.mxu1 %vm845_vm10, %v1349_v33 }
 0x84d   : > { %v1410_v39 = vpop.f32.mrf.mxu1 }
 0x84e   : > { %v1411_v40 = vadd.f32 %v1709_v38, %v1410_v39 }
 0x84f   : > { %v1833_v41 = vpop.f32.mrf.mxu1 }
 0x850   : > { %v1417_v42 = vmul.f32 0.044715, %v1411_v40  ;;  %v1416_v50 = vmul.f32 0.5, %v1411_v40 }
 0x851   : > { %v1413_v43 = vpop.f32.mrf.mxu1 }
 0x852   : > { %v1418_v44 = vmul.f32 %v1417_v42, %v1411_v40 }
 0x853   : > { %v1834_v45 = vpop.f32.mrf.mxu1 }
 0x854   : > { %v1419_v46 = vmul.f32 %v1418_v44, %v1411_v40 }
 0x856   : > { %v1420_v47 = vadd.f32 %v1419_v46, %v1411_v40 }
 0x858   : > { %v1421_v48 = vmul.f32 0.7978846, %v1420_v47 }
 0x85a   : > { %2004 = vtanh.f32 %v1421_v48 }
 0x867   : > { %v2005_v49 = vpop.eup %2004 }
 0x868   : > { %v1423_v51 = vadd.f32 1.0, %v2005_v49 }
 0x86a   : > { %v1424_v52 = vmul.f32 %v1423_v51, %v1416_v50 }
 0x86c   : > { %v1425_v53 = vpack.c.bf16 %v1424_v52, %v1424_v52 }
 0x86e   : > { %1844 = vmatmul.mubr.msk.bf16.vlgmr.msra.gmra.mxu0 %vm1463_vm15, %v1425_v53 }
 0x92e   : > { %v1501_v54 = vpop.f32.mrf.mxu0 }
 0x92f   : > { %v1502_v55 = vadd.f32 %v1713_v9, %v1501_v54 }
 0x930   : > { %v1845_v56 = vpop.f32.mrf.mxu0 }
 0x931   : > { %v1507_v57 = vadd.f32 %v1502_v55, %v1348_v32 }
 0x932   : > { %v1504_v58 = vpop.f32.mrf.mxu0 }
 0x933   : > { %v1510_v59 = vsel %vm845_vm10, %v1507_v57, 0.0 }
 0x934   : > { %1511 = vadd.xlane.f32.xlu0 %v1510_v59  ;;  %v1846_v60 = vpop.f32.mrf.mxu0 }
 0x9bd   : > { %v1512_v61 = vpop.xlane.xlu0 %1511 }
 0x9be   : > { %v1513_v62 = vmul.f32 0.03125, %v1512_v61 }
 0x9c0   : > { %v1514_v63 = vsub.f32 %v1507_v57, %v1513_v62 }
 0x9c2   : > { %v1515_v1 = vmul.f32 %v1514_v63, %v1514_v63 }
 0x9c4   : > { %v1516_v2 = vsel %vm845_vm10, %v1515_v1, 0.0 }
 0x9c5   : > { %1517 = vadd.xlane.f32.xlu1 %v1516_v2 }
 0xa4e   : > { %v1518_v3 = vpop.xlane.xlu1 %1517 }
 0xa4f   : > { %v1519_v4 = vmul.f32 0.03125, %v1518_v3 }
 0xa51   : > { %v1520_v5 = vadd.f32 1e-05, %v1519_v4 }
 0xa53   : > { %2006 = vrsqrt.f32 %v1520_v5 }
 0xa60   : > { %v2007_v6 = vpop.eup %2006 }
 0xa61   : > { %v1522_v8 = vmul.f32 %v2007_v6, %v1514_v63 }
 0xa63   : > { %v1527_v11 = vmul.f32 %v1719_v7, %v1522_v8 }
 0xa65   : > { %v1532_v12 = vadd.f32 %v1720_v10, %v1527_v11 }
 0xa67   : > { %v1533_v13 = vpack.c.bf16 %v1532_v12, %v1532_v12 }
 0xa69   : > { %1535 = vst.msk [vmem:[%s2486_s0] sm:$0xf] %vm1534_vm0, %v1533_v13 }
 0xa6a PF: > { %s1722_s28 = sshll.u32 %s2216_s20, 6  ;;  %s1552_s16 = sshll.u32 %s2486_s0, 4  ;;  %s1553_s16 = int_to_ptr.vmem [resolvable:$true] %s1552_s16 }
 0xa6b   : > { %s1550_s23 = scalar_lea.hbm %s2679_s10, %s1722_s28  ;;  %s1537_s12 = scalar_lea.sflag [#allocation8], %s2464_s14 }
 0xa6c   : > { %s2122_s15 = scalar_lea.vmem %s1553_s16, 64  ;;  %p2702_p10 = scmp.ne.s32.totalorder %s2700_s4, 0 }
 0xa6d   : > { %p2123_p9 = scmp.ne.s32.totalorder %s1553_s16, %s2122_s15  ;;  %s2255_s6 = smov [#allocation14]  }
 0xa6e   : > { %s2126_s25 = sshll.u32 %s2255_s6, 4  ;;  %s2127_s25 = int_to_ptr.vmem [resolvable:$false] %s2126_s25 }
 0xa6f   : > { %p2124_p13 = pnand %p2123_p9, %p2702_p10  ;;  %s2128_s27 = scalar_lea.vmem %s2127_s25, 128 }
 0xa70   : > { %p2129_p0 = scmp.lt.s32.totalorder %s1553_s16, %s2127_s25  ;;  %p2130_p5 = scmp.lt.s32.totalorder %s2128_s27, %s2122_s15 }
 0xa71   : > { %p2125_p2 = pneg %p2124_p13 }
 0xa72   : > { %p2131_p11 = por %p2130_p5, %p2129_p0 }
 0xa74   : > { %p2132_p7 = pnand %p2131_p11, %p2125_p2 }
 0xa76   : > { %2135 = shalt.err (!%p2132_p7)
}
 0xa77   : > { %s2136_s20 = scalar_lea.hbm %s1550_s23, 64  ;;  %s2140_s19 = scalar_lea.hbm %s2679_s10, 128 }
 0xa78   : > { %p2137_p6 = scmp.ne.s32.totalorder %s1550_s23, %s2136_s20  ;;  %p2141_p8 = scmp.lt.s32.totalorder %s1550_s23, %s2679_s10 }
 0xa79   : > { %p2142_p1 = scmp.lt.s32.totalorder %s2140_s19, %s2136_s20 }
 0xa7a   : > { %p2138_p12 = pnand %p2137_p6, %p2702_p10 }
 0xa7b   : > { %p2143_p4 = por %p2142_p1, %p2141_p8 }
 0xa7c   : > { %p2139_p3 = pneg %p2138_p12 }
 0xa7e   : > { %p2144_p9 = pnand %p2143_p4, %p2139_p3 }
 0xa80   : > { %2147 = shalt.err (!%p2144_p9)
}
 0xa81   : > { %1861 = dma.vmem_to_hbm [thread:$0]  (%p2702_p10), %s1553_s16, 64, %s1550_s23, %s1537_s12  }
 0xa82 PF: > { %s2703_s26 = sld [smem:[#allocation20_spill]]  ;;  %p1888_p13 = scmp.ge.s32.totalorder %s2228_s22, 2 }
 0xa83   : > { %s2704_s28 = sld [smem:[#allocation22_spill]] }
 0xa88   : > { %s1564_s11 = sand.u32 1, %s2703_s26  }
 0xa89   : > { %p2705_p2 = scmp.ne.s32.totalorder %s2704_s28, 0  ;;  %s1565_s30 = scalar_lea.sflag [#allocation8], %s1564_s11 }
 0xa8b   : > { %p1878_p0 = pnand %p1888_p13, %p2705_p2 }
 0xa8d   : > { %p1879_p5 = pneg %p1878_p0 }
 0xa8f   : > { %2195 = dma.done.wait (%p1879_p5), %s1565_s30, 64  }
 0xa90   : > { %2197 = vsyncadd (%p1879_p5), %s1565_s30, 4294967232  ;;  %s32_s22 = sadd.s32 1, %s2228_s22   ;;  %s2706_s19 = sld [smem:[#allocation21_spill]] }
 0xa91   : > { %p29_p11 = scmp.ge.s32.totalorder %s32_s22, 6   ;;  %s2707_s0 = sld [smem:[#allocation23_spill]] }
 0xa92   : > { %s2708_s16 = smov %s2204_s17  ;;  %s2709_s17 = smov %s2208_s18 }
 0xa93   : > { %s2710_s18 = smov %s2449_s7  ;;  %s2711_s20 = smov %s2224_s21 }
 0xa94   : > { %s2712_s21 = smov %s2718_s24  ;;  %31 = sbr.rel (!%p29_p11) target bundleno = 17 (0x11), region = 131 }
 0xa99   :  { %1570 = vsyncpa [#allocation7], 1 }
 0xa9a   :  { %1572 = vsyncpa [#allocation7 + $0x1], 1 }
 0xa9b   :  { %1573 = vsyncpa [#allocation10], 1 }
 0xa9c   :  { %1574 = vsyncpa [#allocation13], 1 }
 0xa9d   :  { %1575 = vsyncpa [#allocation8], 1 }
 0xa9e   :  { %1577 = vsyncpa [#allocation8 + $0x1], 1 }

// kernel: tpu_custom_call.1
= control target key start
LH: loop header
LB: loop body
LE: loop exit
PB: predicated region body
PF: predicated region fallthrough
CT: control target
= control target key end

     0   :  { %s2230_s13 = smov [#allocation5]   ;;  %s2669_s0 = inlined_call_operand.hbm [shape: s32[2], index: 0, kind: input, shape index: {}]   ;;  %s2670_s1 = inlined_call_operand.hbm [shape: bf16[2,8,32], index: 1, kind: input, shape index: {}]   ;;  %s2671_s2 = inlined_call_operand.vmem [shape: bf16[32,32], index: 2, kind: input, shape index: {}]   ;;  %s2672_s3 = inlined_call_operand.vmem [shape: bf16[32,64], index: 3, kind: input, shape index: {}]   ;;  %s2673_s4 = inlined_call_operand.hbm [shape: f32[1,64], index: 4, kind: input, shape index: {}]   ;;  %s2674_s5 = inlined_call_operand.vmem [shape: bf16[32,32], index: 5, kind: input, shape index: {}]   ;;  %s2675_s6 = inlined_call_operand.hbm [shape: bf16[32,64], index: 6, kind: input, shape index: {}]   ;;  %s2676_s7 = inlined_call_operand.hbm [shape: f32[1,64], index: 7, kind: input, shape index: {}]   ;;  %s2677_s8 = inlined_call_operand.vmem [shape: bf16[64,32], index: 8, kind: input, shape index: {}]   ;;  %s2678_s9 = inlined_call_operand.vmem [shape: f32[9,32], index: 9, kind: input, shape index: {}]   ;;  %s2679_s10 = inlined_call_operand.hbm [shape: bf16[2,8,32], index: 10, kind: output, shape index: {}]  }
   0x1   :  { %2684 = sst [smem:[#allocation24_spill]] %s2673_s4 }
   0x2   :  { %2685 = sst [smem:[#allocation25_spill]] %s2675_s6 }
   0x3   :  { %2686 = sst [smem:[#allocation26_spill]] %s2676_s7 }
   0x4   :  { %16 = dma.hbm_to_smem %s2669_s0, 16, %s2230_s13, [#allocation4] }
   0x5   :  { %2180 = dma.done.wait [#allocation4], 16 }
   0x6   :  { %2181 = vsyncadd [#allocation4], 4294967280 }
   0x7   :  { %18 = sfence }
   0x8   :  { %19 = vsyncpa [#allocation7], 0 }
   0x9   :  { %21 = vsyncpa [#allocation7 + $0x1], 0 }
   0xa   :  { %22 = vsyncpa [#allocation10], 0 }
   0xb   :  { %23 = vsyncpa [#allocation13], 0 }
   0xc   :  { %24 = vsyncpa [#allocation8], 0 }
   0xd   :  { %26 = vsyncpa [#allocation8 + $0x1], 0  ;;  %s2314_s16 = smov 0   ;;  %s2316_s17 = smov 0  }
   0xe   :  { %s2318_s18 = smov 0   ;;  %s2320_s19 = smov 0  }
   0xf   :  { %s2322_s20 = smov 0   ;;  %s2324_s0 = smov 0  }
  0x10   :  { %s2326_s21 = smov 0   ;;  %s2328_s22 = smov 0  }
  0x11 LB: > { %2687 = sst [smem:[#allocation20_spill]] %s2200_s16  ;;  %s1667_s23 = sadd.s32 4294967295, %s2228_s22   ;;  %s2228_s22 = sphi %s2328_s22, %s32_s22   ;;  %s2224_s21 = sphi %s2326_s21, %s2712_s21   ;;  %s2220_s0 = sphi %s2324_s0, %s2707_s0   ;;  %s2216_s20 = sphi %s2322_s20, %s2711_s20   ;;  %s2212_s19 = sphi %s2320_s19, %s2706_s19   ;;  %s2208_s18 = sphi %s2318_s18, %s2710_s18   ;;  %s2204_s17 = sphi %s2316_s17, %s2709_s17   ;;  %s2200_s16 = sphi %s2314_s16, %s2708_s16  }
  0x12   : > { %2688 = sst [smem:[#allocation21_spill]] %s2220_s0  ;;  %s1668_s24 = sadd.s32 4294967294, %s2228_s22  }
  0x13   : > { %p73_p0 = scmp.ne.s32.totalorder %s2204_s17, %s2200_s16  ;;  %p2358_p1 = scmp.eq.s32.totalorder %s1667_s23, 0 }
  0x14   : > { %p2362_p2 = scmp.eq.s32.totalorder %s1667_s23, 3  ;;  %p275_p3 = scmp.eq.s32.totalorder %s1668_s24, 3 }
  0x15   : > { %p2368_p4 = por %p2358_p1, %p73_p0  ;;  %p1669_p5 = scmp.ge.s32.totalorder %s2228_s22, 1 }
  0x16   : > { %p2373_p6 = por %p275_p3, %p73_p0  ;;  %p282_p7 = scmp.lt.s32.totalorder %s2228_s22, 5 }
  0x17   : > { %s2231_s30 = smov [#allocation9]   ;;  %s2232_s12 = smov [#allocation11]  }
  0x18   : > { %s2692_s28 = scalar_select %p2373_p6, 1, 0 }
  0x19   : > { %p2378_p8 = pnand %p1669_p5, %p282_p7  ;;  %s301_s11 = sshll.u32 %s2231_s30, 4  ;;  %s302_s11 = int_to_ptr.vmem [resolvable:$true] %s301_s11 }
  0x1a   : > { %2693 = sst [smem:[#allocation22_spill]] %s2692_s28  ;;  %s314_s13 = sshll.u32 %s2232_s12, 4  ;;  %s2390_s13 = int_to_ptr.vmem [resolvable:$true] %s314_s13 }
  0x1b   : > { %p1863_p9 = pneg %p2378_p8  ;;  %s2233_s15 = smov [#allocation12]  }
  0x1c   : > { %s328_s23 = sshll.u32 %s2233_s15, 4  ;;  %s2027_s24 = scalar_lea.vmem %s302_s11, 16  ;;  %s329_s23 = int_to_ptr.vmem [resolvable:$true] %s328_s23 }
  0x1d   : > { %p2386_p10 = pnand %p1863_p9, %p2358_p1  ;;  %p2028_p12 = scmp.ne.s32.totalorder %s302_s11, %s2027_s24 }
  0x1e   : > { %s2034_s30 = scalar_lea.vmem %s302_s11, 32  ;;  %p2035_p3 = scmp.lt.s32.totalorder %s302_s11, %s302_s11 }
  0x1f   : > { %p2018_p11 = pneg %p2386_p10  ;;  %p2036_p5 = scmp.lt.s32.totalorder %s2034_s30, %s2027_s24 }
  0x21   : > { %p2030_p13 = pnand %p2028_p12, %p2018_p11  ;;  %p2037_p7 = por %p2036_p5, %p2035_p3 }
  0x23   : > { %p2031_p0 = pneg %p2030_p13 }
  0x25   : > { %p2038_p9 = pnand %p2037_p7, %p2031_p0 }
  0x27   : > { %2041 = shalt.err (!%p2038_p9)
}
  0x28   : > { %s2696_s4 = sld [smem:[#allocation24_spill]]  ;;  %s2053_s15 = scalar_lea.vmem %s2390_s13, 256 }
  0x29   : > { %p2054_p6 = scmp.ne.s32.totalorder %s2390_s13, %s2053_s15  ;;  %p2061_p3 = scmp.lt.s32.totalorder %s2390_s13, %s2390_s13 }
  0x2a   : > { %p2062_p0 = scmp.lt.s32.totalorder %s2053_s15, %s2053_s15 }
  0x2b   : > { %p2056_p12 = pnand %p2054_p6, %p2018_p11 }
  0x2c   : > { %p2063_p5 = por %p2062_p0, %p2061_p3 }
  0x2d   : > { %p2057_p13 = pneg %p2056_p12 }
  0x2e   : > { %1866 = dma.hbm_to_vmem [thread:$0]  (!%p2386_p10), %s2696_s4, 16, %s302_s11, [#allocation10]  }
  0x2f   : > { %p2064_p7 = pnand %p2063_p5, %p2057_p13 }
  0x31   : > { %2067 = shalt.err (!%p2064_p7)
}
  0x32   : > { %s2234_s24 = smov 64   ;;  %s2235_s28 = smov 4  }
  0x33   : > { %s2697_s6 = sld [smem:[#allocation25_spill]]  ;;  %s2079_s12 = scalar_lea.vmem %s329_s23, 16 }
  0x34   : > { %p2080_p6 = scmp.ne.s32.totalorder %s329_s23, %s2079_s12  ;;  %s2086_s15 = scalar_lea.vmem %s329_s23, 32 }
  0x35   : > { %p2087_p13 = scmp.lt.s32.totalorder %s329_s23, %s329_s23  ;;  %p2088_p3 = scmp.lt.s32.totalorder %s2086_s15, %s2079_s12 }
  0x36   : > { %p2082_p9 = pnand %p2080_p6, %p2018_p11 }
  0x37   : > { %p2089_p0 = por %p2088_p3, %p2087_p13 }
  0x38   : > { %p2083_p12 = pneg %p2082_p9 }
  0x39   : > { %1869 = dma.hbm_to_vmem [thread:$0]  (!%p2386_p10), %s2697_s6, 256, %s2390_s13, [#allocation10], %s2234_s24, %s2234_s24, %s2235_s28  }
  0x3a   : > { %p2090_p5 = pnand %p2089_p0, %p2083_p12 }
  0x3c   : > { %2093 = shalt.err (!%p2090_p5)
}
  0x3d   : > { %s2698_s7 = sld [smem:[#allocation26_spill]]  ;;  %s47_s13 = sadd.s32 1, %s2220_s0 }
  0x3e   : > { %p49_p11 = scmp.ge.s32.totalorder %s47_s13, 2  ;;  %s51_s24 = sadd.s32 1, %s2224_s21 }
  0x3f   : > { %s60_s14 = sadd.s32 1, %s2208_s18  ;;  %p67_p7 = scmp.ne.s32.totalorder %s2208_s18, %s2204_s17 }
  0x40   : > { %s2714_s13 = smov (%p49_p11, %s47_s13), 0  ;;  %s2716_s24 = smov (!%p49_p11, %s51_s24), %s2224_s21 }
  0x41   : > { %2699 = sst [smem:[#allocation23_spill]] %s2714_s13  ;;  %p68_p6 = scmp.eq.s32.totalorder %s2228_s22, 0 }
  0x42   : > { %p2434_p9 = por %p2362_p2, %p67_p7  ;;  %p53_p12 = scmp.ge.s32.totalorder %s2716_s24, 2 }
  0x43   : > { %1872 = dma.hbm_to_vmem [thread:$0]  (!%p2386_p10), %s2698_s7, 16, %s329_s23, [#allocation13]  }
  0x44   : > { %s2700_s4 = scalar_select %p2434_p9, 1, 0 }
  0x45   : > { %p1884_p10 = scmp.lt.s32.totalorder %s2228_s22, 4  ;;  %p69_p13 = por %p68_p6, %p67_p7 }
  0x46   : > { %s345_s16 = sand.u32 1, %s2208_s18   ;;  %s2718_s24 = smov (%p53_p12, %s2716_s24), 0 }
  0x47   : > { %s1674_s23 = sshll.u32 %s345_s16, 2  ;;  %s55_s28 = ssub.s32 %s2224_s21, %s2718_s24 }
  0x48   : > { %p58_p3 = scmp.eq.s32.totalorder %s55_s28, 0  ;;  %s1675_s30 = sshll.u32 %s2224_s21, 6 }
  0x49   : > { %s355_s26 = scalar_lea.hbm %s2670_s1, %s1675_s30  ;;  %s349_s15 = scalar_lea.vmem [#allocation6], %s1674_s23 }
  0x4a   : > { %s357_s6 = sshll.u32 %s349_s15, 4  ;;  %p2453_p2 = pnand %p1884_p10, %p69_p13  ;;  %s358_s6 = int_to_ptr.vmem [resolvable:$true] %s357_s6 }
  0x4b   : > { %s2449_s7 = scalar_select %p58_p3, %s2208_s18, %s60_s14  }
  0x4c   : > { %s346_s0 = scalar_lea.sflag [#allocation7], %s345_s16  ;;  %p2096_p0 = pneg %p2453_p2 }
  0x4d   : > { %s2107_s28 = scalar_lea.vmem %s358_s6, 64  ;;  %s2236_s11 = smov [#allocation6]  }
  0x4e   : > { %p2108_p5 = scmp.ne.s32.totalorder %s358_s6, %s2107_s28  ;;  %s2112_s30 = sshll.u32 %s2236_s11, 4  ;;  %s2113_s30 = int_to_ptr.vmem [resolvable:$false] %s2112_s30 }
  0x4f   : > { %s2114_s23 = scalar_lea.vmem %s2113_s30, 128  ;;  %p2115_p6 = scmp.lt.s32.totalorder %s358_s6, %s2113_s30 }
  0x50   : > { %p2110_p11 = pnand %p2108_p5, %p2096_p0  ;;  %p2116_p12 = scmp.lt.s32.totalorder %s2114_s23, %s2107_s28 }
  0x52   : > { %p2111_p7 = pneg %p2110_p11  ;;  %p2117_p3 = por %p2116_p12, %p2115_p6 }
  0x54   : > { %p2118_p9 = pnand %p2117_p3, %p2111_p7 }
  0x56   : > { %2121 = shalt.err (!%p2118_p9)
}
  0x57   : > { %1876 = dma.hbm_to_vmem [thread:$0]  (!%p2453_p2), %s355_s26, 64, %s358_s6, %s346_s0  }
  0x58   : > { %366 = sbr.rel (%p2378_p8) target bundleno = 2690 (0xa82), region = 56  ;;  %s2464_s14 = sand.u32 (!%p2378_p8), 1, %s2204_s17  }
  0x59   : > { %s1677_s16 = sshll.u32 (!%p2378_p8), %s2464_s14, 2  ;;  %s369_s12 = scalar_lea.sflag (!%p2378_p8), [#allocation7], %s2464_s14 }
  0x5a   : > { %s372_s15 = scalar_lea.vmem (!%p2378_p8), [#allocation6], %s1677_s16 }
  0x5d   : > { %2183 = dma.done.wait (%p2368_p4), %s369_s12, 64  }
  0x5e   : > { %2185 = vsyncadd (%p2368_p4), %s369_s12, 4294967232 }
  0x5f   : > { %2187 = dma.done.wait (%p2358_p1), [#allocation10], 272  }
  0x60   : > { %2189 = vsyncadd (%p2358_p1), [#allocation10], 4294967024 }
  0x61   : > { %2191 = dma.done.wait (%p2358_p1), [#allocation13], 16  }
  0x62   : > { %2193 = vsyncadd (%p2358_p1), [#allocation13], 4294967280  ;;  %p423_p8 = scmp.eq.s32.totalorder %s2212_s19, 0  ;;  %s2482_s6 = sld [smem:[#allocation5 + %s2216_s20]]  ;;  %v2484_v0 = vld [vmem:[%s372_s15] sm:$0xf] }
  0x63   : > { %s2486_s0 = scalar_lea.vmem [#allocation14], %s1677_s16  ;;  %vm429_vm0 = vcmask (%p423_p8), 64512   ;;  %vm434_vm1 = vcmask (%p423_p8), 253952   ;;  %v2237_v1 = vmov (%p423_p8), 0.0  }
  0x64   : > { %428 = sbr.rel (!%p423_p8) target bundleno = 105 (0x69), region = 76  ;;  %430 = vst.msk [vmem:[#allocation2] sm:$0xff] (%p423_p8), %vm429_vm0, %v2237_v1  ;;  %431 = vst.msk [vmem:[#allocation2 + $0x8] sm:$0xff] (%p423_p8), %vm429_vm0, %v2237_v1 }
  0x65   : > { %432 = vst.msk [vmem:[#allocation2 + $0x10] sm:$0xff] (%p423_p8), %vm429_vm0, %v2237_v1  ;;  %433 = vst.msk [vmem:[#allocation2 + $0x18] sm:$0xff] (%p423_p8), %vm429_vm0, %v2237_v1 }
  0x66   : > { %435 = vst.msk [vmem:[#allocation3] sm:$0x1] (%p423_p8), %vm434_vm1, %v2237_v1 }
  0x69 PF: > { %p1683_p1 = scmp.ne.s32.totalorder %s2212_s19, 0 }
  0x6a   : > { %s2240_s26 = smov (!%p1683_p1), 104   ;;  %s2241_s28 = smov (!%p1683_p1), 120  }
  0x6b   : > { %438 = sbr.rel (%p1683_p1) target bundleno = 760 (0x2f8), region = 80  ;;  %s2242_s11 = smov (!%p1683_p1), 96  }
  0x6c   : > { %s2243_s30 = smov (!%p1683_p1), 112   ;;  %s2244_s23 = smov (!%p1683_p1), 80  }
  0x6d   : > { %s2245_s16 = smov (!%p1683_p1), 88   ;;  %s2246_s12 = smov (!%p1683_p1), 72  }
  0x70   : > { %v1978_v2 = vld [vmem:[%s2672_s3 + $0x8] sm:$0xff]   ;;  %v2238_v3 = vmov 0.0   ;;  %v1979_v4 = vld [vmem:[%s2672_s3] sm:$0xff]   ;;  %vm2239_vm2 = vmmov 0   ;;  %vm462_vm3 = vcmask 261120   ;;  %v513_v13 = vlaneseq  ;;  %v678_v57 = vld [vmem:[#allocation2 + $0x10] sm:$0xff] }
  0x71   : > { %1759 = vmatprep.subr.bf16.mxu0 %v2238_v3  ;;  %1767 = vmatprep.subr.bf16.mxu1 %v2238_v3  ;;  %v1684_v5 = vld [vmem:[#allocation9] ss:$0 sm:$0xff]  ;;  %v517_v15 = vstv %s2482_s6  ;;  %v522_v29 = vld [vmem:[#allocation3] sm:$0x1]  ;;  %vm531_vm6 = vcmask 253952   ;;  %vm559_vm7 = vcmask 1043456  }
  0x72   : > { %1760 = vmatpush3.bf16.msra.mxu0 %v1978_v2  ;;  %1763 = vmatprep.mubr.msk.bf16.mxu0 %vm2239_vm2, %v2238_v3  ;;  %v514_v14 = vshrl.u32 %v513_v13, 7  ;;  %vm555_vm8 = vcmask 64512   ;;  %v535_v47 = vld [vmem:[#allocation2] sm:$0xff]  ;;  %v606_v53 = vld [vmem:[#allocation2 + $0x8] sm:$0xff]  ;;  %v749_v63 = vld [vmem:[#allocation2 + $0x18] sm:$0xff] }
  0x73   : > { %1761 = vmatprep.subr.bf16.mxu0 %v2238_v3  ;;  %1769 = vmatprep.mubr.msk.bf16.mxu1 %vm2239_vm2, %v2238_v3 }
  0x74   : > { %vm518_vm4 = vcmp.lt.s32.totalorder %v514_v14, %v517_v15 }
  0x75   : > { %v1688_v17 = vsel %vm518_vm4, 1.0, %v2238_v3 }
  0x76   : > { %1762 = vmatpush3.bf16.msra.mxu0 %v1979_v4 }
  0x77   : > { %1779 = vmatprep.subr.bf16.mxu0 %v2238_v3 }
  0x79   : > { %1764 = vmatmul.mubr.msk.bf16.vlgmr.msra.gmra.mxu0 %vm462_vm3, %v2484_v0 }
  0x7a   : > { %1781 = vmatprep.mubr.msk.bf16.mxu0 %vm2239_vm2, %v2238_v3 }
 0x139   : > { %v500_v6 = vpop.f32.mrf.mxu0 }
 0x13a   : > { %v501_v7 = vadd.f32 %v1684_v5, %v500_v6 }
 0x13b   : > { %v1765_v8 = vpop.f32.mrf.mxu0 }
 0x13c   : > { %v508_v9 = vmin.f32 %v501_v7, 0.0  ;;  %v507_v16 = vadd.f32 1.0, %v501_v7  ;;  %vm506_vm5 = vcmp.gt.f32.partialorder %v501_v7, 0.0  ;;  %v534_v25 = vpack.c.bf16 %v501_v7, %v501_v7 }
 0x13d   : > { %v503_v10 = vpop.f32.mrf.mxu0 }
 0x13e   : > { %v509_v11 = vmul.f32 1.442695, %v508_v9 }
 0x13f   : > { %v1766_v12 = vpop.f32.mrf.mxu0 }
 0x140   : > { %1980 = vpow2.f32 %v509_v11 }
 0x14d   : > { %v1981_v18 = vpop.eup %1980 }
 0x14e   : > { %v511_v19 = vsel %vm506_vm5, %v507_v16, %v1981_v18 }
 0x14f   : > { %v521_v20 = vmul.f32 %v1688_v17, %v511_v19 }
 0x151   : > { %v533_v21 = vpack.c.bf16 %v521_v20, %v521_v20  ;;  %v523_v22 = vsel %vm462_vm3, %v521_v20, 0.0 }
 0x152   : > { %v524_v23 = vrot.slane %v523_v22, 4 }
 0x153   : > { %750 = vrot.lane.b32.xlu1 %v533_v21, %s2240_s26  ;;  %608 = vrot.lane.b32.xlu0 %v533_v21, %s2241_s28 }
 0x154   : > { %v525_v24 = vadd.f32 %v524_v23, %v523_v22 }
 0x156   : > { %v526_v26 = vrot.slane %v525_v24, 2 }
 0x157   : > { %553 = vrot.lane.b32.xlu1 %v534_v25, %s2242_s11  ;;  %679 = vrot.lane.b32.xlu0 %v533_v21, %s2243_s30 }
 0x158   : > { %v527_v27 = vadd.f32 %v526_v26, %v525_v24 }
 0x15a   : > { %v528_v28 = vrot.slane %v527_v27, 1 }
 0x15b   : > { %698 = vrot.lane.b32.xlu1 %v534_v25, %s2244_s23  ;;  %627 = vrot.lane.b32.xlu0 %v534_v25, %s2245_s16 }
 0x15c   : > { %v529_v30 = vadd.f32 %v528_v28, %v527_v27 }
 0x15e   : > { %v530_v31 = vadd.f32 %v529_v30, %v522_v29 }
 0x15f   : > { %769 = vrot.lane.b32.xlu0 %v534_v25, %s2246_s12 }
 0x160   : > { %532 = vst.msk [vmem:[#allocation3] sm:$0x1] %vm531_vm6, %v530_v31 }
 0x17e   : > { %536 = vxpose.xlu1.c.b16.start.end [1/1] (short) (narrow) %v533_v21, 16 }
 0x1c5   : > { %v751_v32 = vpop.permute.xlu1 %750  ;;  %v609_v33 = vpop.permute.xlu0 %608 }
 0x1c6   : > { %753 = vxpose.xlu1.c.b16.start.end [1/1] (short) (narrow) %v751_v32, 16  ;;  %611 = vxpose.xlu0.c.b16.start.end [1/1] (short) (narrow) %v609_v33, 16 }
 0x1c9   : > { %v554_v34 = vpop.permute.xlu1 %553  ;;  %v680_v35 = vpop.permute.xlu0 %679 }
 0x1ca   : > { %682 = vxpose.xlu0.c.b16.start.end [1/1] (short) (narrow) %v680_v35, 16  ;;  %v561_v36 = vsel %vm559_vm7, %v554_v34, 0 }
 0x1cb   : > { %1768 = vmatpush3.bf16.msra.mxu1 %v561_v36 }
 0x1cc   : > { %1773 = vmatprep.subr.bf16.mxu1 %v2238_v3 }
 0x1cd   : > { %v699_v37 = vpop.permute.xlu1 %698  ;;  %v628_v39 = vpop.permute.xlu0 %627 }
 0x1ce   : > { %v704_v38 = vsel %vm559_vm7, %v699_v37, 0  ;;  %v633_v41 = vsel %vm559_vm7, %v628_v39, 0 }
 0x1cf   : > { %1780 = vmatpush3.bf16.msra.mxu0 %v704_v38 }
 0x1d1   : > { %v770_v42 = vpop.permute.xlu0 %769 }
 0x1d2   : > { %v775_v44 = vsel %vm559_vm7, %v770_v42, 0 }
 0x1e0   : > { %v544_v40 = vpop.trf.xlu1 }
 0x1e1   : > { %1770 = vmatmul.mubr.msk.bf16.vlgmr.msra.gmra.mxu1 %vm555_vm8, %v544_v40 }
 0x1e2   : > { %1774 = vmatpush3.bf16.msra.mxu1 %v633_v41  ;;  %1775 = vmatprep.mubr.msk.bf16.mxu1 %vm2239_vm2, %v2238_v3 }
 0x1e3   : > { %1785 = vmatprep.subr.bf16.mxu1 %v2238_v3 }
 0x228   : > { %v619_v43 = vpop.trf.xlu0  ;;  %v761_v46 = vpop.trf.xlu1 }
 0x229   : > { %1776 = vmatmul.mubr.msk.bf16.vlgmr.msra.gmra.mxu1 %vm555_vm8, %v619_v43 }
 0x22a   : > { %1786 = vmatpush3.bf16.msra.mxu1 %v775_v44  ;;  %1787 = vmatprep.mubr.msk.bf16.mxu1 %vm2239_vm2, %v2238_v3 }
 0x22c   : > { %v690_v45 = vpop.trf.xlu0 }
 0x22d   : > { %1782 = vmatmul.mubr.msk.bf16.vlgmr.msra.gmra.mxu0 %vm555_vm8, %v690_v45 }
 0x231   : > { %1788 = vmatmul.mubr.msk.bf16.vlgmr.msra.gmra.mxu1 %vm555_vm8, %v761_v46 }
 0x2a1   : > { %v597_v48 = vpop.f32.mrf.mxu1 }
 0x2a2   : > { %v603_v49 = vadd.f32 %v597_v48, %v535_v47 }
 0x2a3   : > { %v1771_v50 = vpop.f32.mrf.mxu1 }
 0x2a4   : > { %604 = vst.msk [vmem:[#allocation2] sm:$0xff] %vm555_vm8, %v603_v49 }
 0x2a5   : > { %v600_v51 = vpop.f32.mrf.mxu1 }
 0x2a7   : > { %v1772_v52 = vpop.f32.mrf.mxu1 }
 0x2e9   : > { %v669_v54 = vpop.f32.mrf.mxu1 }
 0x2ea   : > { %v675_v55 = vadd.f32 %v669_v54, %v606_v53 }
 0x2eb   : > { %v1777_v56 = vpop.f32.mrf.mxu1 }
 0x2ec   : > { %676 = vst.msk [vmem:[#allocation2 + $0x8] sm:$0xff] %vm555_vm8, %v675_v55 }
 0x2ed   : > { %v672_v58 = vpop.f32.mrf.mxu1  ;;  %v740_v59 = vpop.f32.mrf.mxu0 }
 0x2ee   : > { %v746_v60 = vadd.f32 %v740_v59, %v678_v57 }
 0x2ef   : > { %v1778_v61 = vpop.f32.mrf.mxu1  ;;  %v1783_v62 = vpop.f32.mrf.mxu0 }
 0x2f0   : > { %747 = vst.msk [vmem:[#allocation2 + $0x10] sm:$0xff] %vm555_vm8, %v746_v60 }
 0x2f1   : > { %v743_v1 = vpop.f32.mrf.mxu0  ;;  %v811_v2 = vpop.f32.mrf.mxu1 }
 0x2f2   : > { %v817_v3 = vadd.f32 %v811_v2, %v749_v63 }
 0x2f3   : > { %v1784_v4 = vpop.f32.mrf.mxu0  ;;  %v1789_v5 = vpop.f32.mrf.mxu1 }
 0x2f4   : > { %818 = vst.msk [vmem:[#allocation2 + $0x18] sm:$0xff] %vm555_vm8, %v817_v3 }
 0x2f5   : > { %v814_v6 = vpop.f32.mrf.mxu1 }
 0x2f7   : > { %v1790_v7 = vpop.f32.mrf.mxu1 }
 0x2f8 PF: > { %p1693_p4 = scmp.ne.s32.totalorder %s2212_s19, 1 }
 0x2f9   : > { %s2249_s13 = smov (!%p1693_p4), 104   ;;  %s2250_s26 = smov (!%p1693_p4), 120  }
 0x2fa   : > { %822 = sbr.rel (%p1693_p4) target bundleno = 2666 (0xa6a), region = 84  ;;  %s2251_s28 = smov (!%p1693_p4), 112  }
 0x2fb   : > { %s2252_s12 = smov (!%p1693_p4), 8   ;;  %s2253_s15 = smov (!%p1693_p4), 16  }
 0x2fc   : > { %s2254_s6 = smov (!%p1693_p4), 24  }
 0x2ff   : > { %v1982_v8 = vld [vmem:[%s2671_s2 + $0x8] sm:$0xff]   ;;  %v2247_v9 = vmov 0.0   ;;  %v1983_v10 = vld [vmem:[%s2671_s2] sm:$0xff]   ;;  %vm2248_vm9 = vmmov 0   ;;  %vm845_vm10 = vcmask 261120   ;;  %vm896_vm12 = vcmask 64512  }
 0x300   : > { %1791 = vmatprep.subr.bf16.mxu0 %v2247_v9  ;;  %1799 = vmatprep.subr.mxu1 %v2247_v9  ;;  %v895_v11 = vld [vmem:[#allocation2] sm:$0xff]  ;;  %v985_v24 = vld [vmem:[#allocation2 + $0x8] sm:$0xff]  ;;  %v1071_v26 = vld [vmem:[#allocation2 + $0x10] sm:$0xff]  ;;  %vm1253_vm13 = vcmask 130048   ;;  %vm1255_vm14 = vcmask 195584   ;;  %vm1463_vm15 = vcmask 523264  }
 0x301   : > { %1792 = vmatpush3.bf16.msra.mxu0 %v1982_v8  ;;  %1795 = vmatprep.mubr.msk.bf16.mxu0 %vm2248_vm9, %v2247_v9  ;;  %v1694_v12 = vld [vmem:[%s2678_s9] ss:$0 sm:$0xff]  ;;  %v1156_v29 = vld [vmem:[#allocation2 + $0x18] sm:$0xff]  ;;  %v1984_v46 = vld [vmem:[%s2674_s5 + $0x8] sm:$0xff]   ;;  %vm1534_vm0 = vcmask 257024  }
 0x302   : > { %1793 = vmatprep.subr.bf16.mxu0 %v2247_v9  ;;  %1801 = vmatprep.mubr.msk.f32.mxu1 %vm2248_vm9, %v2247_v9  ;;  %v1699_v23 = vld [vmem:[#allocation3] ss:$0 sm:$0xff]  ;;  %v1703_v8 = vld [vmem:[%s2678_s9 + $0x1] ss:$0 sm:$0xff] }
 0x303   : > { %1800 = vmatpush3.msra.mxu1 %v895_v11  ;;  %v1985_v47 = vld [vmem:[%s2674_s5] sm:$0xff]  }
 0x304   : > { %1804 = vmatprep.subr.mxu1 %v2247_v9 }
 0x305   : > { %1794 = vmatpush3.bf16.msra.mxu0 %v1983_v10  ;;  %v823_v10 = vunpack.c.l.bf16 %v2484_v0 }
 0x306   : > { %1835 = vmatprep.subr.bf16.mxu0 %v2247_v9 }
 0x308   : > { %1796 = vmatmul.mubr.msk.bf16.vlgmr.msra.gmra.mxu0 %vm845_vm10, %v2484_v0 }
 0x309   : > { %1843 = vmatprep.mubr.msk.bf16.mxu0 %vm2248_vm9, %v2247_v9 }
 0x3c8   : > { %v883_v13 = vpop.f32.mrf.mxu0 }
 0x3c9   : > { %v884_v14 = vadd.f32 %v1694_v12, %v883_v13 }
 0x3ca   : > { %v1797_v15 = vpop.f32.mrf.mxu0 }
 0x3cb   : > { %v891_v16 = vmin.f32 %v884_v14, 0.0  ;;  %v890_v20 = vadd.f32 1.0, %v884_v14  ;;  %vm889_vm11 = vcmp.gt.f32.partialorder %v884_v14, 0.0 }
 0x3cc   : > { %v886_v17 = vpop.f32.mrf.mxu0 }
 0x3cd   : > { %v892_v18 = vmul.f32 1.442695, %v891_v16 }
 0x3ce   : > { %v1798_v19 = vpop.f32.mrf.mxu0 }
 0x3cf   : > { %1992 = vpow2.f32 %v892_v18 }
 0x3dc   : > { %v1993_v21 = vpop.eup %1992 }
 0x3dd   : > { %v894_v22 = vsel %vm889_vm11, %v890_v20, %v1993_v21 }
 0x3de   : > { %1157 = vrot.lane.b32.xlu1 %v894_v22, %s2249_s13  ;;  %986 = vrot.lane.b32.xlu0 %v894_v22, %s2250_s26  ;;  %v977_v25 = vmul.f32 %v1699_v23, %v894_v22  ;;  %v1986_v23 = vld [vmem:[#allocation11 + $0x8] sm:$0xff]  }
 0x3df   : > { %1802 = vmatmul.mubr.msk.f32.vlgmr.msra.gmra.mxu1 %vm896_vm12, %v894_v22 }
 0x3e0   : > { %1805 = vmatpush3.msra.mxu1 %v985_v24  ;;  %1806 = vmatprep.mubr.msk.f32.mxu1 %vm2248_vm9, %v2247_v9  ;;  %v978_v37 = vsel %vm896_vm12, %v977_v25, 0.0  ;;  %v1987_v24 = vld [vmem:[#allocation11] sm:$0xff]  }
 0x3e1   : > { %1809 = vmatprep.subr.mxu1 %v2247_v9 }
 0x3e2   : > { %1072 = vrot.lane.b32.xlu0 %v894_v22, %s2251_s28  ;;  %1061 = vrot.lane.b32.xlu1 %v977_v25, %s2250_s26 }
 0x3e6   : > { %1146 = vrot.lane.b32.xlu0 %v977_v25, %s2251_s28  ;;  %1231 = vrot.lane.b32.xlu1 %v977_v25, %s2249_s13 }
 0x450   : > { %v1158_v27 = vpop.permute.xlu1 %1157  ;;  %v987_v28 = vpop.permute.xlu0 %986 }
 0x451   : > { %1807 = vmatmul.mubr.msk.f32.vlgmr.msra.gmra.mxu1 %vm896_vm12, %v987_v28  ;;  %v1707_v28 = vld [vmem:[%s2678_s9 + $0x2] ss:$0 sm:$0xff] }
 0x452   : > { %1810 = vmatpush3.msra.mxu1 %v1071_v26  ;;  %1811 = vmatprep.mubr.msk.f32.mxu1 %vm2248_vm9, %v2247_v9 }
 0x453   : > { %1814 = vmatprep.subr.mxu1 %v2247_v9 }
 0x454   : > { %v1073_v30 = vpop.permute.xlu0 %1072  ;;  %v1062_v31 = vpop.permute.xlu1 %1061 }
 0x455   : > { %1812 = vmatmul.mubr.msk.f32.vlgmr.msra.gmra.mxu1 %vm896_vm12, %v1073_v30  ;;  %v1064_v32 = vsel %vm896_vm12, %v1062_v31, 0.0  ;;  %v1708_v30 = vld [vmem:[%s2678_s9 + $0x3] ss:$0 sm:$0xff] }
 0x456   : > { %1815 = vmatpush3.msra.mxu1 %v1156_v29  ;;  %1065 = vadd.xlane.f32.xlu0 %v1064_v32 }
 0x457   : > { %1816 = vmatprep.mubr.msk.f32.mxu1 %vm2248_vm9, %v2247_v9  ;;  %1819 = vmatprep.subr.bf16.mxu1 %v2247_v9 }
 0x458   : > { %v1147_v33 = vpop.permute.xlu0 %1146  ;;  %v1232_v34 = vpop.permute.xlu1 %1231 }
 0x459   : > { %1817 = vmatmul.mubr.msk.f32.vlgmr.msra.gmra.mxu1 %vm896_vm12, %v1158_v27  ;;  %v1149_v35 = vsel %vm896_vm12, %v1147_v33, 0.0  ;;  %v1234_v36 = vsel %vm896_vm12, %v1232_v34, 0.0  ;;  %v1988_v34 = vld [vmem:[%s2677_s8 + $0x18] sm:$0xff]  }
 0x45a   : > { %1150 = vadd.xlane.f32.xlu1 %v1149_v35  ;;  %1235 = vadd.xlane.f32.xlu0 %v1234_v36  ;;  %v1989_v35 = vld [vmem:[%s2677_s8 + $0x10] sm:$0xff]   ;;  %v1990_v36 = vld [vmem:[%s2677_s8 + $0x8] sm:$0xff]  }
 0x45b   : > { %1823 = vmatprep.mubr.msk.bf16.mxu1 %vm2248_vm9, %v2247_v9  ;;  %1820 = vmatpush3.bf16.msra.mxu1 %v1984_v46 }
 0x45c   : > { %1821 = vmatprep.subr.bf16.mxu1 %v2247_v9  ;;  %1836 = vmatpush3.bf16.msra.mxu0 %v1988_v34 }
 0x45d   : > { %1837 = vmatprep.subr.bf16.mxu0 %v2247_v9 }
 0x45e   : > { %979 = vadd.xlane.f32.xlu0 %v978_v37  ;;  %v1991_v37 = vld [vmem:[%s2677_s8] sm:$0xff]  }
 0x45f   : > { %1822 = vmatpush3.bf16.msra.mxu1 %v1985_v47 }
 0x460   : > { %1827 = vmatprep.subr.bf16.mxu1 %v2247_v9  ;;  %1838 = vmatpush3.bf16.msra.mxu0 %v1989_v35 }
 0x461   : > { %1839 = vmatprep.subr.bf16.mxu0 %v2247_v9 }
 0x464   : > { %1840 = vmatpush3.bf16.msra.mxu0 %v1990_v36 }
 0x465   : > { %1841 = vmatprep.subr.bf16.mxu0 %v2247_v9 }
 0x468   : > { %1842 = vmatpush3.bf16.msra.mxu0 %v1991_v37 }
 0x49f   : > { %v966_v38 = vpop.f32.mrf.mxu1 }
 0x4a1   : > { %v1803_v39 = vpop.f32.mrf.mxu1 }
 0x4df   : > { %v1066_v40 = vpop.xlane.xlu0 %1065 }
 0x4e0   : > { %v1067_v41 = vadd.f32 1e-06, %v1066_v40 }
 0x4e2   : > { %1994 = vrcp.f32 %v1067_v41 }
 0x4e3   : > { %v1151_v42 = vpop.xlane.xlu1 %1150  ;;  %v1236_v44 = vpop.xlane.xlu0 %1235 }
 0x4e4   : > { %v1152_v43 = vadd.f32 1e-06, %v1151_v42  ;;  %v1237_v45 = vadd.f32 1e-06, %v1236_v44 }
 0x4e6   : > { %1996 = vrcp.f32 %v1152_v43 }
 0x4e7   : > { %1998 = vrcp.f32 %v1237_v45  ;;  %v980_v60 = vpop.xlane.xlu0 %979 }
 0x4e8   : > { %v981_v61 = vadd.f32 1e-06, %v980_v60 }
 0x4ea   : > { %2000 = vrcp.f32 %v981_v61 }
 0x4ef   : > { %v1995_v48 = vpop.eup %1994 }
 0x4f3   : > { %v1997_v52 = vpop.eup %1996 }
 0x4f4   : > { %v1999_v56 = vpop.eup %1998 }
 0x4f7   : > { %v2001_v62 = vpop.eup %2000 }
 0x4f8   : > { %v983_v1 = vmul.f32 %v2001_v62, %v966_v38  ;;  %v1709_v38 = vld [vmem:[#allocation12] ss:$0 sm:$0xff] }
 0x511   : > { %v1056_v49 = vpop.f32.mrf.mxu1 }
 0x512   : > { %v1069_v50 = vmul.f32 %v1995_v48, %v1056_v49 }
 0x513   : > { %v1808_v51 = vpop.f32.mrf.mxu1 }
 0x514   : > { %1241 = vrot.lane.b32.xlu1 %v1069_v50, %s2252_s12 }
 0x515   : > { %v1142_v53 = vpop.f32.mrf.mxu1 }
 0x516   : > { %v1154_v54 = vmul.f32 %v1997_v52, %v1142_v53 }
 0x517   : > { %v1813_v55 = vpop.f32.mrf.mxu1 }
 0x518   : > { %1245 = vrot.lane.b32.xlu0 %v1154_v54, %s2253_s15 }
 0x519   : > { %v1227_v57 = vpop.f32.mrf.mxu1 }
 0x51a   : > { %v1239_v58 = vmul.f32 %v1999_v56, %v1227_v57 }
 0x51b   : > { %v1818_v59 = vpop.f32.mrf.mxu1 }
 0x51c   : > { %1249 = vrot.lane.b32.xlu1 %v1239_v58, %s2254_s6 }
 0x586   : > { %v1242_v63 = vpop.permute.xlu1 %1241 }
 0x587   : > { %v1252_v3 = vsel %vm896_vm12, %v983_v1, %v1242_v63 }
 0x58a   : > { %v1246_v2 = vpop.permute.xlu0 %1245 }
 0x58b   : > { %v1254_v4 = vsel %vm1253_vm13, %v1252_v3, %v1246_v2 }
 0x58e   : > { %v1250_v5 = vpop.permute.xlu1 %1249 }
 0x58f   : > { %v1256_v6 = vsel %vm1255_vm14, %v1254_v4, %v1250_v5 }
 0x590   : > { %v1257_v7 = vpack.c.bf16 %v1256_v6, %v1256_v6 }
 0x592   : > { %1824 = vmatmul.mubr.msk.bf16.vlgmr.msra.gmra.mxu1 %vm845_vm10, %v1257_v7  ;;  %v1719_v7 = vld [vmem:[%s2678_s9 + $0x5] ss:$0 sm:$0xff] }
 0x593   : > { %1831 = vmatprep.mubr.msk.bf16.mxu1 %vm2248_vm9, %v2247_v9  ;;  %1828 = vmatpush3.bf16.msra.mxu1 %v1986_v23 }
 0x594   : > { %1829 = vmatprep.subr.bf16.mxu1 %v2247_v9  ;;  %v1713_v9 = vld [vmem:[%s2678_s9 + $0x4] ss:$0 sm:$0xff] }
 0x597   : > { %1830 = vmatpush3.bf16.msra.mxu1 %v1987_v24 }
 0x652   : > { %v1316_v11 = vpop.f32.mrf.mxu1 }
 0x653   : > { %v1317_v12 = vadd.f32 %v1703_v8, %v1316_v11 }
 0x654   : > { %v1825_v13 = vpop.f32.mrf.mxu1 }
 0x655   : > { %v1322_v14 = vadd.f32 %v1317_v12, %v823_v10  ;;  %v1720_v10 = vld [vmem:[%s2678_s9 + $0x6] ss:$0 sm:$0xff] }
 0x656   : > { %v1319_v15 = vpop.f32.mrf.mxu1 }
 0x657   : > { %v1325_v16 = vsel %vm845_vm10, %v1322_v14, 0.0 }
 0x658   : > { %v1826_v17 = vpop.f32.mrf.mxu1  ;;  %1326 = vadd.xlane.f32.xlu1 %v1325_v16 }
 0x6e1   : > { %v1327_v18 = vpop.xlane.xlu1 %1326 }
 0x6e2   : > { %v1329_v19 = vmul.f32 0.03125, %v1327_v18 }
 0x6e4   : > { %v1330_v20 = vsub.f32 %v1322_v14, %v1329_v19 }
 0x6e6   : > { %v1331_v21 = vmul.f32 %v1330_v20, %v1330_v20 }
 0x6e8   : > { %v1332_v22 = vsel %vm845_vm10, %v1331_v21, 0.0 }
 0x6e9   : > { %1333 = vadd.xlane.f32.xlu0 %v1332_v22 }
 0x772   : > { %v1334_v0 = vpop.xlane.xlu0 %1333 }
 0x773   : > { %v1335_v25 = vmul.f32 0.03125, %v1334_v0 }
 0x775   : > { %v1336_v26 = vadd.f32 1e-05, %v1335_v25 }
 0x777   : > { %2002 = vrsqrt.f32 %v1336_v26 }
 0x784   : > { %v2003_v27 = vpop.eup %2002 }
 0x785   : > { %v1338_v29 = vmul.f32 %v2003_v27, %v1330_v20 }
 0x787   : > { %v1343_v31 = vmul.f32 %v1707_v28, %v1338_v29 }
 0x789   : > { %v1348_v32 = vadd.f32 %v1708_v30, %v1343_v31 }
 0x78b   : > { %v1349_v33 = vpack.c.bf16 %v1348_v32, %v1348_v32 }
 0x78d   : > { %1832 = vmatmul.mubr.msk.bf16.vlgmr.msra.gmra.mxu1 %vm845_vm10, %v1349_v33 }
 0x84d   : > { %v1410_v39 = vpop.f32.mrf.mxu1 }
 0x84e   : > { %v1411_v40 = vadd.f32 %v1709_v38, %v1410_v39 }
 0x84f   : > { %v1833_v41 = vpop.f32.mrf.mxu1 }
 0x850   : > { %v1417_v42 = vmul.f32 0.044715, %v1411_v40  ;;  %v1416_v50 = vmul.f32 0.5, %v1411_v40 }
 0x851   : > { %v1413_v43 = vpop.f32.mrf.mxu1 }
 0x852   : > { %v1418_v44 = vmul.f32 %v1417_v42, %v1411_v40 }
 0x853   : > { %v1834_v45 = vpop.f32.mrf.mxu1 }
 0x854   : > { %v1419_v46 = vmul.f32 %v1418_v44, %v1411_v40 }
 0x856   : > { %v1420_v47 = vadd.f32 %v1419_v46, %v1411_v40 }
 0x858   : > { %v1421_v48 = vmul.f32 0.7978846, %v1420_v47 }
 0x85a   : > { %2004 = vtanh.f32 %v1421_v48 }
 0x867   : > { %v2005_v49 = vpop.eup %2004 }
 0x868   : > { %v1423_v51 = vadd.f32 1.0, %v2005_v49 }
 0x86a   : > { %v1424_v52 = vmul.f32 %v1423_v51, %v1416_v50 }
 0x86c   : > { %v1425_v53 = vpack.c.bf16 %v1424_v52, %v1424_v52 }
 0x86e   : > { %1844 = vmatmul.mubr.msk.bf16.vlgmr.msra.gmra.mxu0 %vm1463_vm15, %v1425_v53 }
 0x92e   : > { %v1501_v54 = vpop.f32.mrf.mxu0 }
 0x92f   : > { %v1502_v55 = vadd.f32 %v1713_v9, %v1501_v54 }
 0x930   : > { %v1845_v56 = vpop.f32.mrf.mxu0 }
 0x931   : > { %v1507_v57 = vadd.f32 %v1502_v55, %v1348_v32 }
 0x932   : > { %v1504_v58 = vpop.f32.mrf.mxu0 }
 0x933   : > { %v1510_v59 = vsel %vm845_vm10, %v1507_v57, 0.0 }
 0x934   : > { %1511 = vadd.xlane.f32.xlu0 %v1510_v59  ;;  %v1846_v60 = vpop.f32.mrf.mxu0 }
 0x9bd   : > { %v1512_v61 = vpop.xlane.xlu0 %1511 }
 0x9be   : > { %v1513_v62 = vmul.f32 0.03125, %v1512_v61 }
 0x9c0   : > { %v1514_v63 = vsub.f32 %v1507_v57, %v1513_v62 }
 0x9c2   : > { %v1515_v1 = vmul.f32 %v1514_v63, %v1514_v63 }
 0x9c4   : > { %v1516_v2 = vsel %vm845_vm10, %v1515_v1, 0.0 }
 0x9c5   : > { %1517 = vadd.xlane.f32.xlu1 %v1516_v2 }
 0xa4e   : > { %v1518_v3 = vpop.xlane.xlu1 %1517 }
 0xa4f   : > { %v1519_v4 = vmul.f32 0.03125, %v1518_v3 }
 0xa51   : > { %v1520_v5 = vadd.f32 1e-05, %v1519_v4 }
 0xa53   : > { %2006 = vrsqrt.f32 %v1520_v5 }
 0xa60   : > { %v2007_v6 = vpop.eup %2006 }
 0xa61   : > { %v1522_v8 = vmul.f32 %v2007_v6, %v1514_v63 }
 0xa63   : > { %v1527_v11 = vmul.f32 %v1719_v7, %v1522_v8 }
 0xa65   : > { %v1532_v12 = vadd.f32 %v1720_v10, %v1527_v11 }
 0xa67   : > { %v1533_v13 = vpack.c.bf16 %v1532_v12, %v1532_v12 }
 0xa69   : > { %1535 = vst.msk [vmem:[%s2486_s0] sm:$0xf] %vm1534_vm0, %v1533_v13 }
 0xa6a PF: > { %s1722_s28 = sshll.u32 %s2216_s20, 6  ;;  %s1552_s16 = sshll.u32 %s2486_s0, 4  ;;  %s1553_s16 = int_to_ptr.vmem [resolvable:$true] %s1552_s16 }
 0xa6b   : > { %s1550_s23 = scalar_lea.hbm %s2679_s10, %s1722_s28  ;;  %s1537_s12 = scalar_lea.sflag [#allocation8], %s2464_s14 }
 0xa6c   : > { %s2122_s15 = scalar_lea.vmem %s1553_s16, 64  ;;  %p2702_p10 = scmp.ne.s32.totalorder %s2700_s4, 0 }
 0xa6d   : > { %p2123_p9 = scmp.ne.s32.totalorder %s1553_s16, %s2122_s15  ;;  %s2255_s6 = smov [#allocation14]  }
 0xa6e   : > { %s2126_s25 = sshll.u32 %s2255_s6, 4  ;;  %s2127_s25 = int_to_ptr.vmem [resolvable:$false] %s2126_s25 }
 0xa6f   : > { %p2124_p13 = pnand %p2123_p9, %p2702_p10  ;;  %s2128_s27 = scalar_lea.vmem %s2127_s25, 128 }
 0xa70   : > { %p2129_p0 = scmp.lt.s32.totalorder %s1553_s16, %s2127_s25  ;;  %p2130_p5 = scmp.lt.s32.totalorder %s2128_s27, %s2122_s15 }
 0xa71   : > { %p2125_p2 = pneg %p2124_p13 }
 0xa72   : > { %p2131_p11 = por %p2130_p5, %p2129_p0 }
 0xa74   : > { %p2132_p7 = pnand %p2131_p11, %p2125_p2 }
 0xa76   : > { %2135 = shalt.err (!%p2132_p7)
}
 0xa77   : > { %s2136_s20 = scalar_lea.hbm %s1550_s23, 64  ;;  %s2140_s19 = scalar_lea.hbm %s2679_s10, 128 }
 0xa78   : > { %p2137_p6 = scmp.ne.s32.totalorder %s1550_s23, %s2136_s20  ;;  %p2141_p8 = scmp.lt.s32.totalorder %s1550_s23, %s2679_s10 }
 0xa79   : > { %p2142_p1 = scmp.lt.s32.totalorder %s2140_s19, %s2136_s20 }
 0xa7a   : > { %p2138_p12 = pnand %p2137_p6, %p2702_p10 }
 0xa7b   : > { %p2143_p4 = por %p2142_p1, %p2141_p8 }
 0xa7c   : > { %p2139_p3 = pneg %p2138_p12 }
 0xa7e   : > { %p2144_p9 = pnand %p2143_p4, %p2139_p3 }
 0xa80   : > { %2147 = shalt.err (!%p2144_p9)
}
 0xa81   : > { %1861 = dma.vmem_to_hbm [thread:$0]  (%p2702_p10), %s1553_s16, 64, %s1550_s23, %s1537_s12  }
 0xa82 PF: > { %s2703_s26 = sld [smem:[#allocation20_spill]]  ;;  %p1888_p13 = scmp.ge.s32.totalorder %s2228_s22, 2 }
 0xa83   : > { %s2704_s28 = sld [smem:[#allocation22_spill]] }
 0xa88   : > { %s1564_s11 = sand.u32 1, %s2703_s26  }
 0xa89   : > { %p2705_p2 = scmp.ne.s32.totalorder %s2704_s28, 0  ;;  %s1565_s30 = scalar_lea.sflag [#allocation8], %s1564_s11 }
 0xa8b   : > { %p1878_p0 = pnand %p1888_p13, %p2705_p2 }
 0xa8d   : > { %p1879_p5 = pneg %p1878_p0 }
 0xa8f   : > { %2195 = dma.done.wait (%p1879_p5), %s1565_s30, 64  }
 0xa90   : > { %2197 = vsyncadd (%p1879_p5), %s1565_s30, 4294967232  ;;  %s32_s22 = sadd.s32 1, %s2228_s22   ;;  %s2706_s19 = sld [smem:[#allocation21_spill]] }
 0xa91   : > { %p29_p11 = scmp.ge.s32.totalorder %s32_s22, 6   ;;  %s2707_s0 = sld [smem:[#allocation23_spill]] }
 0xa92   : > { %s2708_s16 = smov %s2204_s17  ;;  %s2709_s17 = smov %s2208_s18 }
 0xa93   : > { %s2710_s18 = smov %s2449_s7  ;;  %s2711_s20 = smov %s2224_s21 }
 0xa94   : > { %s2712_s21 = smov %s2718_s24  ;;  %31 = sbr.rel (!%p29_p11) target bundleno = 17 (0x11), region = 131 }
 0xa99   :  { %1570 = vsyncpa [#allocation7], 1 }
 0xa9a   :  { %1572 = vsyncpa [#allocation7 + $0x1], 1 }
 0xa9b   :  { %1573 = vsyncpa [#allocation10], 1 }
 0xa9c   :  { %1574 = vsyncpa [#allocation13], 1 }
 0xa9d   :  { %1575 = vsyncpa [#allocation8], 1 }
 0xa9e   :  { %1577 = vsyncpa [#allocation8 + $0x1], 1 }

</bundles_post_ra>
